<compile_context>
chip_gen: v7x
topology: tpu7x:2x2x1
jax: 0.10.0
libtpu: 0.0.40
codegen_flags: <defaults>
</compile_context>

<pallas_src>
import functools
import math

import numpy as np

import jax
import jax.numpy as jnp
from jax.experimental import pallas as pl
from jax.experimental.pallas import tpu as pltpu


# ----------------------------------------------------------------------------
# small helpers
# ----------------------------------------------------------------------------
def _round_up(x, m):
    return (x + m - 1) // m * m


def _pad_axis(x, axis, target):
    pad = target - x.shape[axis]
    if pad == 0:
        return x
    widths = [(0, 0)] * x.ndim
    widths[axis] = (0, pad)
    return jnp.pad(x, widths)


def _choose_batch_tiling(batch, max_tile=256):
    """Batch tiles are multiples of 16 (bf16 sublane packing), capped at
    max_tile (keeps activation tiles comfortable for v7x's 64 MiB VMEM).  The
    batch is zero-padded up to a multiple of the tile instead of searching for
    exact divisors; when the batch is large enough this yields >=2 grid blocks
    so both v7x TensorCores get work via dimension_semantics=("parallel",)."""
    if batch <= 16:
        tile = 16
    else:
        tile = min(max_tile, _round_up((batch + 1) // 2, 16))
    return tile, _round_up(batch, tile)


# ----------------------------------------------------------------------------
# conv -> dense "conv + pool-phase" matmul folding (one-time, at prep)
# ----------------------------------------------------------------------------
def _dense_conv_pool_matrix(w_oihw, H, W):
    """Express a 3x3 / pad-1 / stride-1 conv on a fixed HxW grid as a dense
    matmul (H*W*Cin) -> (4 * (H//2)*(W//2) * Cout), with output columns grouped
    by 2x2 max-pool phase so pooling becomes an elementwise max of 4 aligned
    lane slabs inside the kernel.  Input ordering is (h, w, cin) row-major;
    output ordering inside each phase slab is (ho, wo, cout) row-major."""
    w = np.asarray(w_oihw, dtype=np.float32)            # (Cout, Cin, 3, 3)
    Cout, Cin, _, _ = w.shape
    Ho, Wo = H // 2, W // 2
    D = np.zeros((H * W * Cin, 4 * Ho * Wo * Cout), dtype=np.float32)
    for oh in range(H):
        for ow in range(W):
            phase = (oh % 2) * 2 + (ow % 2)
            q = phase * (Ho * Wo) + (oh // 2) * Wo + (ow // 2)
            for kh in range(3):
                ih = oh + kh - 1
                if ih < 0 or ih >= H:
                    continue
                for kw in range(3):
                    iw = ow + kw - 1
                    if iw < 0 or iw >= W:
                        continue
                    r0 = (ih * W + iw) * Cin
                    D[r0:r0 + Cin, q * Cout:(q + 1) * Cout] = w[:, :, kh, kw].T
    return jnp.asarray(D)


def _bn_affine(gamma, beta, running_mean, running_var, eps=1e-5):
    """Fold eval-mode BatchNorm1d into (scale, shift)."""
    scale = gamma / jnp.sqrt(running_var + eps)
    shift = beta - running_mean * scale
    return scale, shift


# ----------------------------------------------------------------------------
# the fused Pallas kernel
# ----------------------------------------------------------------------------
def _vgg_ic_fused_kernel(x_ref,
                         cw1_ref, cb1_ref,
                         cw2_ref, cb2_ref,
                         s1_ref, t1_ref, w1_ref, b1_ref,
                         s2_ref, t2_ref, w2_ref, b2_ref,
                         s3_ref, t3_ref, hw_ref, hb_ref,
                         o_ref):
    """Whole VGG_IC forward for one batch tile, fully fused on-chip.

    Convs are dense matmuls over the fixed tiny feature maps with columns
    grouped by 2x2 pool phase -> pooling is a max of four 128-aligned lane
    slabs; bias/ReLU commute with that max so they are applied once after it.
    GEMMs in bf16 (MXU) with f32 accumulation; BN/bias/ReLU epilogues in f32.
    """

    def pool4(h, slab):
        a = jnp.maximum(h[:, 0 * slab:1 * slab], h[:, 1 * slab:2 * slab])
        b = jnp.maximum(h[:, 2 * slab:3 * slab], h[:, 3 * slab:4 * slab])
        return jnp.maximum(a, b)

    # --- features: Conv(3->64)+ReLU+Pool, Conv(64->512)+ReLU+Pool -----------
    h = jnp.dot(x_ref[...].astype(jnp.bfloat16), cw1_ref[...],
                preferred_element_type=jnp.float32)           # (T, 4*2*2*64)
    h = jnp.maximum(pool4(h, 256) + cb1_ref[...], 0.0)        # (T, 256)

    h = jnp.dot(h.astype(jnp.bfloat16), cw2_ref[...],
                preferred_element_type=jnp.float32)           # (T, 4*512)
    h = jnp.maximum(pool4(h, 512) + cb2_ref[...], 0.0)        # (T, 512)

    # --- classifier: (IC -> Linear -> ReLU) x2 -> IC -> head Linear ---------
    h = h * s1_ref[...] + t1_ref[...]
    h = jnp.dot(h.astype(jnp.bfloat16), w1_ref[...],
                preferred_element_type=jnp.float32)
    h = jnp.maximum(h + b1_ref[...], 0.0)

    h = h * s2_ref[...] + t2_ref[...]
    h = jnp.dot(h.astype(jnp.bfloat16), w2_ref[...],
                preferred_element_type=jnp.float32)
    h = jnp.maximum(h + b2_ref[...], 0.0)

    h = h * s3_ref[...] + t3_ref[...]
    h = jnp.dot(h.astype(jnp.bfloat16), hw_ref[...],
                preferred_element_type=jnp.float32)
    o_ref[...] = h + hb_ref[...]                              # (T, 128)


_PARAM_ORDER = ("cw1", "cb1", "cw2", "cb2",
                "s1", "t1", "w1", "b1",
                "s2", "t2", "w2", "b2",
                "s3", "t3", "head_w", "head_b")


def _fused_forward(x_pad, cp, tile_b):
    """x_pad: (B_pad, K1) f32, B_pad % tile_b == 0.  Returns (B_pad, Np) f32."""
    b_pad, k1 = x_pad.shape
    np_out = cp["head_w"].shape[1]
    grid = (b_pad // tile_b,)

    row = lambda i: (i, 0)
    const = lambda i: (0, 0)

    gemm_weight_elems = sum(int(cp[k].size)
                            for k in ("cw1", "cw2", "w1", "w2", "head_w"))
    param_bytes = sum(int(v.size) * v.dtype.itemsize for v in cp.values())
    cost = pl.CostEstimate(
        flops=2 * b_pad * gemm_weight_elems,
        transcendentals=0,
        bytes_accessed=int(x_pad.size) * 4 + param_bytes + b_pad * np_out * 4,
    )

    in_specs = [pl.BlockSpec((tile_b, k1), row)]
    in_specs += [pl.BlockSpec(cp[name].shape, const) for name in _PARAM_ORDER]

    return pl.pallas_call(
        _vgg_ic_fused_kernel,
        out_shape=jax.ShapeDtypeStruct((b_pad, np_out), jnp.float32),
        grid=grid,
        in_specs=in_specs,
        out_specs=pl.BlockSpec((tile_b, np_out), row),
        compiler_params=pltpu.CompilerParams(
            dimension_semantics=("parallel",)),
        cost_estimate=cost,
    )(x_pad, *[cp[name] for name in _PARAM_ORDER])


# ----------------------------------------------------------------------------
# parameter preparation (one-time, outside the hot path)
# ----------------------------------------------------------------------------
def prepare_params(p, num_classes):
    """Fold BN / conv structure, pad & bf16-cast weights once."""
    cp = {}

    # features cfg [64, 'M', 512, 'M'] on a 4x4 input (flatten -> 512):
    # conv1 on a 4x4 grid, conv2 on the pooled 2x2 grid.
    cw1 = _dense_conv_pool_matrix(p["conv1_w"], H=4, W=4)      # (48, 1024)
    cw1 = _pad_axis(cw1, 0, _round_up(cw1.shape[0], 128))      # K 48 -> 128
    cp["cw1"] = cw1.astype(jnp.bfloat16)
    cp["cb1"] = jnp.tile(p["conv1_b"], 4).reshape(1, -1).astype(jnp.float32)

    cw2 = _dense_conv_pool_matrix(p["conv2_w"], H=2, W=2)      # (256, 2048)
    cp["cw2"] = cw2.astype(jnp.bfloat16)
    cp["cb2"] = p["conv2_b"].reshape(1, -1).astype(jnp.float32)

    for i in (1, 2, 3):
        s, t = _bn_affine(p[f"bn{i}_g"], p[f"bn{i}_b"],
                          p[f"bn{i}_m"], p[f"bn{i}_v"])
        cp[f"s{i}"] = s.reshape(1, -1).astype(jnp.float32)
        cp[f"t{i}"] = t.reshape(1, -1).astype(jnp.float32)

    cp["w1"] = p["lin1_w"].astype(jnp.bfloat16)
    cp["b1"] = p["lin1_b"].reshape(1, -1).astype(jnp.float32)
    cp["w2"] = p["lin2_w"].astype(jnp.bfloat16)
    cp["b2"] = p["lin2_b"].reshape(1, -1).astype(jnp.float32)

    ncp = _round_up(num_classes, 128)                          # lane-dense head
    cp["head_w"] = _pad_axis(p["head_w"], 1, ncp).astype(jnp.bfloat16)
    cp["head_b"] = _pad_axis(p["head_b"], 0, ncp).reshape(1, ncp).astype(jnp.float32)
    return cp


# ----------------------------------------------------------------------------
# Model forward
# ----------------------------------------------------------------------------
@functools.partial(jax.jit, static_argnames=("num_classes",))
def vgg_ic_forward(x_nchw, cp, *, num_classes):
    n, c, h, w = x_nchw.shape
    # The dense conv matrices in cp are specialized to the 4x4x3 input implied
    # by this features config (features must flatten to 512 for the classifier).
    assert (c, h, w) == (3, 4, 4), (c, h, w)

    x = jnp.transpose(x_nchw, (0, 2, 3, 1)).astype(jnp.float32)   # NCHW -> NHWC
    x = x.reshape(n, h * w * c)                                   # (h, w, c) order

    k1 = cp["cw1"].shape[0]
    tile_b, b_pad = _choose_batch_tiling(n)
    x = jnp.pad(x, ((0, b_pad - n), (0, k1 - h * w * c)))         # zero rows/cols

    logits = _fused_forward(x, cp, tile_b)
    return logits[:n, :num_classes]


# ----------------------------------------------------------------------------
# pure-JAX f32 reference (for validation only)
# ----------------------------------------------------------------------------
def vgg_ic_reference(x_nchw, p, num_classes):
    x = x_nchw.astype(jnp.float32)

    def conv_relu_pool(x, w, b):
        y = jax.lax.conv_general_dilated(
            x, w, window_strides=(1, 1), padding=((1, 1), (1, 1)),
            dimension_numbers=("NCHW", "OIHW", "NCHW"))
        y = jax.nn.relu(y + b.reshape(1, -1, 1, 1))
        return jax.lax.reduce_window(y, -jnp.inf, jax.lax.max,
                                     (1, 1, 2, 2), (1, 1, 2, 2), "VALID")

    x = conv_relu_pool(x, p["conv1_w"], p["conv1_b"])
    x = conv_relu_pool(x, p["conv2_w"], p["conv2_b"])
    h = x.reshape(x.shape[0], -1)

    def bn(h, i):
        s, t = _bn_affine(p[f"bn{i}_g"], p[f"bn{i}_b"],
                          p[f"bn{i}_m"], p[f"bn{i}_v"])
        return h * s + t

    h = bn(h, 1)
    h = jax.nn.relu(h @ p["lin1_w"] + p["lin1_b"])
    h = bn(h, 2)
    h = jax.nn.relu(h @ p["lin2_w"] + p["lin2_b"])
    h = bn(h, 3)
    return h @ p["head_w"] + p["head_b"]


# ----------------------------------------------------------------------------
# parameter init (mimics the PyTorch module's init)
# ----------------------------------------------------------------------------
def init_params(key, num_classes):
    ks = jax.random.split(key, 8)
    f32 = jnp.float32

    def linear_init(k, fan_in, fan_out):
        bound = 1.0 / math.sqrt(fan_in)
        kw, kb = jax.random.split(k)
        w = jax.random.uniform(kw, (fan_in, fan_out), f32, -bound, bound)
        b = jax.random.uniform(kb, (fan_out,), f32, -bound, bound)
        return w, b

    p = {}
    # Conv init per module: normal(0, sqrt(2/(kh*kw*Cout))), bias zero
    p["conv1_w"] = jax.random.normal(ks[0], (64, 3, 3, 3), f32) * math.sqrt(2.0 / (3 * 3 * 64))
    p["conv1_b"] = jnp.zeros((64,), f32)
    p["conv2_w"] = jax.random.normal(ks[1], (512, 64, 3, 3), f32) * math.sqrt(2.0 / (3 * 3 * 512))
    p["conv2_b"] = jnp.zeros((512,), f32)

    p["lin1_w"], p["lin1_b"] = linear_init(ks[2], 512, 512)
    p["lin2_w"], p["lin2_b"] = linear_init(ks[3], 512, 512)
    p["head_w"], p["head_b"] = linear_init(ks[4], 512, num_classes)

    # BatchNorm1d(512) default init / running stats (eval mode)
    for i in (1, 2, 3):
        p[f"bn{i}_g"] = jnp.ones((512,), f32)
        p[f"bn{i}_b"] = jnp.zeros((512,), f32)
        p[f"bn{i}_m"] = jnp.zeros((512,), f32)
        p[f"bn{i}_v"] = jnp.ones((512,), f32)
    return p


if __name__ == "__main__":
    num_classes = 10
    key = jax.random.PRNGKey(0)
    k_params, k_x = jax.random.split(key)

    params = init_params(k_params, num_classes)
    cp = prepare_params(params, num_classes)

    # Small NCHW input (PyTorch convention): batch=2, channels=3, spatial=4x4
    # -> features output flattens to exactly 512 as the classifier requires.
    x = jax.random.normal(k_x, (2, 3, 4, 4), jnp.float32)

    logits = vgg_ic_forward(x, cp, num_classes=num_classes)
    logits = jax.block_until_ready(logits)
    assert logits.shape == (2, num_classes), logits.shape
    assert bool(jnp.all(jnp.isfinite(logits)))

    # Cross-check against the pure-JAX f32 reference (loose tolerance: GEMMs
    # run in bf16 on the MXU with f32 accumulation).
    ref = vgg_ic_reference(x, params, num_classes)
    rel_err = float(jnp.max(jnp.abs(logits - ref)) /
                    (jnp.max(jnp.abs(ref)) + 1e-6))
    assert rel_err < 0.1, rel_err

    print("KERNEL_OK")
</pallas_src>

<mosaic_0001>
module attributes {stable_mosaic.version = 11 : i64} {
  func.func @_vgg_ic_fused_kernel(%arg0: i32, %arg1: memref<16x128xf32, #tpu.memory_space<vmem>>, %arg2: memref<128x1024xbf16, #tpu.memory_space<vmem>>, %arg3: memref<1x256xf32, #tpu.memory_space<vmem>>, %arg4: memref<256x2048xbf16, #tpu.memory_space<vmem>>, %arg5: memref<1x512xf32, #tpu.memory_space<vmem>>, %arg6: memref<1x512xf32, #tpu.memory_space<vmem>>, %arg7: memref<1x512xf32, #tpu.memory_space<vmem>>, %arg8: memref<512x512xbf16, #tpu.memory_space<vmem>>, %arg9: memref<1x512xf32, #tpu.memory_space<vmem>>, %arg10: memref<1x512xf32, #tpu.memory_space<vmem>>, %arg11: memref<1x512xf32, #tpu.memory_space<vmem>>, %arg12: memref<512x512xbf16, #tpu.memory_space<vmem>>, %arg13: memref<1x512xf32, #tpu.memory_space<vmem>>, %arg14: memref<1x512xf32, #tpu.memory_space<vmem>>, %arg15: memref<1x512xf32, #tpu.memory_space<vmem>>, %arg16: memref<512x128xbf16, #tpu.memory_space<vmem>>, %arg17: memref<1x128xf32, #tpu.memory_space<vmem>>, %arg18: memref<16x128xf32, #tpu.memory_space<vmem>>) attributes {dimension_semantics = [#tpu.dimension_semantics<parallel>], iteration_bounds = array<i64: 1>, scalar_prefetch = 0 : i64, scratch_operands = 0 : i64, tpu.core_type = #tpu.core_type<tc>, window_params = [{transform_indices = @transform_0, window_bounds = array<i64: 16, 128>}, {pipeline_mode = #tpu.pipeline_mode<synchronous>, transform_indices = @transform_1, window_bounds = array<i64: 128, 1024>}, {pipeline_mode = #tpu.pipeline_mode<synchronous>, transform_indices = @transform_2, window_bounds = array<i64: 1, 256>}, {pipeline_mode = #tpu.pipeline_mode<synchronous>, transform_indices = @transform_3, window_bounds = array<i64: 256, 2048>}, {pipeline_mode = #tpu.pipeline_mode<synchronous>, transform_indices = @transform_4, window_bounds = array<i64: 1, 512>}, {pipeline_mode = #tpu.pipeline_mode<synchronous>, transform_indices = @transform_5, window_bounds = array<i64: 1, 512>}, {pipeline_mode = #tpu.pipeline_mode<synchronous>, transform_indices = @transform_6, window_bounds = array<i64: 1, 512>}, {pipeline_mode = #tpu.pipeline_mode<synchronous>, transform_indices = @transform_7, window_bounds = array<i64: 512, 512>}, {pipeline_mode = #tpu.pipeline_mode<synchronous>, transform_indices = @transform_8, window_bounds = array<i64: 1, 512>}, {pipeline_mode = #tpu.pipeline_mode<synchronous>, transform_indices = @transform_9, window_bounds = array<i64: 1, 512>}, {pipeline_mode = #tpu.pipeline_mode<synchronous>, transform_indices = @transform_10, window_bounds = array<i64: 1, 512>}, {pipeline_mode = #tpu.pipeline_mode<synchronous>, transform_indices = @transform_11, window_bounds = array<i64: 512, 512>}, {pipeline_mode = #tpu.pipeline_mode<synchronous>, transform_indices = @transform_12, window_bounds = array<i64: 1, 512>}, {pipeline_mode = #tpu.pipeline_mode<synchronous>, transform_indices = @transform_13, window_bounds = array<i64: 1, 512>}, {pipeline_mode = #tpu.pipeline_mode<synchronous>, transform_indices = @transform_14, window_bounds = array<i64: 1, 512>}, {pipeline_mode = #tpu.pipeline_mode<synchronous>, transform_indices = @transform_15, window_bounds = array<i64: 512, 128>}, {pipeline_mode = #tpu.pipeline_mode<synchronous>, transform_indices = @transform_16, window_bounds = array<i64: 1, 128>}, {transform_indices = @transform_17, window_bounds = array<i64: 16, 128>}]} {
    %c0 = arith.constant 0 : index
    %c0_0 = arith.constant 0 : index
    %0 = vector.load %arg1[%c0, %c0_0] : memref<16x128xf32, #tpu.memory_space<vmem>>, vector<16x128xf32>
    %1 = arith.truncf %0 : vector<16x128xf32> to vector<16x128xbf16>
    %c0_1 = arith.constant 0 : index
    %c0_2 = arith.constant 0 : index
    %2 = vector.load %arg2[%c0_1, %c0_2] : memref<128x1024xbf16, #tpu.memory_space<vmem>>, vector<128x1024xbf16>
    %cst = arith.constant dense<0.000000e+00> : vector<16x1024xf32>
    %3 = tpu.matmul %1, %2, %cst {dimension_numbers = #tpu.dot_dimension_numbers<[1], [0], [0], [1], [0, 0, 1, 1], [], []>} : vector<16x128xbf16>, vector<128x1024xbf16>, vector<16x1024xf32> -> vector<16x1024xf32>
    %4 = vector.extract_strided_slice %3 {offsets = [0, 0], sizes = [16, 256], strides = [1, 1]} : vector<16x1024xf32> to vector<16x256xf32>
    %5 = vector.extract_strided_slice %3 {offsets = [0, 256], sizes = [16, 256], strides = [1, 1]} : vector<16x1024xf32> to vector<16x256xf32>
    %6 = arith.maximumf %4, %5 : vector<16x256xf32>
    %7 = vector.extract_strided_slice %3 {offsets = [0, 512], sizes = [16, 256], strides = [1, 1]} : vector<16x1024xf32> to vector<16x256xf32>
    %8 = vector.extract_strided_slice %3 {offsets = [0, 768], sizes = [16, 256], strides = [1, 1]} : vector<16x1024xf32> to vector<16x256xf32>
    %9 = arith.maximumf %7, %8 : vector<16x256xf32>
    %10 = arith.maximumf %6, %9 : vector<16x256xf32>
    %c0_3 = arith.constant 0 : index
    %c0_4 = arith.constant 0 : index
    %11 = vector.load %arg3[%c0_3, %c0_4] : memref<1x256xf32, #tpu.memory_space<vmem>>, vector<1x256xf32>
    %12 = vector.broadcast %11 : vector<1x256xf32> to vector<16x256xf32>
    %13 = arith.addf %10, %12 : vector<16x256xf32>
    %cst_5 = arith.constant 0.000000e+00 : f32
    %14 = vector.broadcast %cst_5 : f32 to vector<16x256xf32>
    %15 = arith.maximumf %13, %14 : vector<16x256xf32>
    %16 = arith.truncf %15 : vector<16x256xf32> to vector<16x256xbf16>
    %c0_6 = arith.constant 0 : index
    %c0_7 = arith.constant 0 : index
    %17 = vector.load %arg4[%c0_6, %c0_7] : memref<256x2048xbf16, #tpu.memory_space<vmem>>, vector<256x2048xbf16>
    %cst_8 = arith.constant dense<0.000000e+00> : vector<16x2048xf32>
    %18 = tpu.matmul %16, %17, %cst_8 {dimension_numbers = #tpu.dot_dimension_numbers<[1], [0], [0], [1], [0, 0, 1, 1], [], []>} : vector<16x256xbf16>, vector<256x2048xbf16>, vector<16x2048xf32> -> vector<16x2048xf32>
    %19 = vector.extract_strided_slice %18 {offsets = [0, 0], sizes = [16, 512], strides = [1, 1]} : vector<16x2048xf32> to vector<16x512xf32>
    %20 = vector.extract_strided_slice %18 {offsets = [0, 512], sizes = [16, 512], strides = [1, 1]} : vector<16x2048xf32> to vector<16x512xf32>
    %21 = arith.maximumf %19, %20 : vector<16x512xf32>
    %22 = vector.extract_strided_slice %18 {offsets = [0, 1024], sizes = [16, 512], strides = [1, 1]} : vector<16x2048xf32> to vector<16x512xf32>
    %23 = vector.extract_strided_slice %18 {offsets = [0, 1536], sizes = [16, 512], strides = [1, 1]} : vector<16x2048xf32> to vector<16x512xf32>
    %24 = arith.maximumf %22, %23 : vector<16x512xf32>
    %25 = arith.maximumf %21, %24 : vector<16x512xf32>
    %c0_9 = arith.constant 0 : index
    %c0_10 = arith.constant 0 : index
    %26 = vector.load %arg5[%c0_9, %c0_10] : memref<1x512xf32, #tpu.memory_space<vmem>>, vector<1x512xf32>
    %27 = vector.broadcast %26 : vector<1x512xf32> to vector<16x512xf32>
    %28 = arith.addf %25, %27 : vector<16x512xf32>
    %cst_11 = arith.constant 0.000000e+00 : f32
    %29 = vector.broadcast %cst_11 : f32 to vector<16x512xf32>
    %30 = arith.maximumf %28, %29 : vector<16x512xf32>
    %c0_12 = arith.constant 0 : index
    %c0_13 = arith.constant 0 : index
    %31 = vector.load %arg6[%c0_12, %c0_13] : memref<1x512xf32, #tpu.memory_space<vmem>>, vector<1x512xf32>
    %32 = vector.broadcast %31 : vector<1x512xf32> to vector<16x512xf32>
    %33 = arith.mulf %30, %32 : vector<16x512xf32>
    %c0_14 = arith.constant 0 : index
    %c0_15 = arith.constant 0 : index
    %34 = vector.load %arg7[%c0_14, %c0_15] : memref<1x512xf32, #tpu.memory_space<vmem>>, vector<1x512xf32>
    %35 = vector.broadcast %34 : vector<1x512xf32> to vector<16x512xf32>
    %36 = arith.addf %33, %35 : vector<16x512xf32>
    %37 = arith.truncf %36 : vector<16x512xf32> to vector<16x512xbf16>
    %c0_16 = arith.constant 0 : index
    %c0_17 = arith.constant 0 : index
    %38 = vector.load %arg8[%c0_16, %c0_17] : memref<512x512xbf16, #tpu.memory_space<vmem>>, vector<512x512xbf16>
    %cst_18 = arith.constant dense<0.000000e+00> : vector<16x512xf32>
    %39 = tpu.matmul %37, %38, %cst_18 {dimension_numbers = #tpu.dot_dimension_numbers<[1], [0], [0], [1], [0, 0, 1, 1], [], []>} : vector<16x512xbf16>, vector<512x512xbf16>, vector<16x512xf32> -> vector<16x512xf32>
    %c0_19 = arith.constant 0 : index
    %c0_20 = arith.constant 0 : index
    %40 = vector.load %arg9[%c0_19, %c0_20] : memref<1x512xf32, #tpu.memory_space<vmem>>, vector<1x512xf32>
    %41 = vector.broadcast %40 : vector<1x512xf32> to vector<16x512xf32>
    %42 = arith.addf %39, %41 : vector<16x512xf32>
    %cst_21 = arith.constant 0.000000e+00 : f32
    %43 = vector.broadcast %cst_21 : f32 to vector<16x512xf32>
    %44 = arith.maximumf %42, %43 : vector<16x512xf32>
    %c0_22 = arith.constant 0 : index
    %c0_23 = arith.constant 0 : index
    %45 = vector.load %arg10[%c0_22, %c0_23] : memref<1x512xf32, #tpu.memory_space<vmem>>, vector<1x512xf32>
    %46 = vector.broadcast %45 : vector<1x512xf32> to vector<16x512xf32>
    %47 = arith.mulf %44, %46 : vector<16x512xf32>
    %c0_24 = arith.constant 0 : index
    %c0_25 = arith.constant 0 : index
    %48 = vector.load %arg11[%c0_24, %c0_25] : memref<1x512xf32, #tpu.memory_space<vmem>>, vector<1x512xf32>
    %49 = vector.broadcast %48 : vector<1x512xf32> to vector<16x512xf32>
    %50 = arith.addf %47, %49 : vector<16x512xf32>
    %51 = arith.truncf %50 : vector<16x512xf32> to vector<16x512xbf16>
    %c0_26 = arith.constant 0 : index
    %c0_27 = arith.constant 0 : index
    %52 = vector.load %arg12[%c0_26, %c0_27] : memref<512x512xbf16, #tpu.memory_space<vmem>>, vector<512x512xbf16>
    %cst_28 = arith.constant dense<0.000000e+00> : vector<16x512xf32>
    %53 = tpu.matmul %51, %52, %cst_28 {dimension_numbers = #tpu.dot_dimension_numbers<[1], [0], [0], [1], [0, 0, 1, 1], [], []>} : vector<16x512xbf16>, vector<512x512xbf16>, vector<16x512xf32> -> vector<16x512xf32>
    %c0_29 = arith.constant 0 : index
    %c0_30 = arith.constant 0 : index
    %54 = vector.load %arg13[%c0_29, %c0_30] : memref<1x512xf32, #tpu.memory_space<vmem>>, vector<1x512xf32>
    %55 = vector.broadcast %54 : vector<1x512xf32> to vector<16x512xf32>
    %56 = arith.addf %53, %55 : vector<16x512xf32>
    %cst_31 = arith.constant 0.000000e+00 : f32
    %57 = vector.broadcast %cst_31 : f32 to vector<16x512xf32>
    %58 = arith.maximumf %56, %57 : vector<16x512xf32>
    %c0_32 = arith.constant 0 : index
    %c0_33 = arith.constant 0 : index
    %59 = vector.load %arg14[%c0_32, %c0_33] : memref<1x512xf32, #tpu.memory_space<vmem>>, vector<1x512xf32>
    %60 = vector.broadcast %59 : vector<1x512xf32> to vector<16x512xf32>
    %61 = arith.mulf %58, %60 : vector<16x512xf32>
    %c0_34 = arith.constant 0 : index
    %c0_35 = arith.constant 0 : index
    %62 = vector.load %arg15[%c0_34, %c0_35] : memref<1x512xf32, #tpu.memory_space<vmem>>, vector<1x512xf32>
    %63 = vector.broadcast %62 : vector<1x512xf32> to vector<16x512xf32>
    %64 = arith.addf %61, %63 : vector<16x512xf32>
    %65 = arith.truncf %64 : vector<16x512xf32> to vector<16x512xbf16>
    %c0_36 = arith.constant 0 : index
    %c0_37 = arith.constant 0 : index
    %66 = vector.load %arg16[%c0_36, %c0_37] : memref<512x128xbf16, #tpu.memory_space<vmem>>, vector<512x128xbf16>
    %cst_38 = arith.constant dense<0.000000e+00> : vector<16x128xf32>
    %67 = tpu.matmul %65, %66, %cst_38 {dimension_numbers = #tpu.dot_dimension_numbers<[1], [0], [0], [1], [0, 0, 1, 1], [], []>} : vector<16x512xbf16>, vector<512x128xbf16>, vector<16x128xf32> -> vector<16x128xf32>
    %c0_39 = arith.constant 0 : index
    %c0_40 = arith.constant 0 : index
    %68 = vector.load %arg17[%c0_39, %c0_40] : memref<1x128xf32, #tpu.memory_space<vmem>>, vector<1x128xf32>
    %69 = vector.broadcast %68 : vector<1x128xf32> to vector<16x128xf32>
    %70 = arith.addf %67, %69 : vector<16x128xf32>
    %c0_41 = arith.constant 0 : index
    %c0_42 = arith.constant 0 : index
    %71 = vector.load %arg18[%c0_41, %c0_42] : memref<16x128xf32, #tpu.memory_space<vmem>>, vector<16x128xf32>
    tpu.vector_store %arg18[%c0_41, %c0_42], %70 {strides = array<i32>} : memref<16x128xf32, #tpu.memory_space<vmem>>, vector<16x128xf32>,
    return
  }
  func.func @transform_0(%arg0: i32) -> (i32, i32) {
    %c0_i32 = arith.constant 0 : i32
    %c0_i32_0 = arith.constant 0 : i32
    return %arg0, %c0_i32 : i32, i32
  }
  func.func @transform_1(%arg0: i32) -> (i32, i32) {
    %c0_i32 = arith.constant 0 : i32
    %c0_i32_0 = arith.constant 0 : i32
    %c0_i32_1 = arith.constant 0 : i32
    return %c0_i32, %c0_i32_0 : i32, i32
  }
  func.func @transform_2(%arg0: i32) -> (i32, i32) {
    %c0_i32 = arith.constant 0 : i32
    %c0_i32_0 = arith.constant 0 : i32
    %c0_i32_1 = arith.constant 0 : i32
    return %c0_i32, %c0_i32_0 : i32, i32
  }
  func.func @transform_3(%arg0: i32) -> (i32, i32) {
    %c0_i32 = arith.constant 0 : i32
    %c0_i32_0 = arith.constant 0 : i32
    %c0_i32_1 = arith.constant 0 : i32
    return %c0_i32, %c0_i32_0 : i32, i32
  }
  func.func @transform_4(%arg0: i32) -> (i32, i32) {
    %c0_i32 = arith.constant 0 : i32
    %c0_i32_0 = arith.constant 0 : i32
    %c0_i32_1 = arith.constant 0 : i32
    return %c0_i32, %c0_i32_0 : i32, i32
  }
  func.func @transform_5(%arg0: i32) -> (i32, i32) {
    %c0_i32 = arith.constant 0 : i32
    %c0_i32_0 = arith.constant 0 : i32
    %c0_i32_1 = arith.constant 0 : i32
    return %c0_i32, %c0_i32_0 : i32, i32
  }
  func.func @transform_6(%arg0: i32) -> (i32, i32) {
    %c0_i32 = arith.constant 0 : i32
    %c0_i32_0 = arith.constant 0 : i32
    %c0_i32_1 = arith.constant 0 : i32
    return %c0_i32, %c0_i32_0 : i32, i32
  }
  func.func @transform_7(%arg0: i32) -> (i32, i32) {
    %c0_i32 = arith.constant 0 : i32
    %c0_i32_0 = arith.constant 0 : i32
    %c0_i32_1 = arith.constant 0 : i32
    return %c0_i32, %c0_i32_0 : i32, i32
  }
  func.func @transform_8(%arg0: i32) -> (i32, i32) {
    %c0_i32 = arith.constant 0 : i32
    %c0_i32_0 = arith.constant 0 : i32
    %c0_i32_1 = arith.constant 0 : i32
    return %c0_i32, %c0_i32_0 : i32, i32
  }
  func.func @transform_9(%arg0: i32) -> (i32, i32) {
    %c0_i32 = arith.constant 0 : i32
    %c0_i32_0 = arith.constant 0 : i32
    %c0_i32_1 = arith.constant 0 : i32
    return %c0_i32, %c0_i32_0 : i32, i32
  }
  func.func @transform_10(%arg0: i32) -> (i32, i32) {
    %c0_i32 = arith.constant 0 : i32
    %c0_i32_0 = arith.constant 0 : i32
    %c0_i32_1 = arith.constant 0 : i32
    return %c0_i32, %c0_i32_0 : i32, i32
  }
  func.func @transform_11(%arg0: i32) -> (i32, i32) {
    %c0_i32 = arith.constant 0 : i32
    %c0_i32_0 = arith.constant 0 : i32
    %c0_i32_1 = arith.constant 0 : i32
    return %c0_i32, %c0_i32_0 : i32, i32
  }
  func.func @transform_12(%arg0: i32) -> (i32, i32) {
    %c0_i32 = arith.constant 0 : i32
    %c0_i32_0 = arith.constant 0 : i32
    %c0_i32_1 = arith.constant 0 : i32
    return %c0_i32, %c0_i32_0 : i32, i32
  }
  func.func @transform_13(%arg0: i32) -> (i32, i32) {
    %c0_i32 = arith.constant 0 : i32
    %c0_i32_0 = arith.constant 0 : i32
    %c0_i32_1 = arith.constant 0 : i32
    return %c0_i32, %c0_i32_0 : i32, i32
  }
  func.func @transform_14(%arg0: i32) -> (i32, i32) {
    %c0_i32 = arith.constant 0 : i32
    %c0_i32_0 = arith.constant 0 : i32
    %c0_i32_1 = arith.constant 0 : i32
    return %c0_i32, %c0_i32_0 : i32, i32
  }
  func.func @transform_15(%arg0: i32) -> (i32, i32) {
    %c0_i32 = arith.constant 0 : i32
    %c0_i32_0 = arith.constant 0 : i32
    %c0_i32_1 = arith.constant 0 : i32
    return %c0_i32, %c0_i32_0 : i32, i32
  }
  func.func @transform_16(%arg0: i32) -> (i32, i32) {
    %c0_i32 = arith.constant 0 : i32
    %c0_i32_0 = arith.constant 0 : i32
    %c0_i32_1 = arith.constant 0 : i32
    return %c0_i32, %c0_i32_0 : i32, i32
  }
  func.func @transform_17(%arg0: i32) -> (i32, i32) {
    %c0_i32 = arith.constant 0 : i32
    %c0_i32_0 = arith.constant 0 : i32
    return %arg0, %c0_i32 : i32, i32
  }
}

</mosaic_0001>

<bundles_post_ra>
// kernel: vgg_ic_forward.1
= control target key start
LH: loop header
LB: loop body
LE: loop exit
PB: predicated region body
PF: predicated region fallthrough
CT: control target
= control target key end

     0   :  { %s6777_s0 = inlined_call_operand.vmem [shape: f32[16,128], index: 0, kind: input, shape index: {}]   ;;  %s6778_s1 = inlined_call_operand.hbm [shape: bf16[128,1024], index: 1, kind: input, shape index: {}]   ;;  %s6779_s2 = inlined_call_operand.vmem [shape: f32[1,256], index: 2, kind: input, shape index: {}]   ;;  %s6780_s3 = inlined_call_operand.hbm [shape: bf16[256,2048], index: 3, kind: input, shape index: {}]   ;;  %s6781_s4 = inlined_call_operand.vmem [shape: f32[1,512], index: 4, kind: input, shape index: {}]   ;;  %s6782_s5 = inlined_call_operand.vmem [shape: f32[1,512], index: 5, kind: input, shape index: {}]   ;;  %s6783_s6 = inlined_call_operand.vmem [shape: f32[1,512], index: 6, kind: input, shape index: {}]   ;;  %s6784_s7 = inlined_call_operand.hbm [shape: bf16[512,512], index: 7, kind: input, shape index: {}]   ;;  %s6785_s8 = inlined_call_operand.vmem [shape: f32[1,512], index: 8, kind: input, shape index: {}]   ;;  %s6786_s9 = inlined_call_operand.vmem [shape: f32[1,512], index: 9, kind: input, shape index: {}]   ;;  %s6787_s10 = inlined_call_operand.vmem [shape: f32[1,512], index: 10, kind: input, shape index: {}]   ;;  %s6788_s11 = inlined_call_operand.hbm [shape: bf16[512,512], index: 11, kind: input, shape index: {}]   ;;  %s6789_s12 = inlined_call_operand.vmem [shape: f32[1,512], index: 12, kind: input, shape index: {}]   ;;  %s6790_s13 = inlined_call_operand.vmem [shape: f32[1,512], index: 13, kind: input, shape index: {}]   ;;  %s6791_s14 = inlined_call_operand.vmem [shape: f32[1,512], index: 14, kind: input, shape index: {}]   ;;  %s6792_s15 = inlined_call_operand.hbm [shape: bf16[512,128], index: 15, kind: input, shape index: {}]   ;;  %s6793_s16 = inlined_call_operand.vmem [shape: f32[1,128], index: 16, kind: input, shape index: {}]   ;;  %s6794_s17 = inlined_call_operand.vmem [shape: f32[16,128], index: 17, kind: output, shape index: {}]  }
   0x1   :  { %6800 = sst [smem:[#allocation13_spill]] %s6777_s0 }
   0x2   :  { %6801 = sst [smem:[#allocation14_spill]] %s6778_s1 }
   0x3   :  { %6802 = sst [smem:[#allocation15_spill]] %s6794_s17 }
   0x4   :  { %22 = vsyncpa [#allocation3], 0 }
   0x5   :  { %23 = vsyncpa [#allocation5], 0 }
   0x6   :  { %24 = vsyncpa [#allocation8], 0  ;;  %s6376_s24 = smov [#allocation4]   ;;  %s6260_s28 = scalar_lea.hbm %s6780_s3, 32768 }
   0x7   :  { %s46_s25 = sshll.u32 %s6376_s24, 4  ;;  %p6261_p0 = scmp.ne.s32.totalorder %s6780_s3, %s6260_s28  ;;  %s47_s25 = int_to_ptr.vmem [resolvable:$true] %s46_s25 }
   0x8   :  { %p6264_p1 = scmp.lt.u32.totalorder %s6260_s28, %s6780_s3 }
   0xa   :  { %p6266_p2 = pnand %p6264_p1, %p6261_p0 }
   0xc   :  { %6269 = shalt.err (!%p6266_p2)
}
   0xd   :  { %s6270_s19 = scalar_lea.vmem %s47_s25, 32768  ;;  %p6275_p4 = scmp.lt.s32.totalorder %s47_s25, %s47_s25 }
   0xe   :  { %p6271_p3 = scmp.ne.s32.totalorder %s47_s25, %s6270_s19  ;;  %p6276_p5 = scmp.lt.s32.totalorder %s6270_s19, %s6270_s19 }
  0x10   :  { %p6277_p6 = por %p6276_p5, %p6275_p4 }
  0x12   :  { %p6278_p7 = pnand %p6277_p6, %p6271_p3 }
  0x14   :  { %6281 = shalt.err (!%p6278_p7)
}
  0x15   :  { %s6377_s1 = smov 1024   ;;  %s6798_s20 = smov 64  }
  0x16   :  { %52 = dma.hbm_to_vmem [thread:$0]  %s6780_s3, 32768, %s47_s25, [#allocation5], %s6377_s1, %s6377_s1, %s6798_s20  }
  0x17   :  { %s6379_s23 = smov [#allocation7]   ;;  %s6380_s26 = smov [#allocation2]  }
  0x18   :  { %s82_s24 = sshll.u32 %s6379_s23, 4  ;;  %s32_s27 = sshll.u32 %s6380_s26, 4  ;;  %s83_s24 = int_to_ptr.vmem [resolvable:$true] %s82_s24  ;;  %s33_s27 = int_to_ptr.vmem [resolvable:$true] %s32_s27 }
  0x19   :  { %s6282_s0 = scalar_lea.hbm %s6788_s11, 16384 }
  0x1a   :  { %p6283_p8 = scmp.ne.s32.totalorder %s6788_s11, %s6282_s0  ;;  %p6286_p9 = scmp.lt.u32.totalorder %s6282_s0, %s6788_s11 }
  0x1c   :  { %p6288_p10 = pnand %p6286_p9, %p6283_p8 }
  0x1e   :  { %6291 = shalt.err (!%p6288_p10)
}
  0x1f   :  { %s6292_s3 = scalar_lea.vmem %s83_s24, 16384  ;;  %p6297_p12 = scmp.lt.s32.totalorder %s83_s24, %s83_s24 }
  0x20   :  { %p6293_p11 = scmp.ne.s32.totalorder %s83_s24, %s6292_s3  ;;  %p6298_p13 = scmp.lt.s32.totalorder %s6292_s3, %s6292_s3 }
  0x22   :  { %p6299_p0 = por %p6298_p13, %p6297_p12 }
  0x24   :  { %p6300_p1 = pnand %p6299_p0, %p6293_p11 }
  0x26   :  { %6303 = shalt.err (!%p6300_p1)
}
  0x27   :  { %s6799_s25 = smov 256   ;;  %s6382_s1 = smov 16  }
  0x28   :  { %88 = dma.hbm_to_vmem [thread:$0]  %s6788_s11, 16384, %s83_s24, [#allocation8], %s6799_s25, %s6799_s25, %s6382_s1  }
  0x29   :  { %s6803_s26 = sld [smem:[#allocation14_spill]] }
  0x2f   :  { %s6304_s28 = scalar_lea.hbm %s6803_s26, 8192 }
  0x30   :  { %p6305_p2 = scmp.ne.s32.totalorder %s6803_s26, %s6304_s28  ;;  %p6308_p3 = scmp.lt.u32.totalorder %s6304_s28, %s6803_s26 }
  0x32   :  { %p6310_p4 = pnand %p6308_p3, %p6305_p2 }
  0x34   :  { %6313 = shalt.err (!%p6310_p4)
}
  0x35   :  { %s6314_s19 = scalar_lea.vmem %s33_s27, 8192  ;;  %p6319_p6 = scmp.lt.s32.totalorder %s33_s27, %s33_s27 }
  0x36   :  { %p6315_p5 = scmp.ne.s32.totalorder %s33_s27, %s6314_s19  ;;  %p6320_p7 = scmp.lt.s32.totalorder %s6314_s19, %s6314_s19 }
  0x38   :  { %p6321_p8 = por %p6320_p7, %p6319_p6 }
  0x3a   :  { %p6322_p9 = pnand %p6321_p8, %p6315_p5 }
  0x3c   :  { %6325 = shalt.err (!%p6322_p9)
}
  0x3d   :  { %s6383_s11 = smov 512   ;;  %s6384_s24 = smov 32  }
  0x3e   :  { %38 = dma.hbm_to_vmem [thread:$0]  %s6803_s26, 8192, %s33_s27, [#allocation3], %s6383_s11, %s6383_s11, %s6384_s24  }
  0x3f   :  { %s6385_s22 = smov [#allocation6]   ;;  %s6386_s23 = smov [#allocation9]  }
  0x40   :  { %s64_s17 = sshll.u32 %s6385_s22, 4  ;;  %s100_s28 = sshll.u32 %s6386_s23, 4  ;;  %s65_s17 = int_to_ptr.vmem [resolvable:$true] %s64_s17  ;;  %s101_s28 = int_to_ptr.vmem [resolvable:$true] %s100_s28 }
  0x41   :  { %s6326_s30 = scalar_lea.hbm %s6784_s7, 16384 }
  0x42   :  { %p6327_p10 = scmp.ne.s32.totalorder %s6784_s7, %s6326_s30  ;;  %p6330_p11 = scmp.lt.u32.totalorder %s6326_s30, %s6784_s7 }
  0x44   :  { %p6332_p12 = pnand %p6330_p11, %p6327_p10 }
  0x46   :  { %6335 = shalt.err (!%p6332_p12)
}
  0x47   :  { %s6336_s27 = scalar_lea.vmem %s65_s17, 16384  ;;  %p6341_p0 = scmp.lt.s32.totalorder %s65_s17, %s65_s17 }
  0x48   :  { %p6337_p13 = scmp.ne.s32.totalorder %s65_s17, %s6336_s27  ;;  %p6342_p1 = scmp.lt.s32.totalorder %s6336_s27, %s6336_s27 }
  0x4a   :  { %p6343_p2 = por %p6342_p1, %p6341_p0 }
  0x4c   :  { %p6344_p3 = pnand %p6343_p2, %p6337_p13 }
  0x4e   :  { %6347 = shalt.err (!%p6344_p3)
}
  0x4f   :  { %s6804_s26 = smov 256   ;;  %s6348_s25 = scalar_lea.hbm %s6792_s15, 4096 }
  0x50   :  { %70 = dma.hbm_to_vmem [thread:$0]  %s6784_s7, 16384, %s65_s17, [#allocation5], %s6804_s26, %s6804_s26, %s6382_s1  }
  0x51   :  { %p6349_p4 = scmp.ne.s32.totalorder %s6792_s15, %s6348_s25  ;;  %p6352_p5 = scmp.lt.u32.totalorder %s6348_s25, %s6792_s15 }
  0x53   :  { %p6354_p6 = pnand %p6352_p5, %p6349_p4 }
  0x55   :  { %6357 = shalt.err (!%p6354_p6)
}
  0x56   :  { %s6358_s0 = scalar_lea.vmem %s101_s28, 4096  ;;  %p6363_p8 = scmp.lt.s32.totalorder %s101_s28, %s101_s28 }
  0x57   :  { %p6359_p7 = scmp.ne.s32.totalorder %s101_s28, %s6358_s0  ;;  %p6364_p9 = scmp.lt.s32.totalorder %s6358_s0, %s6358_s0 }
  0x59   :  { %p6365_p10 = por %p6364_p9, %p6363_p8 }
  0x5b   :  { %p6366_p11 = pnand %p6365_p10, %p6359_p7 }
  0x5d   :  { %6369 = shalt.err (!%p6366_p11)
}
  0x5e   :  { %s6387_s7 = smov 4   ;;  %s6805_s1 = smov 64  }
  0x5f   :  { %106 = dma.hbm_to_vmem [thread:$0]  %s6792_s15, 4096, %s101_s28, [#allocation8], %s6805_s1, %s6805_s1, %s6387_s7  }
  0x60   :  { %6370 = dma.done.wait [#allocation3], 8192  }
  0x61   :  { %6371 = vsyncadd [#allocation3], 4294959104 }
  0x62   :  { %6372 = dma.done.wait [#allocation5], 49152  }
  0x63   :  { %6373 = vsyncadd [#allocation5], 4294918144 }
  0x64   :  { %6374 = dma.done.wait [#allocation8], 20480  }
  0x65   :  { %6375 = vsyncadd [#allocation8], 4294946816  ;;  %v6388_v0 = vmov 0   ;;  %v128_v1 = vld [vmem:[#allocation2] sm:$0xff]  ;;  %v129_v3 = vld [vmem:[#allocation2 + $0x8] sm:$0xff]  ;;  %s6806_s18 = sld [smem:[#allocation13_spill]] }
  0x66   :  { %544 = vmatprep.mubr.bf16.mxu0 %v6388_v0  ;;  %587 = vmatprep.mubr.bf16.mxu1 %v6388_v0  ;;  %v132_v2 = vld [vmem:[#allocation2 + $0x20] sm:$0xff]  ;;  %v133_v5 = vld [vmem:[#allocation2 + $0x28] sm:$0xff]  ;;  %s6807_s30 = sld [smem:[#allocation15_spill]] }
  0x67   :  { %v5147_v4 = vcombine.high %v128_v1, %v132_v2  ;;  %v5146_v6 = vcombine.low %v128_v1, %v132_v2  ;;  %v136_v7 = vld [vmem:[#allocation2 + $0x40] sm:$0xff]  ;;  %v5149_v9 = vcombine.high %v129_v3, %v133_v5  ;;  %v5148_v10 = vcombine.low %v129_v3, %v133_v5  ;;  %v137_v12 = vld [vmem:[#allocation2 + $0x48] sm:$0xff]  ;;  %v130_v1 = vld [vmem:[#allocation2 + $0x10] sm:$0xff] }
  0x68   :  { %v140_v8 = vld [vmem:[#allocation2 + $0x60] sm:$0xff]  ;;  %v141_v13 = vld [vmem:[#allocation2 + $0x68] sm:$0xff]  ;;  %v134_v2 = vld [vmem:[#allocation2 + $0x30] sm:$0xff] }
  0x69   :  { %v5155_v11 = vcombine.high %v136_v7, %v140_v8  ;;  %v144_v14 = vld [vmem:[#allocation2 + $0x80] sm:$0xff]  ;;  %512 = vmatprep.subr.bf16.mxu0 %v5147_v4  ;;  %v5157_v15 = vcombine.high %v137_v12, %v141_v13  ;;  %v145_v17 = vld [vmem:[#allocation2 + $0x88] sm:$0xff]  ;;  %555 = vmatprep.subr.bf16.mxu1 %v5149_v9  ;;  %v5154_v19 = vcombine.low %v136_v7, %v140_v8  ;;  %v131_v4 = vld [vmem:[#allocation2 + $0x18] sm:$0xff] }
  0x6a   :  { %v148_v16 = vld [vmem:[#allocation2 + $0xa0] sm:$0xff]  ;;  %v149_v18 = vld [vmem:[#allocation2 + $0xa8] sm:$0xff]  ;;  %513 = vmatpush1.bf16.msra.mxu0 %v5146_v6  ;;  %556 = vmatpush1.bf16.msra.mxu1 %v5148_v10  ;;  %v5156_v20 = vcombine.low %v137_v12, %v141_v13  ;;  %v135_v5 = vld [vmem:[#allocation2 + $0x38] sm:$0xff]  ;;  %v5151_v10 = vcombine.high %v130_v1, %v134_v2 }
  0x6b   :  { %514 = vmatprep.subr.bf16.mxu0 %v5155_v11  ;;  %v5163_v21 = vcombine.high %v144_v14, %v148_v16  ;;  %557 = vmatprep.subr.bf16.mxu1 %v5157_v15  ;;  %v5165_v22 = vcombine.high %v145_v17, %v149_v18  ;;  %v152_v23 = vld [vmem:[#allocation2 + $0xc0] sm:$0xff]  ;;  %v153_v25 = vld [vmem:[#allocation2 + $0xc8] sm:$0xff]  ;;  %v5162_v27 = vcombine.low %v144_v14, %v148_v16  ;;  %v138_v7 = vld [vmem:[#allocation2 + $0x50] sm:$0xff] }
  0x6c   :  { %v156_v24 = vld [vmem:[#allocation2 + $0xe0] sm:$0xff]  ;;  %v157_v26 = vld [vmem:[#allocation2 + $0xe8] sm:$0xff]  ;;  %v5164_v28 = vcombine.low %v145_v17, %v149_v18  ;;  %v142_v8 = vld [vmem:[#allocation2 + $0x70] sm:$0xff]  ;;  %v5153_v13 = vcombine.high %v131_v4, %v135_v5  ;;  %v5150_v15 = vcombine.low %v130_v1, %v134_v2  ;;  %v5152_v18 = vcombine.low %v131_v4, %v135_v5 }
  0x6d   :  { %v5171_v29 = vcombine.high %v152_v23, %v156_v24  ;;  %v5173_v30 = vcombine.high %v153_v25, %v157_v26  ;;  %v160_v31 = vld [vmem:[#allocation2 + $0x100] sm:$0xff]  ;;  %v161_v33 = vld [vmem:[#allocation2 + $0x108] sm:$0xff]  ;;  %v5170_v35 = vcombine.low %v152_v23, %v156_v24  ;;  %v5172_v36 = vcombine.low %v153_v25, %v157_v26  ;;  %v139_v11 = vld [vmem:[#allocation2 + $0x58] sm:$0xff] }
  0x6e   :  { %515 = vmatpush1.bf16.msra.mxu0 %v5154_v19  ;;  %558 = vmatpush1.bf16.msra.mxu1 %v5156_v20  ;;  %v164_v32 = vld [vmem:[#allocation2 + $0x120] sm:$0xff]  ;;  %v165_v34 = vld [vmem:[#allocation2 + $0x128] sm:$0xff]  ;;  %v143_v12 = vld [vmem:[#allocation2 + $0x78] sm:$0xff]  ;;  %v5159_v19 = vcombine.high %v138_v7, %v142_v8  ;;  %v5158_v23 = vcombine.low %v138_v7, %v142_v8 }
  0x6f   :  { %516 = vmatprep.subr.bf16.mxu0 %v5163_v21  ;;  %559 = vmatprep.subr.bf16.mxu1 %v5165_v22  ;;  %v5179_v37 = vcombine.high %v160_v31, %v164_v32  ;;  %v5181_v38 = vcombine.high %v161_v33, %v165_v34  ;;  %v168_v39 = vld [vmem:[#allocation2 + $0x140] sm:$0xff]  ;;  %v169_v41 = vld [vmem:[#allocation2 + $0x148] sm:$0xff]  ;;  %v5178_v43 = vcombine.low %v160_v31, %v164_v32  ;;  %v146_v16 = vld [vmem:[#allocation2 + $0x90] sm:$0xff] }
  0x70   :  { %v172_v40 = vld [vmem:[#allocation2 + $0x160] sm:$0xff]  ;;  %v173_v42 = vld [vmem:[#allocation2 + $0x168] sm:$0xff]  ;;  %v5180_v44 = vcombine.low %v161_v33, %v165_v34  ;;  %v150_v17 = vld [vmem:[#allocation2 + $0xb0] sm:$0xff]  ;;  %v5161_v22 = vcombine.high %v139_v11, %v143_v12  ;;  %v5160_v26 = vcombine.low %v139_v11, %v143_v12 }
  0x71   :  { %v5187_v45 = vcombine.high %v168_v39, %v172_v40  ;;  %v5189_v46 = vcombine.high %v169_v41, %v173_v42  ;;  %v176_v47 = vld [vmem:[#allocation2 + $0x180] sm:$0xff]  ;;  %v177_v49 = vld [vmem:[#allocation2 + $0x188] sm:$0xff]  ;;  %v5186_v51 = vcombine.low %v168_v39, %v172_v40  ;;  %v5188_v52 = vcombine.low %v169_v41, %v173_v42  ;;  %v147_v20 = vld [vmem:[#allocation2 + $0x98] sm:$0xff] }
  0x72   :  { %517 = vmatpush1.bf16.msra.mxu0 %v5162_v27  ;;  %560 = vmatpush1.bf16.msra.mxu1 %v5164_v28  ;;  %v180_v48 = vld [vmem:[#allocation2 + $0x1a0] sm:$0xff]  ;;  %v181_v50 = vld [vmem:[#allocation2 + $0x1a8] sm:$0xff]  ;;  %v151_v21 = vld [vmem:[#allocation2 + $0xb8] sm:$0xff]  ;;  %v5167_v27 = vcombine.high %v146_v16, %v150_v17  ;;  %v5166_v31 = vcombine.low %v146_v16, %v150_v17 }
  0x73   :  { %518 = vmatprep.subr.bf16.mxu0 %v5171_v29  ;;  %561 = vmatprep.subr.bf16.mxu1 %v5173_v30  ;;  %v5195_v53 = vcombine.high %v176_v47, %v180_v48  ;;  %v5197_v54 = vcombine.high %v177_v49, %v181_v50  ;;  %v184_v55 = vld [vmem:[#allocation2 + $0x1c0] sm:$0xff]  ;;  %v185_v57 = vld [vmem:[#allocation2 + $0x1c8] sm:$0xff]  ;;  %v5194_v59 = vcombine.low %v176_v47, %v180_v48  ;;  %v154_v24 = vld [vmem:[#allocation2 + $0xd0] sm:$0xff] }
  0x74   :  { %v188_v56 = vld [vmem:[#allocation2 + $0x1e0] sm:$0xff]  ;;  %v189_v58 = vld [vmem:[#allocation2 + $0x1e8] sm:$0xff]  ;;  %v5196_v60 = vcombine.low %v177_v49, %v181_v50  ;;  %v158_v25 = vld [vmem:[#allocation2 + $0xf0] sm:$0xff]  ;;  %v5169_v30 = vcombine.high %v147_v20, %v151_v21  ;;  %v5168_v34 = vcombine.low %v147_v20, %v151_v21 }
  0x75   :  { %v5203_v61 = vcombine.high %v184_v55, %v188_v56  ;;  %v5205_v62 = vcombine.high %v185_v57, %v189_v58  ;;  %v125_v63 = vld [vmem:[%s6806_s18] sm:$0xff]  ;;  %v126_v3 = vld [vmem:[%s6806_s18 + $0x8] sm:$0xff]  ;;  %v5202_v6 = vcombine.low %v184_v55, %v188_v56  ;;  %v5204_v9 = vcombine.low %v185_v57, %v189_v58  ;;  %v155_v28 = vld [vmem:[#allocation2 + $0xd8] sm:$0xff] }
  0x76   :  { %519 = vmatpush1.bf16.msra.mxu0 %v5170_v35  ;;  %562 = vmatpush1.bf16.msra.mxu1 %v5172_v36  ;;  %v6556_v14 = vpack.c.bf16 %v126_v3, %v125_v63  ;;  %v159_v29 = vld [vmem:[#allocation2 + $0xf8] sm:$0xff]  ;;  %v162_v32 = vld [vmem:[#allocation2 + $0x110] sm:$0xff]  ;;  %v5175_v35 = vcombine.high %v154_v24, %v158_v25  ;;  %v5174_v39 = vcombine.low %v154_v24, %v158_v25  ;;  %v718_v63 = vld [vmem:[#allocation4] sm:$0xff] }
  0x77   :  { %520 = vmatprep.subr.bf16.mxu0 %v5179_v37  ;;  %563 = vmatprep.subr.bf16.mxu1 %v5181_v38  ;;  %v166_v33 = vld [vmem:[#allocation2 + $0x130] sm:$0xff]  ;;  %v163_v36 = vld [vmem:[#allocation2 + $0x118] sm:$0xff]  ;;  %v5177_v38 = vcombine.high %v155_v28, %v159_v29  ;;  %v5176_v42 = vcombine.low %v155_v28, %v159_v29  ;;  %v726_v1 = vld [vmem:[#allocation4 + $0x40] sm:$0xff] }
  0x78   :  { %v167_v37 = vld [vmem:[#allocation2 + $0x138] sm:$0xff]  ;;  %v170_v40 = vld [vmem:[#allocation2 + $0x150] sm:$0xff]  ;;  %v719_v4 = vld [vmem:[#allocation4 + $0x8] sm:$0xff]  ;;  %v5211_v11 = vcombine.high %v718_v63, %v726_v1  ;;  %v5210_v16 = vcombine.low %v718_v63, %v726_v1 }
  0x79   :  { %v174_v41 = vld [vmem:[#allocation2 + $0x170] sm:$0xff]  ;;  %v5184_v49 = vcombine.low %v163_v36, %v167_v37  ;;  %v727_v5 = vld [vmem:[#allocation4 + $0x48] sm:$0xff]  ;;  %v734_v8 = vld [vmem:[#allocation4 + $0x80] sm:$0xff] }
  0x7a   :  { %521 = vmatpush1.bf16.msra.mxu0 %v5178_v43  ;;  %564 = vmatpush1.bf16.msra.mxu1 %v5180_v44  ;;  %v171_v43 = vld [vmem:[#allocation2 + $0x158] sm:$0xff]  ;;  %v178_v47 = vld [vmem:[#allocation2 + $0x190] sm:$0xff]  ;;  %v5191_v50 = vcombine.high %v170_v40, %v174_v41  ;;  %v735_v12 = vld [vmem:[#allocation4 + $0x88] sm:$0xff] }
  0x7b   :  { %522 = vmatprep.subr.bf16.mxu0 %v5187_v45  ;;  %565 = vmatprep.subr.bf16.mxu1 %v5189_v46  ;;  %v175_v44 = vld [vmem:[#allocation2 + $0x178] sm:$0xff]  ;;  %v5185_v45 = vcombine.high %v163_v36, %v167_v37  ;;  %v5182_v46 = vcombine.low %v162_v32, %v166_v33  ;;  %v182_v48 = vld [vmem:[#allocation2 + $0x1b0] sm:$0xff]  ;;  %v750_v17 = vld [vmem:[#allocation4 + $0x100] sm:$0xff] }
  0x7c   :  { %v186_v55 = vld [vmem:[#allocation2 + $0x1d0] sm:$0xff]  ;;  %v5192_v57 = vcombine.low %v171_v43, %v175_v44  ;;  %v5199_v58 = vcombine.high %v178_v47, %v182_v48  ;;  %v751_v21 = vld [vmem:[#allocation4 + $0x108] sm:$0xff]  ;;  %v766_v25 = vld [vmem:[#allocation4 + $0x180] sm:$0xff] }
  0x7d   :  { %v190_v56 = vld [vmem:[#allocation2 + $0x1f0] sm:$0xff]  ;;  %v767_v29 = vld [vmem:[#allocation4 + $0x188] sm:$0xff] }
  0x7e   :  { %523 = vmatpush1.bf16.msra.mxu0 %v5186_v51  ;;  %566 = vmatpush1.bf16.msra.mxu1 %v5188_v52  ;;  %v179_v51 = vld [vmem:[#allocation2 + $0x198] sm:$0xff]  ;;  %v5207_v3 = vcombine.high %v186_v55, %v190_v56  ;;  %v5206_v7 = vcombine.low %v186_v55, %v190_v56  ;;  %v783_v36 = vld [vmem:[#allocation4 + $0x208] sm:$0xff] }
  0x7f   :  { %524 = vmatprep.subr.bf16.mxu0 %v5195_v53  ;;  %567 = vmatprep.subr.bf16.mxu1 %v5197_v54  ;;  %v183_v52 = vld [vmem:[#allocation2 + $0x1b8] sm:$0xff]  ;;  %v5193_v53 = vcombine.high %v171_v43, %v175_v44  ;;  %v5190_v54 = vcombine.low %v170_v40, %v174_v41  ;;  %v791_v37 = vld [vmem:[#allocation4 + $0x248] sm:$0xff]  ;;  %v798_v44 = vld [vmem:[#allocation4 + $0x280] sm:$0xff] }
  0x80   :  { %v5200_v2 = vcombine.low %v179_v51, %v183_v52  ;;  %v5276_v43 = vcombine.low %v783_v36, %v791_v37  ;;  %v831_v63 = vld [vmem:[#allocation4 + $0x388] sm:$0xff] }
  0x81   :  { %v839_v1 = vld [vmem:[#allocation4 + $0x3c8] sm:$0xff] }
  0x82   :  { %525 = vmatpush1.bf16.msra.mxu0 %v5194_v59  ;;  %568 = vmatpush1.bf16.msra.mxu1 %v5196_v60  ;;  %v187_v59 = vld [vmem:[#allocation2 + $0x1d8] sm:$0xff] }
  0x83   :  { %526 = vmatprep.subr.bf16.mxu0 %v5203_v61  ;;  %569 = vmatprep.subr.bf16.mxu1 %v5205_v62  ;;  %v191_v60 = vld [vmem:[#allocation2 + $0x1f8] sm:$0xff]  ;;  %v5201_v61 = vcombine.high %v179_v51, %v183_v52  ;;  %v5198_v62 = vcombine.low %v178_v47, %v182_v48  ;;  %v807_v48 = vld [vmem:[#allocation4 + $0x2c8] sm:$0xff]  ;;  %v814_v52 = vld [vmem:[#allocation4 + $0x300] sm:$0xff] }
  0x86   :  { %527 = vmatpush1.bf16.msra.mxu0 %v5202_v6  ;;  %570 = vmatpush1.bf16.msra.mxu1 %v5204_v9  ;;  %v5209_v6 = vcombine.high %v187_v59, %v191_v60  ;;  %v742_v9 = vld [vmem:[#allocation4 + $0xc0] sm:$0xff] }
  0x87   :  { %598 = vmatprep.subr.bf16.mxu0 %v5151_v10  ;;  %641 = vmatprep.subr.bf16.mxu1 %v5153_v13  ;;  %v5208_v10 = vcombine.low %v187_v59, %v191_v60  ;;  %v743_v13 = vld [vmem:[#allocation4 + $0xc8] sm:$0xff]  ;;  %v5227_v20 = vcombine.high %v734_v8, %v742_v9  ;;  %v5226_v24 = vcombine.low %v734_v8, %v742_v9  ;;  %v838_v59 = vld [vmem:[#allocation4 + $0x3c0] sm:$0xff] }
  0x88   :  { %v5324_v8 = vcombine.low %v831_v63, %v839_v1 }
  0x89   :  { %545 = vmatmul.mubr.bf16.vlgmr.msra.gmra.mrb[0].mxu0 %v6556_v14  ;;  %588 = vmatmul.mubr.bf16.vlgmr.msra.gmra.mrb[0].mxu1 %v6556_v14 }
  0x8a   :  { %599 = vmatpush1.bf16.msra.mxu0 %v5150_v15  ;;  %642 = vmatpush1.bf16.msra.mxu1 %v5152_v18  ;;  %v5213_v15 = vcombine.high %v719_v4, %v727_v5  ;;  %v758_v18 = vld [vmem:[#allocation4 + $0x140] sm:$0xff] }
  0x8b   :  { %600 = vmatprep.subr.bf16.mxu0 %v5159_v19  ;;  %643 = vmatprep.subr.bf16.mxu1 %v5161_v22  ;;  %v5212_v19 = vcombine.low %v719_v4, %v727_v5  ;;  %v759_v22 = vld [vmem:[#allocation4 + $0x148] sm:$0xff]  ;;  %v5243_v28 = vcombine.high %v750_v17, %v758_v18  ;;  %v854_v4 = vld [vmem:[#allocation4 + $0x440] sm:$0xff] }
  0x8c   :  { %630 = vmatprep.mubr.bf16.mxu0 %v6388_v0  ;;  %673 = vmatprep.mubr.bf16.mxu1 %v6388_v0  ;;  %v5183_v0 = vcombine.high %v162_v32, %v166_v33  ;;  %v5242_v32 = vcombine.low %v750_v17, %v758_v18  ;;  %v782_v33 = vld [vmem:[#allocation4 + $0x200] sm:$0xff]  ;;  %v847_v5 = vld [vmem:[#allocation4 + $0x408] sm:$0xff] }
  0x8d   :  { %v878_v17 = vld [vmem:[#allocation4 + $0x500] sm:$0xff] }
  0x8e   :  { %601 = vmatpush1.bf16.msra.mxu0 %v5158_v23  ;;  %644 = vmatpush1.bf16.msra.mxu1 %v5160_v26  ;;  %v5229_v23 = vcombine.high %v735_v12, %v743_v13  ;;  %v774_v26 = vld [vmem:[#allocation4 + $0x1c0] sm:$0xff] }
  0x8f   :  { %602 = vmatprep.subr.bf16.mxu0 %v5167_v27  ;;  %645 = vmatprep.subr.bf16.mxu1 %v5169_v30  ;;  %v5228_v27 = vcombine.low %v735_v12, %v743_v13  ;;  %v775_v30 = vld [vmem:[#allocation4 + $0x1c8] sm:$0xff]  ;;  %v870_v12 = vld [vmem:[#allocation4 + $0x4c0] sm:$0xff] }
  0x90   :  { %v5260_v40 = vcombine.low %v767_v29, %v775_v30  ;;  %v863_v13 = vld [vmem:[#allocation4 + $0x488] sm:$0xff]  ;;  %v886_v18 = vld [vmem:[#allocation4 + $0x540] sm:$0xff] }
  0x92   :  { %603 = vmatpush1.bf16.msra.mxu0 %v5166_v31  ;;  %646 = vmatpush1.bf16.msra.mxu1 %v5168_v34  ;;  %v5245_v31 = vcombine.high %v751_v21, %v759_v22  ;;  %v790_v34 = vld [vmem:[#allocation4 + $0x240] sm:$0xff] }
  0x93   :  { %604 = vmatprep.subr.bf16.mxu0 %v5175_v35  ;;  %647 = vmatprep.subr.bf16.mxu1 %v5177_v38  ;;  %v5244_v35 = vcombine.low %v751_v21, %v759_v22  ;;  %v5261_v38 = vcombine.high %v767_v29, %v775_v30  ;;  %v5275_v41 = vcombine.high %v782_v33, %v790_v34  ;;  %v879_v21 = vld [vmem:[#allocation4 + $0x508] sm:$0xff] }
  0x94   :  { %v887_v22 = vld [vmem:[#allocation4 + $0x548] sm:$0xff] }
  0x95   :  { %v895_v29 = vld [vmem:[#allocation4 + $0x588] sm:$0xff] }
  0x96   :  { %605 = vmatpush1.bf16.msra.mxu0 %v5174_v39  ;;  %648 = vmatpush1.bf16.msra.mxu1 %v5176_v42  ;;  %v5258_v39 = vcombine.low %v766_v25, %v774_v26  ;;  %v5277_v42 = vcombine.high %v783_v36, %v791_v37  ;;  %v903_v30 = vld [vmem:[#allocation4 + $0x5c8] sm:$0xff] }
  0x97   :  { %606 = vmatprep.subr.bf16.mxu0 %v5183_v0  ;;  %649 = vmatprep.subr.bf16.mxu1 %v5185_v45  ;;  %v5274_v0 = vcombine.low %v782_v33, %v790_v34  ;;  %v806_v45 = vld [vmem:[#allocation4 + $0x2c0] sm:$0xff]  ;;  %v911_v36 = vld [vmem:[#allocation4 + $0x608] sm:$0xff] }
  0x98   :  { %v5291_v47 = vcombine.high %v798_v44, %v806_v45  ;;  %v910_v33 = vld [vmem:[#allocation4 + $0x600] sm:$0xff]  ;;  %v919_v37 = vld [vmem:[#allocation4 + $0x648] sm:$0xff] }
  0x99   :  { %v918_v34 = vld [vmem:[#allocation4 + $0x640] sm:$0xff] }
  0x9a   :  { %607 = vmatpush1.bf16.msra.mxu0 %v5182_v46  ;;  %650 = vmatpush1.bf16.msra.mxu1 %v5184_v49  ;;  %v799_v46 = vld [vmem:[#allocation4 + $0x288] sm:$0xff]  ;;  %v5290_v49 = vcombine.low %v798_v44, %v806_v45  ;;  %v926_v44 = vld [vmem:[#allocation4 + $0x680] sm:$0xff] }
  0x9b   :  { %608 = vmatprep.subr.bf16.mxu0 %v5191_v50  ;;  %651 = vmatprep.subr.bf16.mxu1 %v5193_v53  ;;  %v5292_v50 = vcombine.low %v799_v46, %v807_v48  ;;  %v5293_v51 = vcombine.high %v799_v46, %v807_v48  ;;  %v822_v53 = vld [vmem:[#allocation4 + $0x340] sm:$0xff]  ;;  %v927_v46 = vld [vmem:[#allocation4 + $0x688] sm:$0xff] }
  0x9c   :  { %v5306_v55 = vcombine.low %v814_v52, %v822_v53  ;;  %v5307_v56 = vcombine.high %v814_v52, %v822_v53  ;;  %v934_v45 = vld [vmem:[#allocation4 + $0x6c0] sm:$0xff]  ;;  %v935_v48 = vld [vmem:[#allocation4 + $0x6c8] sm:$0xff] }
  0x9d   :  { %v942_v52 = vld [vmem:[#allocation4 + $0x700] sm:$0xff] }
  0x9e   :  { %609 = vmatpush1.bf16.msra.mxu0 %v5190_v54  ;;  %652 = vmatpush1.bf16.msra.mxu1 %v5192_v57  ;;  %v815_v54 = vld [vmem:[#allocation4 + $0x308] sm:$0xff]  ;;  %v950_v53 = vld [vmem:[#allocation4 + $0x740] sm:$0xff] }
  0x9f   :  { %610 = vmatprep.subr.bf16.mxu0 %v5199_v58  ;;  %653 = vmatprep.subr.bf16.mxu1 %v5201_v61  ;;  %v823_v57 = vld [vmem:[#allocation4 + $0x348] sm:$0xff]  ;;  %v830_v58 = vld [vmem:[#allocation4 + $0x380] sm:$0xff] }
  0xa0   :  { %v5308_v60 = vcombine.low %v815_v54, %v823_v57  ;;  %v5309_v61 = vcombine.high %v815_v54, %v823_v57  ;;  %v943_v54 = vld [vmem:[#allocation4 + $0x708] sm:$0xff]  ;;  %v5434_v57 = vcombine.low %v942_v52, %v950_v53 }
  0xa2   :  { %611 = vmatpush1.bf16.msra.mxu0 %v5198_v62  ;;  %654 = vmatpush1.bf16.msra.mxu1 %v5200_v2  ;;  %v5323_v62 = vcombine.high %v830_v58, %v838_v59  ;;  %v846_v2 = vld [vmem:[#allocation4 + $0x400] sm:$0xff] }
  0xa3   :  { %612 = vmatprep.subr.bf16.mxu0 %v5207_v3  ;;  %655 = vmatprep.subr.bf16.mxu1 %v5209_v6  ;;  %v5325_v3 = vcombine.high %v831_v63, %v839_v1  ;;  %v855_v6 = vld [vmem:[#allocation4 + $0x448] sm:$0xff]  ;;  %v5339_v9 = vcombine.high %v846_v2, %v854_v4 }
  0xa4   :  { %v967_v1 = vld [vmem:[#allocation4 + $0x7c8] sm:$0xff] }
  0xa6   :  { %613 = vmatpush1.bf16.msra.mxu0 %v5206_v7  ;;  %656 = vmatpush1.bf16.msra.mxu1 %v5208_v10  ;;  %v5322_v7 = vcombine.low %v830_v58, %v838_v59  ;;  %v5341_v10 = vcombine.high %v847_v5, %v855_v6 }
  0xa7   :  { %2254 = vmatprep.subr.bf16.mxu0 %v5211_v11  ;;  %2297 = vmatprep.subr.bf16.mxu1 %v5213_v15  ;;  %v862_v11 = vld [vmem:[#allocation4 + $0x480] sm:$0xff]  ;;  %v871_v15 = vld [vmem:[#allocation4 + $0x4c8] sm:$0xff] }
  0xa9   :  { %631 = vmatmul.mubr.bf16.vlgmr.msra.gmra.mrb[4].mxu0 %v6556_v14  ;;  %674 = vmatmul.mubr.bf16.vlgmr.msra.gmra.mrb[4].mxu1 %v6556_v14  ;;  %v5259_v14 = vcombine.high %v766_v25, %v774_v26  ;;  %v894_v25 = vld [vmem:[#allocation4 + $0x580] sm:$0xff] }
  0xaa   :  { %2255 = vmatpush1.bf16.msra.mxu0 %v5210_v16  ;;  %2298 = vmatpush1.bf16.msra.mxu1 %v5212_v19  ;;  %v5338_v16 = vcombine.low %v846_v2, %v854_v4  ;;  %v5340_v19 = vcombine.low %v847_v5, %v855_v6  ;;  %v902_v26 = vld [vmem:[#allocation4 + $0x5c0] sm:$0xff]  ;;  %v6564_v5 = vld [vmem:[#allocation4 + $0x10] sm:$0xff] }
  0xab   :  { %2256 = vmatprep.subr.bf16.mxu0 %v5227_v20  ;;  %2299 = vmatprep.subr.bf16.mxu1 %v5229_v23  ;;  %v5355_v20 = vcombine.high %v862_v11, %v870_v12  ;;  %v5357_v23 = vcombine.high %v863_v13, %v871_v15  ;;  %v6566_v6 = vld [vmem:[#allocation4 + $0x50] sm:$0xff] }
  0xae   :  { %2257 = vmatpush1.bf16.msra.mxu0 %v5226_v24  ;;  %2300 = vmatpush1.bf16.msra.mxu1 %v5228_v27  ;;  %v5354_v24 = vcombine.low %v862_v11, %v870_v12  ;;  %v5356_v27 = vcombine.low %v863_v13, %v871_v15 }
  0xaf   :  { %2258 = vmatprep.subr.bf16.mxu0 %v5243_v28  ;;  %2301 = vmatprep.subr.bf16.mxu1 %v5245_v31  ;;  %v5371_v28 = vcombine.high %v878_v17, %v886_v18  ;;  %v5373_v31 = vcombine.high %v879_v21, %v887_v22 }
  0xb2   :  { %2259 = vmatpush1.bf16.msra.mxu0 %v5242_v32  ;;  %2302 = vmatpush1.bf16.msra.mxu1 %v5244_v35  ;;  %v5370_v32 = vcombine.low %v878_v17, %v886_v18  ;;  %v5372_v35 = vcombine.low %v879_v21, %v887_v22 }
  0xb3   :  { %2260 = vmatprep.subr.bf16.mxu0 %v5259_v14  ;;  %2303 = vmatprep.subr.bf16.mxu1 %v5261_v38  ;;  %v5387_v14 = vcombine.high %v894_v25, %v902_v26  ;;  %v5389_v38 = vcombine.high %v895_v29, %v903_v30 }
  0xb6   :  { %2261 = vmatpush1.bf16.msra.mxu0 %v5258_v39  ;;  %2304 = vmatpush1.bf16.msra.mxu1 %v5260_v40  ;;  %v5386_v39 = vcombine.low %v894_v25, %v902_v26  ;;  %v5388_v40 = vcombine.low %v895_v29, %v903_v30  ;;  %v698_v26 = vlaneseq  ;;  %v696_v29 = vld [vmem:[%s6779_s2] sm:$0x3] }
  0xb7   :  { %2262 = vmatprep.subr.bf16.mxu0 %v5275_v41  ;;  %2305 = vmatprep.subr.bf16.mxu1 %v5277_v42  ;;  %v5403_v41 = vcombine.high %v910_v33, %v918_v34  ;;  %v5405_v42 = vcombine.high %v911_v36, %v919_v37 }
  0xba   :  { %2263 = vmatpush1.bf16.msra.mxu0 %v5274_v0  ;;  %2306 = vmatpush1.bf16.msra.mxu1 %v5276_v43  ;;  %v5402_v0 = vcombine.low %v910_v33, %v918_v34  ;;  %v5404_v43 = vcombine.low %v911_v36, %v919_v37 }
  0xbb   :  { %2264 = vmatprep.subr.bf16.mxu0 %v5291_v47  ;;  %2307 = vmatprep.subr.bf16.mxu1 %v5293_v51  ;;  %v5419_v47 = vcombine.high %v926_v44, %v934_v45  ;;  %v5421_v51 = vcombine.high %v927_v46, %v935_v48 }
  0xbe   :  { %2265 = vmatpush1.bf16.msra.mxu0 %v5290_v49  ;;  %2308 = vmatpush1.bf16.msra.mxu1 %v5292_v50  ;;  %v5418_v49 = vcombine.low %v926_v44, %v934_v45  ;;  %v5420_v50 = vcombine.low %v927_v46, %v935_v48 }
  0xbf   :  { %2266 = vmatprep.subr.bf16.mxu0 %v5307_v56  ;;  %2309 = vmatprep.subr.bf16.mxu1 %v5309_v61  ;;  %v951_v56 = vld [vmem:[#allocation4 + $0x748] sm:$0xff]  ;;  %v966_v61 = vld [vmem:[#allocation4 + $0x7c0] sm:$0xff] }
  0xc0   :  { %v5436_v58 = vcombine.low %v943_v54, %v951_v56  ;;  %v5437_v59 = vcombine.high %v943_v54, %v951_v56 }
  0xc2   :  { %2267 = vmatpush1.bf16.msra.mxu0 %v5306_v55  ;;  %2310 = vmatpush1.bf16.msra.mxu1 %v5308_v60  ;;  %v5435_v55 = vcombine.high %v942_v52, %v950_v53  ;;  %v958_v60 = vld [vmem:[#allocation4 + $0x780] sm:$0xff] }
  0xc3   :  { %2268 = vmatprep.subr.bf16.mxu0 %v5323_v62  ;;  %2311 = vmatprep.subr.bf16.mxu1 %v5325_v3  ;;  %v959_v62 = vld [vmem:[#allocation4 + $0x788] sm:$0xff]  ;;  %v5451_v63 = vcombine.high %v958_v60, %v966_v61  ;;  %v5450_v2 = vcombine.low %v958_v60, %v966_v61  ;;  %v752_v61 = vld [vmem:[#allocation4 + $0x110] sm:$0xff] }
  0xc4   :  { %v5452_v3 = vcombine.low %v959_v62, %v967_v1  ;;  %v5453_v4 = vcombine.high %v959_v62, %v967_v1  ;;  %v760_v1 = vld [vmem:[#allocation4 + $0x150] sm:$0xff] }
  0xc6   :  { %2269 = vmatpush1.bf16.msra.mxu0 %v5322_v7  ;;  %2312 = vmatpush1.bf16.msra.mxu1 %v5324_v8  ;;  %v6568_v7 = vld [vmem:[#allocation4 + $0x18] sm:$0xff]  ;;  %v5215_v8 = vcombine.high %v6564_v5, %v6566_v6 }
  0xc7   :  { %2270 = vmatprep.subr.bf16.mxu0 %v5339_v9  ;;  %2313 = vmatprep.subr.bf16.mxu1 %v5341_v10  ;;  %v6572_v9 = vld [vmem:[#allocation4 + $0x58] sm:$0xff]  ;;  %v5214_v10 = vcombine.low %v6564_v5, %v6566_v6  ;;  %v5246_v5 = vcombine.low %v752_v61, %v760_v1 }
  0xc8   :  { %v5216_v11 = vcombine.low %v6568_v7, %v6572_v9  ;;  %v5217_v12 = vcombine.high %v6568_v7, %v6572_v9 }
  0xca   :  { %2271 = vmatpush1.bf16.msra.mxu0 %v5338_v16  ;;  %2314 = vmatpush1.bf16.msra.mxu1 %v5340_v19 }
  0xcb   :  { %2272 = vmatprep.subr.bf16.mxu0 %v5355_v20  ;;  %2315 = vmatprep.subr.bf16.mxu1 %v5357_v23 }
  0xce   :  { %2273 = vmatpush1.bf16.msra.mxu0 %v5354_v24  ;;  %2316 = vmatpush1.bf16.msra.mxu1 %v5356_v27  ;;  %v6580_v27 = vshrl.u32 %v698_v26, 7  ;;  %v808_v26 = vld [vmem:[#allocation4 + $0x2d0] sm:$0xff] }
  0xcf   :  { %2274 = vmatprep.subr.bf16.mxu0 %v5371_v28  ;;  %2317 = vmatprep.subr.bf16.mxu1 %v5373_v31 }
  0xd0   :  { %v6583_v28 = vsub.s32 0, %v6580_v27  ;;  %v6589_v30 = vsub.s32 1, %v6580_v27 }
  0xd2   :  { %2275 = vmatpush1.bf16.msra.mxu0 %v5370_v32  ;;  %2318 = vmatpush1.bf16.msra.mxu1 %v5372_v35  ;;  %v701_v35 = vrot.slane %v696_v29, %v6583_v28 }
  0xd3   :  { %2276 = vmatprep.subr.bf16.mxu0 %v5387_v14  ;;  %2319 = vmatprep.subr.bf16.mxu1 %v5389_v38  ;;  %v705_v38 = vrot.slane %v696_v29, %v6589_v30  ;;  %v801_v29 = vld [vmem:[#allocation4 + $0x298] sm:$0xff] }
  0xd6   :  { %2277 = vmatpush1.bf16.msra.mxu0 %v5386_v39  ;;  %2320 = vmatpush1.bf16.msra.mxu1 %v5388_v40 }
  0xd7   :  { %2278 = vmatprep.subr.bf16.mxu0 %v5403_v41  ;;  %2321 = vmatprep.subr.bf16.mxu1 %v5405_v42 }
  0xda   :  { %2279 = vmatpush1.bf16.msra.mxu0 %v5402_v0  ;;  %2322 = vmatpush1.bf16.msra.mxu1 %v5404_v43 }
  0xdb   :  { %2280 = vmatprep.subr.bf16.mxu0 %v5419_v47  ;;  %2323 = vmatprep.subr.bf16.mxu1 %v5421_v51 }
  0xde   :  { %2281 = vmatpush1.bf16.msra.mxu0 %v5418_v49  ;;  %2324 = vmatpush1.bf16.msra.mxu1 %v5420_v50 }
  0xdf   :  { %2282 = vmatprep.subr.bf16.mxu0 %v5435_v55  ;;  %2325 = vmatprep.subr.bf16.mxu1 %v5437_v59  ;;  %v736_v55 = vld [vmem:[#allocation4 + $0x90] sm:$0xff]  ;;  %v745_v59 = vld [vmem:[#allocation4 + $0xd8] sm:$0xff] }
  0xe2   :  { %2283 = vmatpush1.bf16.msra.mxu0 %v5434_v57  ;;  %2326 = vmatpush1.bf16.msra.mxu1 %v5436_v58  ;;  %v744_v57 = vld [vmem:[#allocation4 + $0xd0] sm:$0xff]  ;;  %v737_v58 = vld [vmem:[#allocation4 + $0x98] sm:$0xff] }
  0xe3   :  { %2284 = vmatprep.subr.bf16.mxu0 %v5451_v63  ;;  %2327 = vmatprep.subr.bf16.mxu1 %v5453_v4  ;;  %v5231_v62 = vcombine.high %v736_v55, %v744_v57  ;;  %v5233_v63 = vcombine.high %v737_v58, %v745_v59  ;;  %v5230_v4 = vcombine.low %v736_v55, %v744_v57 }
  0xe6   :  { %2285 = vmatpush1.bf16.msra.mxu0 %v5450_v2  ;;  %2328 = vmatpush1.bf16.msra.mxu1 %v5452_v3  ;;  %v753_v2 = vld [vmem:[#allocation4 + $0x118] sm:$0xff] }
  0xe7   :  { %2340 = vmatprep.subr.bf16.mxu0 %v5215_v8  ;;  %2383 = vmatprep.subr.bf16.mxu1 %v5217_v12  ;;  %v761_v3 = vld [vmem:[#allocation4 + $0x158] sm:$0xff]  ;;  %v5232_v8 = vcombine.low %v737_v58, %v745_v59  ;;  %v5247_v12 = vcombine.high %v752_v61, %v760_v1  ;;  %v864_v59 = vld [vmem:[#allocation4 + $0x490] sm:$0xff] }
  0xe8   :  { %v5248_v6 = vcombine.low %v753_v2, %v761_v3  ;;  %v872_v61 = vld [vmem:[#allocation4 + $0x4d0] sm:$0xff] }
 0x15c   :  { %v546_v13 = vpop.f32.mrb[0].mxu0  ;;  %v589_v15 = vpop.f32.mrb[0].mxu1 }
 0x15d   :  { %v548_v16 = vpop.f32.mrb[1].mxu0  ;;  %v684_v17 = vmax.f32 %v546_v13, %v589_v15  ;;  %v591_v18 = vpop.f32.mrb[1].mxu1  ;;  %v5249_v13 = vcombine.high %v753_v2, %v761_v3  ;;  %v768_v15 = vld [vmem:[#allocation4 + $0x190] sm:$0xff]  ;;  %v5359_v3 = vcombine.high %v864_v59, %v872_v61 }
 0x15e   :  { %v550_v19 = vpop.f32.mrb[2].mxu0  ;;  %v685_v20 = vmax.f32 %v548_v16, %v591_v18  ;;  %v593_v21 = vpop.f32.mrb[2].mxu1  ;;  %v776_v16 = vld [vmem:[#allocation4 + $0x1d0] sm:$0xff]  ;;  %v777_v18 = vld [vmem:[#allocation4 + $0x1d8] sm:$0xff] }
 0x15f   :  { %v552_v22 = vpop.f32.mrb[3].mxu0  ;;  %v686_v23 = vmax.f32 %v550_v19, %v593_v21  ;;  %v595_v24 = vpop.f32.mrb[3].mxu1  ;;  %v5263_v7 = vcombine.high %v768_v15, %v776_v16  ;;  %v785_v19 = vld [vmem:[#allocation4 + $0x218] sm:$0xff]  ;;  %v5262_v21 = vcombine.low %v768_v15, %v776_v16  ;;  %v5358_v16 = vcombine.low %v864_v59, %v872_v61  ;;  %v731_v59 = vld [vmem:[#allocation4 + $0x68] sm:$0xff] }
 0x160   :  { %v687_v25 = vmax.f32 %v552_v22, %v595_v24  ;;  %v889_v15 = vld [vmem:[#allocation4 + $0x558] sm:$0xff] }
 0x17c   :  { %v632_v31 = vpop.f32.mrb[4].mxu0  ;;  %v675_v32 = vpop.f32.mrb[4].mxu1 }
 0x17d   :  { %v634_v33 = vpop.f32.mrb[5].mxu0  ;;  %v688_v34 = vmax.f32 %v632_v31, %v675_v32  ;;  %v677_v14 = vpop.f32.mrb[5].mxu1  ;;  %v809_v31 = vld [vmem:[#allocation4 + $0x2d8] sm:$0xff] }
 0x17e   :  { %v636_v36 = vpop.f32.mrb[6].mxu0  ;;  %v689_v37 = vmax.f32 %v634_v33, %v677_v14  ;;  %v679_v39 = vpop.f32.mrb[6].mxu1  ;;  %v816_v14 = vld [vmem:[#allocation4 + $0x310] sm:$0xff] }
 0x17f   :  { %v638_v40 = vpop.f32.mrb[7].mxu0  ;;  %v692_v41 = vmax.f32 %v684_v17, %v688_v34  ;;  %v690_v42 = vmax.f32 %v636_v36, %v679_v39  ;;  %v681_v0 = vpop.f32.mrb[7].mxu1  ;;  %v769_v17 = vld [vmem:[#allocation4 + $0x198] sm:$0xff]  ;;  %v824_v36 = vld [vmem:[#allocation4 + $0x350] sm:$0xff] }
 0x180   :  { %v693_v43 = vmax.f32 %v685_v20, %v689_v37  ;;  %v691_v44 = vmax.f32 %v638_v40, %v681_v0  ;;  %v5265_v9 = vcombine.high %v769_v17, %v777_v18  ;;  %v793_v20 = vld [vmem:[#allocation4 + $0x258] sm:$0xff]  ;;  %v5264_v22 = vcombine.low %v769_v17, %v777_v18  ;;  %v832_v0 = vld [vmem:[#allocation4 + $0x390] sm:$0xff] }
 0x181   :  { %v708_v45 = vadd.f32 %v701_v35, %v692_v41  ;;  %v694_v46 = vmax.f32 %v686_v23, %v690_v42  ;;  %v5281_v24 = vcombine.high %v785_v19, %v793_v20  ;;  %v5280_v33 = vcombine.low %v785_v19, %v793_v20  ;;  %v817_v37 = vld [vmem:[#allocation4 + $0x318] sm:$0xff] }
 0x182   :  { %v709_v47 = vadd.f32 %v705_v38, %v693_v43  ;;  %v695_v48 = vmax.f32 %v687_v25, %v691_v44  ;;  %v800_v25 = vld [vmem:[#allocation4 + $0x290] sm:$0xff]  ;;  %v5296_v40 = vcombine.low %v801_v29, %v809_v31  ;;  %v5311_v41 = vcombine.high %v816_v14, %v824_v36  ;;  %v833_v44 = vld [vmem:[#allocation4 + $0x398] sm:$0xff] }
 0x183   :  { %v710_v49 = vadd.f32 %v701_v35, %v694_v46  ;;  %v712_v51 = vmax.f32 %v708_v45, 0.0  ;;  %v5295_v34 = vcombine.high %v800_v25, %v808_v26  ;;  %v5297_v35 = vcombine.high %v801_v29, %v809_v31  ;;  %v840_v43 = vld [vmem:[#allocation4 + $0x3d0] sm:$0xff]  ;;  %v841_v45 = vld [vmem:[#allocation4 + $0x3d8] sm:$0xff] }
 0x184   :  { %v711_v50 = vadd.f32 %v705_v38, %v695_v48  ;;  %v713_v53 = vmax.f32 %v709_v47, 0.0  ;;  %v825_v38 = vld [vmem:[#allocation4 + $0x358] sm:$0xff]  ;;  %v5294_v39 = vcombine.low %v800_v25, %v808_v26  ;;  %v5310_v46 = vcombine.low %v816_v14, %v824_v36 }
 0x185   :  { %v714_v52 = vmax.f32 %v710_v49, 0.0  ;;  %v5313_v42 = vcombine.high %v817_v37, %v825_v38  ;;  %v5312_v47 = vcombine.low %v817_v37, %v825_v38  ;;  %v5327_v48 = vcombine.high %v832_v0, %v840_v43  ;;  %v921_v25 = vld [vmem:[#allocation4 + $0x658] sm:$0xff] }
 0x186   :  { %v715_v54 = vmax.f32 %v711_v50, 0.0  ;;  %v5329_v49 = vcombine.high %v833_v44, %v841_v45  ;;  %v848_v50 = vld [vmem:[#allocation4 + $0x410] sm:$0xff]  ;;  %v5328_v55 = vcombine.low %v833_v44, %v841_v45  ;;  %v937_v14 = vld [vmem:[#allocation4 + $0x6d8] sm:$0xff] }
 0x187   :  { %v6593_v56 = vpack.c.bf16 %v714_v52, %v712_v51  ;;  %v856_v51 = vld [vmem:[#allocation4 + $0x450] sm:$0xff]  ;;  %v849_v52 = vld [vmem:[#allocation4 + $0x418] sm:$0xff] }
 0x188   :  { %v6595_v60 = vpack.c.bf16 %v715_v54, %v713_v53  ;;  %v857_v53 = vld [vmem:[#allocation4 + $0x458] sm:$0xff]  ;;  %v5326_v54 = vcombine.low %v832_v0, %v840_v43  ;;  %v5343_v57 = vcombine.high %v848_v50, %v856_v51  ;;  %v5342_v1 = vcombine.low %v848_v50, %v856_v51 }
 0x189   :  { %v5345_v58 = vcombine.high %v849_v52, %v857_v53  ;;  %v5344_v2 = vcombine.low %v849_v52, %v857_v53  ;;  %v953_v0 = vld [vmem:[#allocation4 + $0x758] sm:$0xff] }
 0x18a   :  { %2286 = vmatprep.mubr.bf16.mxu0 %v6595_v60  ;;  %2329 = vmatprep.mubr.bf16.mxu1 %v6595_v60  ;;  %v969_v50 = vld [vmem:[#allocation4 + $0x7d8] sm:$0xff] }
 0x18b   :  { %2287 = vmatmul.mubr.bf16.vlgmr.msra.gmra.mrb[8].mxu0 %v6593_v56  ;;  %2330 = vmatmul.mubr.bf16.vlgmr.msra.gmra.mrb[8].mxu1 %v6593_v56 }
 0x18c   :  { %2341 = vmatpush1.bf16.msra.mxu0 %v5214_v10  ;;  %2384 = vmatpush1.bf16.msra.mxu1 %v5216_v11  ;;  %v784_v10 = vld [vmem:[#allocation4 + $0x210] sm:$0xff] }
 0x18d   :  { %2372 = vmatprep.mubr.bf16.mxu0 %v6595_v60  ;;  %2415 = vmatprep.mubr.bf16.mxu1 %v6595_v60  ;;  %v792_v11 = vld [vmem:[#allocation4 + $0x250] sm:$0xff] }
 0x18e   :  { %2342 = vmatprep.subr.bf16.mxu0 %v5231_v62  ;;  %2385 = vmatprep.subr.bf16.mxu1 %v5233_v63  ;;  %v5279_v23 = vcombine.high %v784_v10, %v792_v11  ;;  %v5278_v32 = vcombine.low %v784_v10, %v792_v11  ;;  %v865_v62 = vld [vmem:[#allocation4 + $0x498] sm:$0xff] }
 0x18f   :  { %v873_v63 = vld [vmem:[#allocation4 + $0x4d8] sm:$0xff] }
 0x190   :  { %2343 = vmatpush1.bf16.msra.mxu0 %v5230_v4  ;;  %2386 = vmatpush1.bf16.msra.mxu1 %v5232_v8  ;;  %v5361_v4 = vcombine.high %v865_v62, %v873_v63  ;;  %v880_v8 = vld [vmem:[#allocation4 + $0x510] sm:$0xff]  ;;  %v5360_v17 = vcombine.low %v865_v62, %v873_v63  ;;  %v905_v10 = vld [vmem:[#allocation4 + $0x5d8] sm:$0xff] }
 0x191   :  { %2344 = vmatprep.subr.bf16.mxu0 %v5247_v12  ;;  %2387 = vmatprep.subr.bf16.mxu1 %v5249_v13  ;;  %v888_v12 = vld [vmem:[#allocation4 + $0x550] sm:$0xff]  ;;  %v881_v13 = vld [vmem:[#allocation4 + $0x518] sm:$0xff] }
 0x192   :  { %v5375_v18 = vcombine.high %v880_v8, %v888_v12  ;;  %v5374_v11 = vcombine.low %v880_v8, %v888_v12  ;;  %v5376_v19 = vcombine.low %v881_v13, %v889_v15  ;;  %v747_v8 = vld [vmem:[#allocation4 + $0xe8] sm:$0xff] }
 0x194   :  { %2345 = vmatpush1.bf16.msra.mxu0 %v5246_v5  ;;  %2388 = vmatpush1.bf16.msra.mxu1 %v5248_v6  ;;  %v5377_v5 = vcombine.high %v881_v13, %v889_v15  ;;  %v896_v6 = vld [vmem:[#allocation4 + $0x590] sm:$0xff] }
 0x195   :  { %2346 = vmatprep.subr.bf16.mxu0 %v5263_v7  ;;  %2389 = vmatprep.subr.bf16.mxu1 %v5265_v9  ;;  %v904_v7 = vld [vmem:[#allocation4 + $0x5d0] sm:$0xff]  ;;  %v897_v9 = vld [vmem:[#allocation4 + $0x598] sm:$0xff] }
 0x196   :  { %v5391_v20 = vcombine.high %v896_v6, %v904_v7  ;;  %v5390_v26 = vcombine.low %v896_v6, %v904_v7  ;;  %v5392_v29 = vcombine.low %v897_v9, %v905_v10  ;;  %v763_v6 = vld [vmem:[#allocation4 + $0x168] sm:$0xff] }
 0x198   :  { %2347 = vmatpush1.bf16.msra.mxu0 %v5262_v21  ;;  %2390 = vmatpush1.bf16.msra.mxu1 %v5264_v22  ;;  %v5393_v21 = vcombine.high %v897_v9, %v905_v10  ;;  %v912_v22 = vld [vmem:[#allocation4 + $0x610] sm:$0xff] }
 0x199   :  { %2348 = vmatprep.subr.bf16.mxu0 %v5279_v23  ;;  %2391 = vmatprep.subr.bf16.mxu1 %v5281_v24  ;;  %v920_v23 = vld [vmem:[#allocation4 + $0x650] sm:$0xff]  ;;  %v913_v24 = vld [vmem:[#allocation4 + $0x618] sm:$0xff] }
 0x19a   :  { %v5407_v31 = vcombine.high %v912_v22, %v920_v23  ;;  %v5406_v36 = vcombine.low %v912_v22, %v920_v23  ;;  %v5408_v37 = vcombine.low %v913_v24, %v921_v25  ;;  %v779_v22 = vld [vmem:[#allocation4 + $0x1e8] sm:$0xff] }
 0x19c   :  { %2349 = vmatpush1.bf16.msra.mxu0 %v5278_v32  ;;  %2392 = vmatpush1.bf16.msra.mxu1 %v5280_v33  ;;  %v5409_v32 = vcombine.high %v913_v24, %v921_v25  ;;  %v928_v33 = vld [vmem:[#allocation4 + $0x690] sm:$0xff] }
 0x19d   :  { %2350 = vmatprep.subr.bf16.mxu0 %v5295_v34  ;;  %2393 = vmatprep.subr.bf16.mxu1 %v5297_v35  ;;  %v936_v34 = vld [vmem:[#allocation4 + $0x6d0] sm:$0xff]  ;;  %v929_v35 = vld [vmem:[#allocation4 + $0x698] sm:$0xff] }
 0x19e   :  { %v5423_v38 = vcombine.high %v928_v33, %v936_v34  ;;  %v5422_v43 = vcombine.low %v928_v33, %v936_v34  ;;  %v5424_v44 = vcombine.low %v929_v35, %v937_v14  ;;  %v795_v33 = vld [vmem:[#allocation4 + $0x268] sm:$0xff] }
 0x1a0   :  { %2351 = vmatpush1.bf16.msra.mxu0 %v5294_v39  ;;  %2394 = vmatpush1.bf16.msra.mxu1 %v5296_v40  ;;  %v5425_v39 = vcombine.high %v929_v35, %v937_v14  ;;  %v944_v40 = vld [vmem:[#allocation4 + $0x710] sm:$0xff] }
 0x1a1   :  { %2352 = vmatprep.subr.bf16.mxu0 %v5311_v41  ;;  %2395 = vmatprep.subr.bf16.mxu1 %v5313_v42  ;;  %v952_v41 = vld [vmem:[#allocation4 + $0x750] sm:$0xff]  ;;  %v945_v42 = vld [vmem:[#allocation4 + $0x718] sm:$0xff] }
 0x1a2   :  { %v5439_v45 = vcombine.high %v944_v40, %v952_v41  ;;  %v5438_v51 = vcombine.low %v944_v40, %v952_v41  ;;  %v5440_v52 = vcombine.low %v945_v42, %v953_v0  ;;  %v811_v40 = vld [vmem:[#allocation4 + $0x2e8] sm:$0xff] }
 0x1a4   :  { %2353 = vmatpush1.bf16.msra.mxu0 %v5310_v46  ;;  %2396 = vmatpush1.bf16.msra.mxu1 %v5312_v47  ;;  %v5441_v46 = vcombine.high %v945_v42, %v953_v0  ;;  %v960_v47 = vld [vmem:[#allocation4 + $0x790] sm:$0xff] }
 0x1a5   :  { %2354 = vmatprep.subr.bf16.mxu0 %v5327_v48  ;;  %2397 = vmatprep.subr.bf16.mxu1 %v5329_v49  ;;  %v968_v48 = vld [vmem:[#allocation4 + $0x7d0] sm:$0xff]  ;;  %v961_v49 = vld [vmem:[#allocation4 + $0x798] sm:$0xff] }
 0x1a6   :  { %v5455_v53 = vcombine.high %v960_v47, %v968_v48  ;;  %v5454_v61 = vcombine.low %v960_v47, %v968_v48  ;;  %v5456_v62 = vcombine.low %v961_v49, %v969_v50  ;;  %v827_v47 = vld [vmem:[#allocation4 + $0x368] sm:$0xff] }
 0x1a8   :  { %2355 = vmatpush1.bf16.msra.mxu0 %v5326_v54  ;;  %2398 = vmatpush1.bf16.msra.mxu1 %v5328_v55  ;;  %v5457_v54 = vcombine.high %v961_v49, %v969_v50  ;;  %v722_v55 = vld [vmem:[#allocation4 + $0x20] sm:$0xff] }
 0x1a9   :  { %2356 = vmatprep.subr.bf16.mxu0 %v5343_v57  ;;  %2399 = vmatprep.subr.bf16.mxu1 %v5345_v58  ;;  %v730_v57 = vld [vmem:[#allocation4 + $0x60] sm:$0xff]  ;;  %v723_v58 = vld [vmem:[#allocation4 + $0x28] sm:$0xff] }
 0x1aa   :  { %v5219_v63 = vcombine.high %v722_v55, %v730_v57  ;;  %v5218_v12 = vcombine.low %v722_v55, %v730_v57  ;;  %v5220_v13 = vcombine.low %v723_v58, %v731_v59  ;;  %v843_v55 = vld [vmem:[#allocation4 + $0x3e8] sm:$0xff] }
 0x1ac   :  { %2357 = vmatpush1.bf16.msra.mxu0 %v5342_v1  ;;  %2400 = vmatpush1.bf16.msra.mxu1 %v5344_v2  ;;  %v5221_v1 = vcombine.high %v723_v58, %v731_v59  ;;  %v738_v2 = vld [vmem:[#allocation4 + $0xa0] sm:$0xff] }
 0x1ad   :  { %2358 = vmatprep.subr.bf16.mxu0 %v5359_v3  ;;  %2401 = vmatprep.subr.bf16.mxu1 %v5361_v4  ;;  %v746_v3 = vld [vmem:[#allocation4 + $0xe0] sm:$0xff]  ;;  %v739_v4 = vld [vmem:[#allocation4 + $0xa8] sm:$0xff] }
 0x1ae   :  { %v5235_v15 = vcombine.high %v738_v2, %v746_v3  ;;  %v5234_v7 = vcombine.low %v738_v2, %v746_v3  ;;  %v5236_v9 = vcombine.low %v739_v4, %v747_v8  ;;  %v859_v2 = vld [vmem:[#allocation4 + $0x468] sm:$0xff] }
 0x1b0   :  { %2359 = vmatpush1.bf16.msra.mxu0 %v5358_v16  ;;  %2402 = vmatpush1.bf16.msra.mxu1 %v5360_v17  ;;  %v5237_v16 = vcombine.high %v739_v4, %v747_v8  ;;  %v754_v17 = vld [vmem:[#allocation4 + $0x120] sm:$0xff] }
 0x1b1   :  { %2360 = vmatprep.subr.bf16.mxu0 %v5375_v18  ;;  %2403 = vmatprep.subr.bf16.mxu1 %v5377_v5  ;;  %v762_v18 = vld [vmem:[#allocation4 + $0x160] sm:$0xff]  ;;  %v755_v5 = vld [vmem:[#allocation4 + $0x128] sm:$0xff] }
 0x1b2   :  { %v5251_v10 = vcombine.high %v754_v17, %v762_v18  ;;  %v5250_v23 = vcombine.low %v754_v17, %v762_v18  ;;  %v5252_v24 = vcombine.low %v755_v5, %v763_v6  ;;  %v875_v17 = vld [vmem:[#allocation4 + $0x4e8] sm:$0xff] }
 0x1b4   :  { %2361 = vmatpush1.bf16.msra.mxu0 %v5374_v11  ;;  %2404 = vmatpush1.bf16.msra.mxu1 %v5376_v19  ;;  %v5253_v11 = vcombine.high %v755_v5, %v763_v6  ;;  %v770_v19 = vld [vmem:[#allocation4 + $0x1a0] sm:$0xff] }
 0x1b5   :  { %2362 = vmatprep.subr.bf16.mxu0 %v5391_v20  ;;  %2405 = vmatprep.subr.bf16.mxu1 %v5393_v21  ;;  %v778_v20 = vld [vmem:[#allocation4 + $0x1e0] sm:$0xff]  ;;  %v771_v21 = vld [vmem:[#allocation4 + $0x1a8] sm:$0xff] }
 0x1b6   :  { %v5267_v25 = vcombine.high %v770_v19, %v778_v20  ;;  %v5266_v34 = vcombine.low %v770_v19, %v778_v20  ;;  %v5268_v35 = vcombine.low %v771_v21, %v779_v22  ;;  %v891_v19 = vld [vmem:[#allocation4 + $0x568] sm:$0xff] }
 0x1b8   :  { %2363 = vmatpush1.bf16.msra.mxu0 %v5390_v26  ;;  %2406 = vmatpush1.bf16.msra.mxu1 %v5392_v29  ;;  %v5269_v26 = vcombine.high %v771_v21, %v779_v22  ;;  %v786_v29 = vld [vmem:[#allocation4 + $0x220] sm:$0xff] }
 0x1b9   :  { %2364 = vmatprep.subr.bf16.mxu0 %v5407_v31  ;;  %2407 = vmatprep.subr.bf16.mxu1 %v5409_v32  ;;  %v794_v31 = vld [vmem:[#allocation4 + $0x260] sm:$0xff]  ;;  %v787_v32 = vld [vmem:[#allocation4 + $0x228] sm:$0xff] }
 0x1ba   :  { %v5283_v14 = vcombine.high %v786_v29, %v794_v31  ;;  %v5282_v41 = vcombine.low %v786_v29, %v794_v31  ;;  %v5284_v42 = vcombine.low %v787_v32, %v795_v33  ;;  %v907_v29 = vld [vmem:[#allocation4 + $0x5e8] sm:$0xff] }
 0x1bc   :  { %2365 = vmatpush1.bf16.msra.mxu0 %v5406_v36  ;;  %2408 = vmatpush1.bf16.msra.mxu1 %v5408_v37  ;;  %v5285_v36 = vcombine.high %v787_v32, %v795_v33  ;;  %v802_v37 = vld [vmem:[#allocation4 + $0x2a0] sm:$0xff] }
 0x1bd   :  { %2366 = vmatprep.subr.bf16.mxu0 %v5423_v38  ;;  %2409 = vmatprep.subr.bf16.mxu1 %v5425_v39  ;;  %v810_v38 = vld [vmem:[#allocation4 + $0x2e0] sm:$0xff]  ;;  %v803_v39 = vld [vmem:[#allocation4 + $0x2a8] sm:$0xff] }
 0x1be   :  { %v5299_v0 = vcombine.high %v802_v37, %v810_v38  ;;  %v5298_v48 = vcombine.low %v802_v37, %v810_v38  ;;  %v5300_v49 = vcombine.low %v803_v39, %v811_v40  ;;  %v923_v37 = vld [vmem:[#allocation4 + $0x668] sm:$0xff] }
 0x1c0   :  { %2367 = vmatpush1.bf16.msra.mxu0 %v5422_v43  ;;  %2410 = vmatpush1.bf16.msra.mxu1 %v5424_v44  ;;  %v5301_v43 = vcombine.high %v803_v39, %v811_v40  ;;  %v818_v44 = vld [vmem:[#allocation4 + $0x320] sm:$0xff] }
 0x1c1   :  { %2368 = vmatprep.subr.bf16.mxu0 %v5439_v45  ;;  %2411 = vmatprep.subr.bf16.mxu1 %v5441_v46  ;;  %v826_v45 = vld [vmem:[#allocation4 + $0x360] sm:$0xff]  ;;  %v819_v46 = vld [vmem:[#allocation4 + $0x328] sm:$0xff] }
 0x1c2   :  { %v5315_v50 = vcombine.high %v818_v44, %v826_v45  ;;  %v5314_v57 = vcombine.low %v818_v44, %v826_v45  ;;  %v5316_v58 = vcombine.low %v819_v46, %v827_v47  ;;  %v939_v44 = vld [vmem:[#allocation4 + $0x6e8] sm:$0xff] }
 0x1c4   :  { %2369 = vmatpush1.bf16.msra.mxu0 %v5438_v51  ;;  %2412 = vmatpush1.bf16.msra.mxu1 %v5440_v52  ;;  %v5317_v51 = vcombine.high %v819_v46, %v827_v47  ;;  %v834_v52 = vld [vmem:[#allocation4 + $0x3a0] sm:$0xff] }
 0x1c5   :  { %2370 = vmatprep.subr.bf16.mxu0 %v5455_v53  ;;  %2413 = vmatprep.subr.bf16.mxu1 %v5457_v54  ;;  %v842_v53 = vld [vmem:[#allocation4 + $0x3e0] sm:$0xff]  ;;  %v835_v54 = vld [vmem:[#allocation4 + $0x3a8] sm:$0xff] }
 0x1c6   :  { %v5331_v59 = vcombine.high %v834_v52, %v842_v53  ;;  %v5330_v3 = vcombine.low %v834_v52, %v842_v53  ;;  %v5332_v4 = vcombine.low %v835_v54, %v843_v55  ;;  %v955_v52 = vld [vmem:[#allocation4 + $0x768] sm:$0xff] }
 0x1c8   :  { %2371 = vmatpush1.bf16.msra.mxu0 %v5454_v61  ;;  %2414 = vmatpush1.bf16.msra.mxu1 %v5456_v62  ;;  %v5333_v61 = vcombine.high %v835_v54, %v843_v55  ;;  %v850_v62 = vld [vmem:[#allocation4 + $0x420] sm:$0xff] }
 0x1c9   :  { %2426 = vmatprep.subr.bf16.mxu0 %v5219_v63  ;;  %2469 = vmatprep.subr.bf16.mxu1 %v5221_v1  ;;  %v858_v63 = vld [vmem:[#allocation4 + $0x460] sm:$0xff]  ;;  %v851_v1 = vld [vmem:[#allocation4 + $0x428] sm:$0xff] }
 0x1ca   :  { %v5347_v8 = vcombine.high %v850_v62, %v858_v63  ;;  %v5346_v18 = vcombine.low %v850_v62, %v858_v63  ;;  %v5348_v5 = vcombine.low %v851_v1, %v859_v2  ;;  %v971_v62 = vld [vmem:[#allocation4 + $0x7e8] sm:$0xff] }
 0x1cb   :  { %2373 = vmatmul.mubr.bf16.vlgmr.msra.gmra.mrb[12].mxu0 %v6593_v56  ;;  %2416 = vmatmul.mubr.bf16.vlgmr.msra.gmra.mrb[12].mxu1 %v6593_v56 }
 0x1cc   :  { %2427 = vmatpush1.bf16.msra.mxu0 %v5218_v12  ;;  %2458 = vmatprep.mubr.bf16.mxu0 %v6595_v60  ;;  %v5349_v12 = vcombine.high %v851_v1, %v859_v2 }
 0x1cd   :  { %2470 = vmatpush1.bf16.msra.mxu1 %v5220_v13  ;;  %2501 = vmatprep.mubr.bf16.mxu1 %v6595_v60  ;;  %v866_v13 = vld [vmem:[#allocation4 + $0x4a0] sm:$0xff] }
 0x1ce   :  { %2428 = vmatprep.subr.bf16.mxu0 %v5235_v15  ;;  %2471 = vmatprep.subr.bf16.mxu1 %v5237_v16  ;;  %v874_v15 = vld [vmem:[#allocation4 + $0x4e0] sm:$0xff]  ;;  %v867_v16 = vld [vmem:[#allocation4 + $0x4a8] sm:$0xff] }
 0x1cf   :  { %v5363_v6 = vcombine.high %v866_v13, %v874_v15  ;;  %v5362_v20 = vcombine.low %v866_v13, %v874_v15  ;;  %v5364_v21 = vcombine.low %v867_v16, %v875_v17  ;;  %v733_v13 = vld [vmem:[#allocation4 + $0x78] sm:$0xff] }
 0x1d0   :  { %2429 = vmatpush1.bf16.msra.mxu0 %v5234_v7  ;;  %v5365_v7 = vcombine.high %v867_v16, %v875_v17 }
 0x1d1   :  { %2472 = vmatpush1.bf16.msra.mxu1 %v5236_v9  ;;  %2430 = vmatprep.subr.bf16.mxu0 %v5251_v10  ;;  %v882_v9 = vld [vmem:[#allocation4 + $0x520] sm:$0xff] }
 0x1d2   :  { %2473 = vmatprep.subr.bf16.mxu1 %v5253_v11  ;;  %v890_v10 = vld [vmem:[#allocation4 + $0x560] sm:$0xff]  ;;  %v883_v11 = vld [vmem:[#allocation4 + $0x528] sm:$0xff] }
 0x1d3   :  { %v5379_v22 = vcombine.high %v882_v9, %v890_v10  ;;  %v5378_v31 = vcombine.low %v882_v9, %v890_v10  ;;  %v5380_v32 = vcombine.low %v883_v11, %v891_v19  ;;  %v741_v9 = vld [vmem:[#allocation4 + $0xb8] sm:$0xff] }
 0x1d4   :  { %2431 = vmatpush1.bf16.msra.mxu0 %v5250_v23  ;;  %v5381_v23 = vcombine.high %v883_v11, %v891_v19  ;;  %v749_v10 = vld [vmem:[#allocation4 + $0xf8] sm:$0xff] }
 0x1d5   :  { %2474 = vmatpush1.bf16.msra.mxu1 %v5252_v24  ;;  %2432 = vmatprep.subr.bf16.mxu0 %v5267_v25  ;;  %v898_v24 = vld [vmem:[#allocation4 + $0x5a0] sm:$0xff] }
 0x1d6   :  { %2475 = vmatprep.subr.bf16.mxu1 %v5269_v26  ;;  %v906_v25 = vld [vmem:[#allocation4 + $0x5e0] sm:$0xff]  ;;  %v899_v26 = vld [vmem:[#allocation4 + $0x5a8] sm:$0xff] }
 0x1d7   :  { %v5395_v33 = vcombine.high %v898_v24, %v906_v25  ;;  %v5394_v38 = vcombine.low %v898_v24, %v906_v25  ;;  %v5396_v39 = vcombine.low %v899_v26, %v907_v29  ;;  %v765_v24 = vld [vmem:[#allocation4 + $0x178] sm:$0xff] }
 0x1d8   :  { %2433 = vmatpush1.bf16.msra.mxu0 %v5266_v34  ;;  %v5397_v34 = vcombine.high %v899_v26, %v907_v29  ;;  %v5240_v26 = vcombine.low %v741_v9, %v749_v10 }
 0x1d9   :  { %2476 = vmatpush1.bf16.msra.mxu1 %v5268_v35  ;;  %2434 = vmatprep.subr.bf16.mxu0 %v5283_v14  ;;  %v914_v35 = vld [vmem:[#allocation4 + $0x620] sm:$0xff] }
 0x1da   :  { %2477 = vmatprep.subr.bf16.mxu1 %v5285_v36  ;;  %v922_v14 = vld [vmem:[#allocation4 + $0x660] sm:$0xff]  ;;  %v915_v36 = vld [vmem:[#allocation4 + $0x628] sm:$0xff] }
 0x1db   :  { %v5411_v40 = vcombine.high %v914_v35, %v922_v14  ;;  %v5410_v45 = vcombine.low %v914_v35, %v922_v14  ;;  %v5412_v46 = vcombine.low %v915_v36, %v923_v37  ;;  %v781_v35 = vld [vmem:[#allocation4 + $0x1f8] sm:$0xff] }
 0x1dc   :  { %2435 = vmatpush1.bf16.msra.mxu0 %v5282_v41  ;;  %v5413_v41 = vcombine.high %v915_v36, %v923_v37 }
 0x1dd   :  { %2478 = vmatpush1.bf16.msra.mxu1 %v5284_v42  ;;  %2436 = vmatprep.subr.bf16.mxu0 %v5299_v0  ;;  %v930_v42 = vld [vmem:[#allocation4 + $0x6a0] sm:$0xff] }
 0x1de   :  { %2479 = vmatprep.subr.bf16.mxu1 %v5301_v43  ;;  %v938_v0 = vld [vmem:[#allocation4 + $0x6e0] sm:$0xff]  ;;  %v931_v43 = vld [vmem:[#allocation4 + $0x6a8] sm:$0xff] }
 0x1df   :  { %v5427_v47 = vcombine.high %v930_v42, %v938_v0  ;;  %v5426_v53 = vcombine.low %v930_v42, %v938_v0  ;;  %v5428_v54 = vcombine.low %v931_v43, %v939_v44  ;;  %v797_v42 = vld [vmem:[#allocation4 + $0x278] sm:$0xff] }
 0x1e0   :  { %2437 = vmatpush1.bf16.msra.mxu0 %v5298_v48  ;;  %v5429_v48 = vcombine.high %v931_v43, %v939_v44 }
 0x1e1   :  { %2480 = vmatpush1.bf16.msra.mxu1 %v5300_v49  ;;  %2438 = vmatprep.subr.bf16.mxu0 %v5315_v50  ;;  %v946_v49 = vld [vmem:[#allocation4 + $0x720] sm:$0xff] }
 0x1e2   :  { %2481 = vmatprep.subr.bf16.mxu1 %v5317_v51  ;;  %v954_v50 = vld [vmem:[#allocation4 + $0x760] sm:$0xff]  ;;  %v947_v51 = vld [vmem:[#allocation4 + $0x728] sm:$0xff] }
 0x1e3   :  { %v5443_v55 = vcombine.high %v946_v49, %v954_v50  ;;  %v5442_v63 = vcombine.low %v946_v49, %v954_v50  ;;  %v5444_v1 = vcombine.low %v947_v51, %v955_v52 }
 0x1e4   :  { %2439 = vmatpush1.bf16.msra.mxu0 %v5314_v57  ;;  %v5445_v57 = vcombine.high %v947_v51, %v955_v52 }
 0x1e5   :  { %2482 = vmatpush1.bf16.msra.mxu1 %v5316_v58  ;;  %2440 = vmatprep.subr.bf16.mxu0 %v5331_v59  ;;  %v962_v58 = vld [vmem:[#allocation4 + $0x7a0] sm:$0xff] }
 0x1e6   :  { %2483 = vmatprep.subr.bf16.mxu1 %v5333_v61  ;;  %v970_v59 = vld [vmem:[#allocation4 + $0x7e0] sm:$0xff]  ;;  %v963_v61 = vld [vmem:[#allocation4 + $0x7a8] sm:$0xff] }
 0x1e7   :  { %v5459_v2 = vcombine.high %v962_v58, %v970_v59  ;;  %v5458_v15 = vcombine.low %v962_v58, %v970_v59  ;;  %v5460_v16 = vcombine.low %v963_v61, %v971_v62 }
 0x1e8   :  { %2441 = vmatpush1.bf16.msra.mxu0 %v5330_v3  ;;  %v5461_v3 = vcombine.high %v963_v61, %v971_v62 }
 0x1e9   :  { %2484 = vmatpush1.bf16.msra.mxu1 %v5332_v4  ;;  %2442 = vmatprep.subr.bf16.mxu0 %v5347_v8  ;;  %v724_v4 = vld [vmem:[#allocation4 + $0x30] sm:$0xff] }
 0x1ea   :  { %2485 = vmatprep.subr.bf16.mxu1 %v5349_v12  ;;  %v732_v8 = vld [vmem:[#allocation4 + $0x70] sm:$0xff]  ;;  %v725_v12 = vld [vmem:[#allocation4 + $0x38] sm:$0xff] }
 0x1eb   :  { %v5223_v17 = vcombine.high %v724_v4, %v732_v8  ;;  %v5224_v11 = vcombine.low %v725_v12, %v733_v13 }
 0x1ec   :  { %2443 = vmatpush1.bf16.msra.mxu0 %v5346_v18  ;;  %v5225_v18 = vcombine.high %v725_v12, %v733_v13 }
 0x1ed   :  { %2486 = vmatpush1.bf16.msra.mxu1 %v5348_v5  ;;  %2444 = vmatprep.subr.bf16.mxu0 %v5363_v6  ;;  %v740_v5 = vld [vmem:[#allocation4 + $0xb0] sm:$0xff] }
 0x1ee   :  { %2487 = vmatprep.subr.bf16.mxu1 %v5365_v7  ;;  %v748_v6 = vld [vmem:[#allocation4 + $0xf0] sm:$0xff]  ;;  %v5222_v7 = vcombine.low %v724_v4, %v732_v8 }
 0x1ef   :  { %v5239_v19 = vcombine.high %v740_v5, %v748_v6  ;;  %v5238_v25 = vcombine.low %v740_v5, %v748_v6 }
 0x1f0   :  { %2445 = vmatpush1.bf16.msra.mxu0 %v5362_v20  ;;  %v756_v20 = vld [vmem:[#allocation4 + $0x130] sm:$0xff] }
 0x1f1   :  { %2488 = vmatpush1.bf16.msra.mxu1 %v5364_v21  ;;  %2446 = vmatprep.subr.bf16.mxu0 %v5379_v22  ;;  %v764_v21 = vld [vmem:[#allocation4 + $0x170] sm:$0xff]  ;;  %v5241_v22 = vcombine.high %v741_v9, %v749_v10 }
 0x1f2   :  { %2489 = vmatprep.subr.bf16.mxu1 %v5381_v23  ;;  %v757_v23 = vld [vmem:[#allocation4 + $0x138] sm:$0xff]  ;;  %v5255_v29 = vcombine.high %v756_v20, %v764_v21  ;;  %v5254_v14 = vcombine.low %v756_v20, %v764_v21  ;;  %v868_v10 = vld [vmem:[#allocation4 + $0x4b0] sm:$0xff] }
 0x1f3   :  { %v5256_v36 = vcombine.low %v757_v23, %v765_v24  ;;  %v877_v20 = vld [vmem:[#allocation4 + $0x4f8] sm:$0xff] }
 0x1f4   :  { %2447 = vmatpush1.bf16.msra.mxu0 %v5378_v31  ;;  %v5257_v31 = vcombine.high %v757_v23, %v765_v24 }
 0x1f5   :  { %2490 = vmatpush1.bf16.msra.mxu1 %v5380_v32  ;;  %2448 = vmatprep.subr.bf16.mxu0 %v5395_v33  ;;  %v772_v32 = vld [vmem:[#allocation4 + $0x1b0] sm:$0xff] }
 0x1f6   :  { %2491 = vmatprep.subr.bf16.mxu1 %v5397_v34  ;;  %v780_v33 = vld [vmem:[#allocation4 + $0x1f0] sm:$0xff]  ;;  %v773_v34 = vld [vmem:[#allocation4 + $0x1b8] sm:$0xff] }
 0x1f7   :  { %v5271_v37 = vcombine.high %v772_v32, %v780_v33  ;;  %v5272_v0 = vcombine.low %v773_v34, %v781_v35 }
 0x1f8   :  { %2449 = vmatpush1.bf16.msra.mxu0 %v5394_v38  ;;  %v5273_v38 = vcombine.high %v773_v34, %v781_v35 }
 0x1f9   :  { %2492 = vmatpush1.bf16.msra.mxu1 %v5396_v39  ;;  %2450 = vmatprep.subr.bf16.mxu0 %v5411_v40  ;;  %v788_v39 = vld [vmem:[#allocation4 + $0x230] sm:$0xff] }
 0x1fa   :  { %2493 = vmatprep.subr.bf16.mxu1 %v5413_v41  ;;  %v796_v40 = vld [vmem:[#allocation4 + $0x270] sm:$0xff]  ;;  %v789_v41 = vld [vmem:[#allocation4 + $0x238] sm:$0xff] }
 0x1fb   :  { %v5287_v43 = vcombine.high %v788_v39, %v796_v40  ;;  %v5289_v44 = vcombine.high %v789_v41, %v797_v42  ;;  %v5286_v49 = vcombine.low %v788_v39, %v796_v40  ;;  %v5288_v50 = vcombine.low %v789_v41, %v797_v42 }
 0x1fc   :  { %2451 = vmatpush1.bf16.msra.mxu0 %v5410_v45  ;;  %v804_v45 = vld [vmem:[#allocation4 + $0x2b0] sm:$0xff] }
 0x1fd   :  { %2494 = vmatpush1.bf16.msra.mxu1 %v5412_v46  ;;  %2452 = vmatprep.subr.bf16.mxu0 %v5427_v47  ;;  %v812_v46 = vld [vmem:[#allocation4 + $0x2f0] sm:$0xff]  ;;  %v805_v47 = vld [vmem:[#allocation4 + $0x2b8] sm:$0xff] }
 0x1fe   :  { %2495 = vmatprep.subr.bf16.mxu1 %v5429_v48  ;;  %v813_v48 = vld [vmem:[#allocation4 + $0x2f8] sm:$0xff]  ;;  %v5303_v51 = vcombine.high %v804_v45, %v812_v46  ;;  %v5302_v58 = vcombine.low %v804_v45, %v812_v46 }
 0x1ff   :  { %v5305_v52 = vcombine.high %v805_v47, %v813_v48  ;;  %v5304_v59 = vcombine.low %v805_v47, %v813_v48 }
 0x200   :  { %2453 = vmatpush1.bf16.msra.mxu0 %v5426_v53  ;;  %v820_v53 = vld [vmem:[#allocation4 + $0x330] sm:$0xff] }
 0x201   :  { %2496 = vmatpush1.bf16.msra.mxu1 %v5428_v54  ;;  %2454 = vmatprep.subr.bf16.mxu0 %v5443_v55  ;;  %v828_v54 = vld [vmem:[#allocation4 + $0x370] sm:$0xff]  ;;  %v821_v55 = vld [vmem:[#allocation4 + $0x338] sm:$0xff] }
 0x202   :  { %2497 = vmatprep.subr.bf16.mxu1 %v5445_v57  ;;  %v829_v57 = vld [vmem:[#allocation4 + $0x378] sm:$0xff]  ;;  %v5319_v61 = vcombine.high %v820_v53, %v828_v54  ;;  %v5318_v4 = vcombine.low %v820_v53, %v828_v54 }
 0x203   :  { %v5321_v62 = vcombine.high %v821_v55, %v829_v57  ;;  %v5320_v8 = vcombine.low %v821_v55, %v829_v57 }
 0x204   :  { %2455 = vmatpush1.bf16.msra.mxu0 %v5442_v63  ;;  %v836_v63 = vld [vmem:[#allocation4 + $0x3b0] sm:$0xff] }
 0x205   :  { %2498 = vmatpush1.bf16.msra.mxu1 %v5444_v1  ;;  %2456 = vmatprep.subr.bf16.mxu0 %v5459_v2  ;;  %v844_v1 = vld [vmem:[#allocation4 + $0x3f0] sm:$0xff]  ;;  %v837_v2 = vld [vmem:[#allocation4 + $0x3b8] sm:$0xff] }
 0x206   :  { %2499 = vmatprep.subr.bf16.mxu1 %v5461_v3  ;;  %v845_v3 = vld [vmem:[#allocation4 + $0x3f8] sm:$0xff]  ;;  %v5335_v12 = vcombine.high %v836_v63, %v844_v1  ;;  %v5334_v5 = vcombine.low %v836_v63, %v844_v1 }
 0x207   :  { %v5337_v13 = vcombine.high %v837_v2, %v845_v3  ;;  %v5336_v6 = vcombine.low %v837_v2, %v845_v3 }
 0x208   :  { %2457 = vmatpush1.bf16.msra.mxu0 %v5458_v15  ;;  %v852_v15 = vld [vmem:[#allocation4 + $0x430] sm:$0xff] }
 0x209   :  { %2500 = vmatpush1.bf16.msra.mxu1 %v5460_v16  ;;  %2512 = vmatprep.subr.bf16.mxu0 %v5223_v17  ;;  %v860_v16 = vld [vmem:[#allocation4 + $0x470] sm:$0xff]  ;;  %v853_v17 = vld [vmem:[#allocation4 + $0x438] sm:$0xff] }
 0x20a   :  { %2555 = vmatprep.subr.bf16.mxu1 %v5225_v18  ;;  %v861_v18 = vld [vmem:[#allocation4 + $0x478] sm:$0xff]  ;;  %v5350_v21 = vcombine.low %v852_v15, %v860_v16 }
 0x20b   :  { %2459 = vmatmul.mubr.bf16.vlgmr.msra.gmra.mrb[16].mxu0 %v6593_v56  ;;  %v5353_v9 = vcombine.high %v853_v17, %v861_v18 }
 0x20c   :  { %2502 = vmatmul.mubr.bf16.vlgmr.msra.gmra.mrb[16].mxu1 %v6593_v56  ;;  %2513 = vmatpush1.bf16.msra.mxu0 %v5222_v7  ;;  %v5351_v7 = vcombine.high %v852_v15, %v860_v16 }
 0x20d   :  { %2544 = vmatprep.mubr.bf16.mxu0 %v6595_v60  ;;  %2556 = vmatpush1.bf16.msra.mxu1 %v5224_v11  ;;  %v876_v11 = vld [vmem:[#allocation4 + $0x4f0] sm:$0xff] }
 0x20e   :  { %2587 = vmatprep.mubr.bf16.mxu1 %v6595_v60  ;;  %2514 = vmatprep.subr.bf16.mxu0 %v5239_v19  ;;  %v5270_v60 = vcombine.low %v772_v32, %v780_v33  ;;  %v869_v19 = vld [vmem:[#allocation4 + $0x4b8] sm:$0xff]  ;;  %v5367_v23 = vcombine.high %v868_v10, %v876_v11  ;;  %v5366_v32 = vcombine.low %v868_v10, %v876_v11 }
 0x20f   :  { %2557 = vmatprep.subr.bf16.mxu1 %v5241_v22  ;;  %v5352_v22 = vcombine.low %v853_v17, %v861_v18  ;;  %v5369_v24 = vcombine.high %v869_v19, %v877_v20  ;;  %v5368_v33 = vcombine.low %v869_v19, %v877_v20 }
 0x210   :  { %2515 = vmatpush1.bf16.msra.mxu0 %v5238_v25  ;;  %v884_v25 = vld [vmem:[#allocation4 + $0x530] sm:$0xff] }
 0x211   :  { %2558 = vmatpush1.bf16.msra.mxu1 %v5240_v26  ;;  %2516 = vmatprep.subr.bf16.mxu0 %v5255_v29  ;;  %v892_v26 = vld [vmem:[#allocation4 + $0x570] sm:$0xff]  ;;  %v885_v29 = vld [vmem:[#allocation4 + $0x538] sm:$0xff] }
 0x212   :  { %2559 = vmatprep.subr.bf16.mxu1 %v5257_v31  ;;  %v893_v31 = vld [vmem:[#allocation4 + $0x578] sm:$0xff]  ;;  %v5383_v34 = vcombine.high %v884_v25, %v892_v26  ;;  %v5382_v39 = vcombine.low %v884_v25, %v892_v26  ;;  %v5852_v26 = vld [vmem:[#allocation6 + $0x24] ss:$16 sps:$4 sm:$0xff]  }
 0x213   :  { %v5385_v35 = vcombine.high %v885_v29, %v893_v31  ;;  %v5384_v40 = vcombine.low %v885_v29, %v893_v31  ;;  %v5847_v25 = vld [vmem:[#allocation6 + $0x8] ss:$16 sps:$4 sm:$0xff]   ;;  %v5855_v29 = vld [vmem:[#allocation6 + $0x2c] ss:$16 sps:$4 sm:$0xff]   ;;  %v5850_v31 = vld [vmem:[#allocation6 + $0x20] ss:$16 sps:$4 sm:$0xff]  }
 0x214   :  { %2517 = vmatpush1.bf16.msra.mxu0 %v5254_v14  ;;  %v900_v14 = vld [vmem:[#allocation4 + $0x5b0] sm:$0xff] }
 0x215   :  { %2560 = vmatpush1.bf16.msra.mxu1 %v5256_v36  ;;  %2518 = vmatprep.subr.bf16.mxu0 %v5271_v37  ;;  %v908_v36 = vld [vmem:[#allocation4 + $0x5f0] sm:$0xff]  ;;  %v901_v37 = vld [vmem:[#allocation4 + $0x5b8] sm:$0xff] }
 0x216   :  { %2561 = vmatprep.subr.bf16.mxu1 %v5273_v38  ;;  %v909_v38 = vld [vmem:[#allocation4 + $0x5f8] sm:$0xff]  ;;  %v5399_v41 = vcombine.high %v900_v14, %v908_v36  ;;  %v5398_v45 = vcombine.low %v900_v14, %v908_v36  ;;  %v5864_v36 = vld [vmem:[#allocation6 + $0x64] ss:$16 sps:$4 sm:$0xff]  }
 0x217   :  { %v5401_v42 = vcombine.high %v901_v37, %v909_v38  ;;  %v5400_v46 = vcombine.low %v901_v37, %v909_v38  ;;  %v5859_v14 = vld [vmem:[#allocation6 + $0x48] ss:$16 sps:$4 sm:$0xff]   ;;  %v5867_v37 = vld [vmem:[#allocation6 + $0x6c] ss:$16 sps:$4 sm:$0xff]   ;;  %v5862_v38 = vld [vmem:[#allocation6 + $0x60] ss:$16 sps:$4 sm:$0xff]  }
 0x218   :  { %2519 = vmatpush1.bf16.msra.mxu0 %v5270_v60  ;;  %v916_v60 = vld [vmem:[#allocation4 + $0x630] sm:$0xff] }
 0x219   :  { %2562 = vmatpush1.bf16.msra.mxu1 %v5272_v0  ;;  %2520 = vmatprep.subr.bf16.mxu0 %v5287_v43  ;;  %v924_v0 = vld [vmem:[#allocation4 + $0x670] sm:$0xff]  ;;  %v917_v43 = vld [vmem:[#allocation4 + $0x638] sm:$0xff] }
 0x21a   :  { %2563 = vmatprep.subr.bf16.mxu1 %v5289_v44  ;;  %v925_v44 = vld [vmem:[#allocation4 + $0x678] sm:$0xff]  ;;  %v5415_v47 = vcombine.high %v916_v60, %v924_v0  ;;  %v5414_v53 = vcombine.low %v916_v60, %v924_v0  ;;  %v5876_v0 = vld [vmem:[#allocation6 + $0xa4] ss:$16 sps:$4 sm:$0xff]  }
 0x21b   :  { %v5417_v48 = vcombine.high %v917_v43, %v925_v44  ;;  %v5416_v54 = vcombine.low %v917_v43, %v925_v44  ;;  %v5871_v60 = vld [vmem:[#allocation6 + $0x88] ss:$16 sps:$4 sm:$0xff]   ;;  %v5879_v43 = vld [vmem:[#allocation6 + $0xac] ss:$16 sps:$4 sm:$0xff]   ;;  %v5874_v44 = vld [vmem:[#allocation6 + $0xa0] ss:$16 sps:$4 sm:$0xff]  }
 0x21c   :  { %2521 = vmatpush1.bf16.msra.mxu0 %v5286_v49  ;;  %v932_v49 = vld [vmem:[#allocation4 + $0x6b0] sm:$0xff] }
 0x21d   :  { %2564 = vmatpush1.bf16.msra.mxu1 %v5288_v50  ;;  %2522 = vmatprep.subr.bf16.mxu0 %v5303_v51  ;;  %v940_v50 = vld [vmem:[#allocation4 + $0x6f0] sm:$0xff]  ;;  %v933_v51 = vld [vmem:[#allocation4 + $0x6b8] sm:$0xff] }
 0x21e   :  { %2565 = vmatprep.subr.bf16.mxu1 %v5305_v52  ;;  %v941_v52 = vld [vmem:[#allocation4 + $0x6f8] sm:$0xff]  ;;  %v5431_v55 = vcombine.high %v932_v49, %v940_v50  ;;  %v5430_v63 = vcombine.low %v932_v49, %v940_v50  ;;  %v5888_v50 = vld [vmem:[#allocation6 + $0xe4] ss:$16 sps:$4 sm:$0xff]  }
 0x21f   :  { %v5433_v57 = vcombine.high %v933_v51, %v941_v52  ;;  %v5432_v1 = vcombine.low %v933_v51, %v941_v52  ;;  %v5883_v49 = vld [vmem:[#allocation6 + $0xc8] ss:$16 sps:$4 sm:$0xff]   ;;  %v5891_v51 = vld [vmem:[#allocation6 + $0xec] ss:$16 sps:$4 sm:$0xff]   ;;  %v5886_v52 = vld [vmem:[#allocation6 + $0xe0] ss:$16 sps:$4 sm:$0xff]  }
 0x220   :  { %2523 = vmatpush1.bf16.msra.mxu0 %v5302_v58  ;;  %v948_v58 = vld [vmem:[#allocation4 + $0x730] sm:$0xff] }
 0x221   :  { %2566 = vmatpush1.bf16.msra.mxu1 %v5304_v59  ;;  %2524 = vmatprep.subr.bf16.mxu0 %v5319_v61  ;;  %v956_v59 = vld [vmem:[#allocation4 + $0x770] sm:$0xff]  ;;  %v949_v61 = vld [vmem:[#allocation4 + $0x738] sm:$0xff] }
 0x222   :  { %2567 = vmatprep.subr.bf16.mxu1 %v5321_v62  ;;  %v957_v62 = vld [vmem:[#allocation4 + $0x778] sm:$0xff]  ;;  %v5447_v2 = vcombine.high %v948_v58, %v956_v59  ;;  %v5446_v15 = vcombine.low %v948_v58, %v956_v59  ;;  %v5900_v59 = vld [vmem:[#allocation6 + $0x124] ss:$16 sps:$4 sm:$0xff]  }
 0x223   :  { %v5449_v3 = vcombine.high %v949_v61, %v957_v62  ;;  %v5448_v16 = vcombine.low %v949_v61, %v957_v62  ;;  %v5895_v58 = vld [vmem:[#allocation6 + $0x108] ss:$16 sps:$4 sm:$0xff]   ;;  %v5903_v61 = vld [vmem:[#allocation6 + $0x12c] ss:$16 sps:$4 sm:$0xff]   ;;  %v5898_v62 = vld [vmem:[#allocation6 + $0x120] ss:$16 sps:$4 sm:$0xff]  }
 0x224   :  { %2525 = vmatpush1.bf16.msra.mxu0 %v5318_v4  ;;  %v964_v4 = vld [vmem:[#allocation4 + $0x7b0] sm:$0xff] }
 0x225   :  { %2568 = vmatpush1.bf16.msra.mxu1 %v5320_v8  ;;  %2526 = vmatprep.subr.bf16.mxu0 %v5335_v12  ;;  %v972_v8 = vld [vmem:[#allocation4 + $0x7f0] sm:$0xff]  ;;  %v965_v12 = vld [vmem:[#allocation4 + $0x7b8] sm:$0xff] }
 0x226   :  { %2569 = vmatprep.subr.bf16.mxu1 %v5337_v13  ;;  %v973_v13 = vld [vmem:[#allocation4 + $0x7f8] sm:$0xff]  ;;  %v5463_v17 = vcombine.high %v964_v4, %v972_v8 }
 0x227   :  { %v5465_v18 = vcombine.high %v965_v12, %v973_v13 }
 0x228   :  { %2527 = vmatpush1.bf16.msra.mxu0 %v5334_v5  ;;  %v5462_v5 = vcombine.low %v964_v4, %v972_v8  ;;  %v5907_v4 = vld [vmem:[#allocation6 + $0x148] ss:$16 sps:$4 sm:$0xff]   ;;  %v5912_v8 = vld [vmem:[#allocation6 + $0x164] ss:$16 sps:$4 sm:$0xff]  }
 0x229   :  { %2570 = vmatpush1.bf16.msra.mxu1 %v5336_v6  ;;  %2528 = vmatprep.subr.bf16.mxu0 %v5351_v7  ;;  %v5464_v6 = vcombine.low %v965_v12, %v973_v13  ;;  %v5915_v12 = vld [vmem:[#allocation6 + $0x16c] ss:$16 sps:$4 sm:$0xff]   ;;  %v5910_v13 = vld [vmem:[#allocation6 + $0x160] ss:$16 sps:$4 sm:$0xff]  }
 0x22a   :  { %2571 = vmatprep.subr.bf16.mxu1 %v5353_v9 }
 0x22c   :  { %2529 = vmatpush1.bf16.msra.mxu0 %v5350_v21 }
 0x22d   :  { %2572 = vmatpush1.bf16.msra.mxu1 %v5352_v22  ;;  %2530 = vmatprep.subr.bf16.mxu0 %v5367_v23  ;;  %v5844_v23 = vld [vmem:[#allocation6] ss:$16 sps:$4 sm:$0xff]  }
 0x22e   :  { %2573 = vmatprep.subr.bf16.mxu1 %v5369_v24  ;;  %v5846_v24 = vld [vmem:[#allocation6 + $0x4] ss:$16 sps:$4 sm:$0xff]  }
 0x230   :  { %2531 = vmatpush1.bf16.msra.mxu0 %v5366_v32  ;;  %v5853_v32 = vld [vmem:[#allocation6 + $0x28] ss:$16 sps:$4 sm:$0xff]  }
 0x231   :  { %2574 = vmatpush1.bf16.msra.mxu1 %v5368_v33  ;;  %2532 = vmatprep.subr.bf16.mxu0 %v5383_v34  ;;  %v5858_v33 = vld [vmem:[#allocation6 + $0x44] ss:$16 sps:$4 sm:$0xff]   ;;  %v5861_v34 = vld [vmem:[#allocation6 + $0x4c] ss:$16 sps:$4 sm:$0xff]  }
 0x232   :  { %2575 = vmatprep.subr.bf16.mxu1 %v5385_v35  ;;  %v5856_v35 = vld [vmem:[#allocation6 + $0x40] ss:$16 sps:$4 sm:$0xff]  }
 0x234   :  { %2533 = vmatpush1.bf16.msra.mxu0 %v5382_v39  ;;  %v5865_v39 = vld [vmem:[#allocation6 + $0x68] ss:$16 sps:$4 sm:$0xff]  }
 0x235   :  { %2576 = vmatpush1.bf16.msra.mxu1 %v5384_v40  ;;  %2534 = vmatprep.subr.bf16.mxu0 %v5399_v41  ;;  %v5870_v40 = vld [vmem:[#allocation6 + $0x84] ss:$16 sps:$4 sm:$0xff]   ;;  %v5873_v41 = vld [vmem:[#allocation6 + $0x8c] ss:$16 sps:$4 sm:$0xff]  }
 0x236   :  { %2577 = vmatprep.subr.bf16.mxu1 %v5401_v42  ;;  %v5868_v42 = vld [vmem:[#allocation6 + $0x80] ss:$16 sps:$4 sm:$0xff]  }
 0x238   :  { %2535 = vmatpush1.bf16.msra.mxu0 %v5398_v45  ;;  %v5877_v45 = vld [vmem:[#allocation6 + $0xa8] ss:$16 sps:$4 sm:$0xff]  }
 0x239   :  { %2578 = vmatpush1.bf16.msra.mxu1 %v5400_v46  ;;  %2536 = vmatprep.subr.bf16.mxu0 %v5415_v47  ;;  %v5882_v46 = vld [vmem:[#allocation6 + $0xc4] ss:$16 sps:$4 sm:$0xff]   ;;  %v5885_v47 = vld [vmem:[#allocation6 + $0xcc] ss:$16 sps:$4 sm:$0xff]  }
 0x23a   :  { %2579 = vmatprep.subr.bf16.mxu1 %v5417_v48  ;;  %v5880_v48 = vld [vmem:[#allocation6 + $0xc0] ss:$16 sps:$4 sm:$0xff]  }
 0x23c   :  { %2537 = vmatpush1.bf16.msra.mxu0 %v5414_v53  ;;  %v5889_v53 = vld [vmem:[#allocation6 + $0xe8] ss:$16 sps:$4 sm:$0xff]  }
 0x23d   :  { %2580 = vmatpush1.bf16.msra.mxu1 %v5416_v54  ;;  %2538 = vmatprep.subr.bf16.mxu0 %v5431_v55  ;;  %v5894_v54 = vld [vmem:[#allocation6 + $0x104] ss:$16 sps:$4 sm:$0xff]   ;;  %v5897_v55 = vld [vmem:[#allocation6 + $0x10c] ss:$16 sps:$4 sm:$0xff]  }
 0x23e   :  { %2581 = vmatprep.subr.bf16.mxu1 %v5433_v57  ;;  %v5892_v57 = vld [vmem:[#allocation6 + $0x100] ss:$16 sps:$4 sm:$0xff]  }
 0x240   :  { %2539 = vmatpush1.bf16.msra.mxu0 %v5430_v63  ;;  %v5901_v63 = vld [vmem:[#allocation6 + $0x128] ss:$16 sps:$4 sm:$0xff]  }
 0x241   :  { %2582 = vmatpush1.bf16.msra.mxu1 %v5432_v1  ;;  %2540 = vmatprep.subr.bf16.mxu0 %v5447_v2  ;;  %v5906_v1 = vld [vmem:[#allocation6 + $0x144] ss:$16 sps:$4 sm:$0xff]   ;;  %v5909_v2 = vld [vmem:[#allocation6 + $0x14c] ss:$16 sps:$4 sm:$0xff]  }
 0x242   :  { %2583 = vmatprep.subr.bf16.mxu1 %v5449_v3  ;;  %v5904_v3 = vld [vmem:[#allocation6 + $0x140] ss:$16 sps:$4 sm:$0xff]  }
 0x244   :  { %2541 = vmatpush1.bf16.msra.mxu0 %v5446_v15  ;;  %v5913_v15 = vld [vmem:[#allocation6 + $0x168] ss:$16 sps:$4 sm:$0xff]  }
 0x245   :  { %2584 = vmatpush1.bf16.msra.mxu1 %v5448_v16  ;;  %2542 = vmatprep.subr.bf16.mxu0 %v5463_v17 }
 0x246   :  { %2585 = vmatprep.subr.bf16.mxu1 %v5465_v18 }
 0x248   :  { %2543 = vmatpush1.bf16.msra.mxu0 %v5462_v5 }
 0x249   :  { %2586 = vmatpush1.bf16.msra.mxu1 %v5464_v6  ;;  %3514 = vmatprep.subr.bf16.mxu0 %v5846_v24 }
 0x24b   :  { %2545 = vmatmul.mubr.bf16.vlgmr.msra.gmra.mrb[20].mxu0 %v6593_v56 }
 0x24c   :  { %2588 = vmatmul.mubr.bf16.vlgmr.msra.gmra.mrb[20].mxu1 %v6593_v56  ;;  %v5849_v56 = vld [vmem:[#allocation6 + $0xc] ss:$16 sps:$4 sm:$0xff]   ;;  %3515 = vmatpush1.bf16.msra.mxu0 %v5844_v23 }
 0x24d   :  { %3600 = vmatprep.subr.bf16.mxu1 %v5849_v56  ;;  %3516 = vmatprep.subr.bf16.mxu0 %v5852_v26 }
 0x24e   :  { %3601 = vmatpush1.bf16.msra.mxu1 %v5847_v25 }
 0x24f   :  { %3602 = vmatprep.subr.bf16.mxu1 %v5855_v29  ;;  %v5918_v29 = vld [vmem:[#allocation6 + $0x184] ss:$16 sps:$4 sm:$0xff]  }
 0x250   :  { %3517 = vmatpush1.bf16.msra.mxu0 %v5850_v31  ;;  %v5921_v31 = vld [vmem:[#allocation6 + $0x18c] ss:$16 sps:$4 sm:$0xff]  }
 0x251   :  { %3518 = vmatprep.subr.bf16.mxu0 %v5858_v33 }
 0x252   :  { %3603 = vmatpush1.bf16.msra.mxu1 %v5853_v32 }
 0x253   :  { %3604 = vmatprep.subr.bf16.mxu1 %v5861_v34 }
 0x254   :  { %3519 = vmatpush1.bf16.msra.mxu0 %v5856_v35 }
 0x255   :  { %3520 = vmatprep.subr.bf16.mxu0 %v5864_v36 }
 0x256   :  { %3605 = vmatpush1.bf16.msra.mxu1 %v5859_v14 }
 0x257   :  { %3606 = vmatprep.subr.bf16.mxu1 %v5867_v37  ;;  %v5916_v37 = vld [vmem:[#allocation6 + $0x180] ss:$16 sps:$4 sm:$0xff]  }
 0x258   :  { %3521 = vmatpush1.bf16.msra.mxu0 %v5862_v38  ;;  %v5919_v38 = vld [vmem:[#allocation6 + $0x188] ss:$16 sps:$4 sm:$0xff]  }
 0x259   :  { %3522 = vmatprep.subr.bf16.mxu0 %v5870_v40  ;;  %v5927_v40 = vld [vmem:[#allocation6 + $0x1ac] ss:$16 sps:$4 sm:$0xff]  }
 0x25a   :  { %3607 = vmatpush1.bf16.msra.mxu1 %v5865_v39  ;;  %v5924_v39 = vld [vmem:[#allocation6 + $0x1a4] ss:$16 sps:$4 sm:$0xff]  }
 0x25b   :  { %3608 = vmatprep.subr.bf16.mxu1 %v5873_v41  ;;  %v5922_v41 = vld [vmem:[#allocation6 + $0x1a0] ss:$16 sps:$4 sm:$0xff]  }
 0x25c   :  { %3523 = vmatpush1.bf16.msra.mxu0 %v5868_v42  ;;  %v5925_v42 = vld [vmem:[#allocation6 + $0x1a8] ss:$16 sps:$4 sm:$0xff]  }
 0x25d   :  { %3524 = vmatprep.subr.bf16.mxu0 %v5876_v0  ;;  %v5933_v0 = vld [vmem:[#allocation6 + $0x1cc] ss:$16 sps:$4 sm:$0xff]  }
 0x25e   :  { %v6619_v7 = vpop.f32.mrb[8].mxu0  ;;  %v6621_v9 = vpop.f32.mrb[8].mxu1  ;;  %3609 = vmatpush1.bf16.msra.mxu1 %v5871_v60  ;;  %v5930_v60 = vld [vmem:[#allocation6 + $0x1c4] ss:$16 sps:$4 sm:$0xff]  }
 0x25f   :  { %v6623_v10 = vpop.f32.mrb[9].mxu0  ;;  %v6625_v11 = vpop.f32.mrb[9].mxu1  ;;  %3610 = vmatprep.subr.bf16.mxu1 %v5879_v43  ;;  %v5928_v43 = vld [vmem:[#allocation6 + $0x1c0] ss:$16 sps:$4 sm:$0xff]  }
 0x260   :  { %v6627_v19 = vpop.f32.mrb[10].mxu0  ;;  %v6629_v20 = vpop.f32.mrb[10].mxu1  ;;  %3525 = vmatpush1.bf16.msra.mxu0 %v5874_v44  ;;  %v5931_v44 = vld [vmem:[#allocation6 + $0x1c8] ss:$16 sps:$4 sm:$0xff]  }
 0x261   :  { %v6631_v21 = vpop.f32.mrb[11].mxu0  ;;  %v6633_v22 = vpop.f32.mrb[11].mxu1  ;;  %3526 = vmatprep.subr.bf16.mxu0 %v5882_v46  ;;  %v5936_v46 = vld [vmem:[#allocation6 + $0x1e4] ss:$16 sps:$4 sm:$0xff]  }
 0x262   :  { %3611 = vmatpush1.bf16.msra.mxu1 %v5877_v45  ;;  %v5934_v45 = vld [vmem:[#allocation6 + $0x1e0] ss:$16 sps:$4 sm:$0xff]  }
 0x263   :  { %3612 = vmatprep.subr.bf16.mxu1 %v5885_v47  ;;  %v5937_v47 = vld [vmem:[#allocation6 + $0x1e8] ss:$16 sps:$4 sm:$0xff]  }
 0x264   :  { %3527 = vmatpush1.bf16.msra.mxu0 %v5880_v48  ;;  %v5939_v48 = vld [vmem:[#allocation6 + $0x1ec] ss:$16 sps:$4 sm:$0xff]  }
 0x265   :  { %3528 = vmatprep.subr.bf16.mxu0 %v5888_v50  ;;  %v5945_v50 = vld [vmem:[#allocation6 + $0x20c] ss:$16 sps:$4 sm:$0xff]  }
 0x266   :  { %3613 = vmatpush1.bf16.msra.mxu1 %v5883_v49  ;;  %v5942_v49 = vld [vmem:[#allocation6 + $0x204] ss:$16 sps:$4 sm:$0xff]  }
 0x267   :  { %3614 = vmatprep.subr.bf16.mxu1 %v5891_v51 }
 0x268   :  { %3529 = vmatpush1.bf16.msra.mxu0 %v5886_v52 }
 0x269   :  { %3530 = vmatprep.subr.bf16.mxu0 %v5894_v54 }
 0x26a   :  { %3615 = vmatpush1.bf16.msra.mxu1 %v5889_v53 }
 0x26b   :  { %3616 = vmatprep.subr.bf16.mxu1 %v5897_v55 }
 0x26c   :  { %3531 = vmatpush1.bf16.msra.mxu0 %v5892_v57 }
 0x26d   :  { %3532 = vmatprep.subr.bf16.mxu0 %v5900_v59 }
 0x26e   :  { %3617 = vmatpush1.bf16.msra.mxu1 %v5895_v58 }
 0x26f   :  { %3618 = vmatprep.subr.bf16.mxu1 %v5903_v61  ;;  %v2622_v61 = vld [vmem:[%s6781_s4] sm:$0xf] }
 0x270   :  { %3533 = vmatpush1.bf16.msra.mxu0 %v5898_v62  ;;  %v6671_v62 = vsub.s32 2, %v6580_v27 }
 0x271   :  { %3534 = vmatprep.subr.bf16.mxu0 %v5906_v1  ;;  %v2660_v1 = vld [vmem:[%s6782_s5] sm:$0xf] }
 0x272   :  { %3619 = vmatpush1.bf16.msra.mxu1 %v5901_v63  ;;  %v6674_v63 = vsub.s32 3, %v6580_v27 }
 0x273   :  { %3620 = vmatprep.subr.bf16.mxu1 %v5909_v2  ;;  %v2690_v2 = vld [vmem:[%s6783_s6] sm:$0xf] }
 0x274   :  { %3535 = vmatpush1.bf16.msra.mxu0 %v5904_v3  ;;  %v2627_v3 = vrot.slane %v2622_v61, %v6583_v28  ;;  %v2639_v27 = vrot.slane %v2622_v61, %v6674_v63 }
 0x275   :  { %3536 = vmatprep.subr.bf16.mxu0 %v5912_v8  ;;  %v2665_v8 = vrot.slane %v2660_v1, %v6583_v28 }
 0x276   :  { %3621 = vmatpush1.bf16.msra.mxu1 %v5907_v4 }
 0x277   :  { %3622 = vmatprep.subr.bf16.mxu1 %v5915_v12  ;;  %v2635_v12 = vrot.slane %v2622_v61, %v6671_v62 }
 0x278   :  { %3537 = vmatpush1.bf16.msra.mxu0 %v5910_v13  ;;  %v2631_v13 = vrot.slane %v2622_v61, %v6589_v30 }
 0x279   :  { %3538 = vmatprep.subr.bf16.mxu0 %v5918_v29  ;;  %v2695_v29 = vrot.slane %v2690_v2, %v6583_v28 }
 0x27a   :  { %3623 = vmatpush1.bf16.msra.mxu1 %v5913_v15 }
 0x27b   :  { %3624 = vmatprep.subr.bf16.mxu1 %v5921_v31 }
 0x27c   :  { %3539 = vmatpush1.bf16.msra.mxu0 %v5916_v37  ;;  %v2673_v37 = vrot.slane %v2660_v1, %v6671_v62 }
 0x27d   :  { %3540 = vmatprep.subr.bf16.mxu0 %v5924_v39  ;;  %v2669_v39 = vrot.slane %v2660_v1, %v6589_v30 }
 0x27e   :  { %3625 = vmatpush1.bf16.msra.mxu1 %v5919_v38 }
 0x27f   :  { %3626 = vmatprep.subr.bf16.mxu1 %v5927_v40 }
 0x280   :  { %3541 = vmatpush1.bf16.msra.mxu0 %v5922_v41  ;;  %v2703_v41 = vrot.slane %v2690_v2, %v6671_v62 }
 0x281   :  { %3542 = vmatprep.subr.bf16.mxu0 %v5930_v60 }
 0x282   :  { %3627 = vmatpush1.bf16.msra.mxu1 %v5925_v42 }
 0x283   :  { %3628 = vmatprep.subr.bf16.mxu1 %v5933_v0  ;;  %v2677_v0 = vrot.slane %v2660_v1, %v6674_v63 }
 0x284   :  { %3543 = vmatpush1.bf16.msra.mxu0 %v5928_v43 }
 0x285   :  { %3544 = vmatprep.subr.bf16.mxu0 %v5936_v46 }
 0x286   :  { %3629 = vmatpush1.bf16.msra.mxu1 %v5931_v44 }
 0x287   :  { %3630 = vmatprep.subr.bf16.mxu1 %v5939_v48 }
 0x288   :  { %3545 = vmatpush1.bf16.msra.mxu0 %v5934_v45 }
 0x289   :  { %3557 = vmatprep.subr.bf16.mxu0 %v5942_v49  ;;  %v2699_v49 = vrot.slane %v2690_v2, %v6589_v30 }
 0x28a   :  { %3631 = vmatpush1.bf16.msra.mxu1 %v5937_v47 }
 0x28b   :  { %3643 = vmatprep.subr.bf16.mxu1 %v5945_v50 }
 0x29e   :  { %v6635_v16 = vpop.f32.mrb[12].mxu0  ;;  %v6637_v17 = vpop.f32.mrb[12].mxu1 }
 0x29f   :  { %v2598_v18 = vmax.f32 %v6619_v7, %v6635_v16  ;;  %v2600_v5 = vmax.f32 %v6621_v9, %v6637_v17  ;;  %v6643_v6 = vpop.f32.mrb[13].mxu0  ;;  %v6645_v23 = vpop.f32.mrb[13].mxu1 }
 0x2a0   :  { %v2599_v24 = vmax.f32 %v6623_v10, %v6643_v6  ;;  %v2601_v25 = vmax.f32 %v6625_v11, %v6645_v23  ;;  %v6651_v56 = vpop.f32.mrb[14].mxu0  ;;  %v6653_v26 = vpop.f32.mrb[14].mxu1 }
 0x2a1   :  { %v2602_v32 = vmax.f32 %v6627_v19, %v6651_v56  ;;  %v2604_v33 = vmax.f32 %v6629_v20, %v6653_v26  ;;  %v6659_v34 = vpop.f32.mrb[15].mxu0  ;;  %v6661_v35 = vpop.f32.mrb[15].mxu1 }
 0x2a2   :  { %v2603_v14 = vmax.f32 %v6631_v21, %v6659_v34  ;;  %v2605_v36 = vmax.f32 %v6633_v22, %v6661_v35 }
 0x2de   :  { %v2460_v51 = vpop.f32.mrb[16].mxu0 }
 0x2df   :  { %v2503_v52 = vpop.f32.mrb[16].mxu1  ;;  %v2462_v53 = vpop.f32.mrb[17].mxu0 }
 0x2e0   :  { %v2505_v54 = vpop.f32.mrb[17].mxu1  ;;  %v2464_v55 = vpop.f32.mrb[18].mxu0 }
 0x2e1   :  { %v2507_v57 = vpop.f32.mrb[18].mxu1  ;;  %v2466_v58 = vpop.f32.mrb[19].mxu0 }
 0x2e2   :  { %v2509_v59 = vpop.f32.mrb[19].mxu1 }
 0x31e   :  { %v2546_v4 = vpop.f32.mrb[20].mxu0 }
 0x31f   :  { %v2606_v15 = vmax.f32 %v2460_v51, %v2546_v4  ;;  %v2589_v31 = vpop.f32.mrb[20].mxu1  ;;  %v2548_v38 = vpop.f32.mrb[21].mxu0 }
 0x320   :  { %v2608_v40 = vmax.f32 %v2503_v52, %v2589_v31  ;;  %v2607_v42 = vmax.f32 %v2462_v53, %v2548_v38  ;;  %v2591_v60 = vpop.f32.mrb[21].mxu1  ;;  %v2550_v43 = vpop.f32.mrb[22].mxu0 }
 0x321   :  { %v2614_v44 = vmax.f32 %v2598_v18, %v2606_v15  ;;  %v2609_v45 = vmax.f32 %v2505_v54, %v2591_v60  ;;  %v2610_v46 = vmax.f32 %v2464_v55, %v2550_v43  ;;  %v2593_v47 = vpop.f32.mrb[22].mxu1  ;;  %v2552_v48 = vpop.f32.mrb[23].mxu0  ;;  %v5940_v43 = vld [vmem:[#allocation6 + $0x200] ss:$16 sps:$4 sm:$0xff]  }
 0x322   :  { %v2616_v50 = vmax.f32 %v2600_v5, %v2608_v40  ;;  %v2615_v51 = vmax.f32 %v2599_v24, %v2607_v42  ;;  %v2612_v52 = vmax.f32 %v2507_v57, %v2593_v47  ;;  %v2611_v53 = vmax.f32 %v2466_v58, %v2552_v48  ;;  %v2595_v61 = vpop.f32.mrb[23].mxu1  ;;  %v5955_v47 = vld [vmem:[#allocation6 + $0x248] ss:$16 sps:$4 sm:$0xff]   ;;  %v5960_v48 = vld [vmem:[#allocation6 + $0x264] ss:$16 sps:$4 sm:$0xff]  }
 0x323   :  { %v2644_v1 = vadd.f32 %v2627_v3, %v2614_v44  ;;  %v2617_v7 = vmax.f32 %v2601_v25, %v2609_v45  ;;  %v2618_v16 = vmax.f32 %v2602_v32, %v2610_v46  ;;  %v2613_v18 = vmax.f32 %v2509_v59, %v2595_v61  ;;  %v5943_v44 = vld [vmem:[#allocation6 + $0x208] ss:$16 sps:$4 sm:$0xff]   ;;  %v5952_v46 = vld [vmem:[#allocation6 + $0x240] ss:$16 sps:$4 sm:$0xff]  }
 0x324   :  { %v2646_v54 = vadd.f32 %v2635_v12, %v2616_v50  ;;  %v2645_v9 = vadd.f32 %v2631_v13, %v2615_v51  ;;  %v2620_v10 = vmax.f32 %v2604_v33, %v2612_v52  ;;  %v2619_v17 = vmax.f32 %v2603_v14, %v2611_v53  ;;  %v5958_v50 = vld [vmem:[#allocation6 + $0x260] ss:$16 sps:$4 sm:$0xff]   ;;  %v5961_v51 = vld [vmem:[#allocation6 + $0x268] ss:$16 sps:$4 sm:$0xff]   ;;  %v5966_v52 = vld [vmem:[#allocation6 + $0x284] ss:$16 sps:$4 sm:$0xff]  }
 0x325   :  { %v2652_v5 = vmax.f32 %v2644_v1, 0.0  ;;  %v2647_v6 = vadd.f32 %v2639_v27, %v2617_v7  ;;  %v2648_v24 = vadd.f32 %v2627_v3, %v2618_v16  ;;  %v2621_v11 = vmax.f32 %v2605_v36, %v2613_v18  ;;  %v5969_v53 = vld [vmem:[#allocation6 + $0x28c] ss:$16 sps:$4 sm:$0xff]   ;;  %v5964_v61 = vld [vmem:[#allocation6 + $0x280] ss:$16 sps:$4 sm:$0xff]  }
 0x326   :  { %v2654_v19 = vmax.f32 %v2646_v54, 0.0  ;;  %v2653_v23 = vmax.f32 %v2645_v9, 0.0  ;;  %v2650_v25 = vadd.f32 %v2635_v12, %v2620_v10  ;;  %v2649_v56 = vadd.f32 %v2631_v13, %v2619_v17  ;;  %v5967_v1 = vld [vmem:[#allocation6 + $0x288] ss:$16 sps:$4 sm:$0xff]   ;;  %v5972_v7 = vld [vmem:[#allocation6 + $0x2a4] ss:$16 sps:$4 sm:$0xff]  }
 0x327   :  { %v2682_v32 = vmul.f32 %v2665_v8, %v2652_v5  ;;  %v2655_v55 = vmax.f32 %v2647_v6, 0.0  ;;  %v2656_v57 = vmax.f32 %v2648_v24, 0.0  ;;  %v2651_v20 = vadd.f32 %v2639_v27, %v2621_v11  ;;  %v5975_v16 = vld [vmem:[#allocation6 + $0x2ac] ss:$16 sps:$4 sm:$0xff]   ;;  %v5970_v18 = vld [vmem:[#allocation6 + $0x2a0] ss:$16 sps:$4 sm:$0xff]  }
 0x328   :  { %v2684_v26 = vmul.f32 %v2673_v37, %v2654_v19  ;;  %v2683_v33 = vmul.f32 %v2669_v39, %v2653_v23  ;;  %v2658_v58 = vmax.f32 %v2650_v25, 0.0  ;;  %v2657_v21 = vmax.f32 %v2649_v56, 0.0  ;;  %v5973_v54 = vld [vmem:[#allocation6 + $0x2a8] ss:$16 sps:$4 sm:$0xff]   ;;  %v5978_v9 = vld [vmem:[#allocation6 + $0x2c4] ss:$16 sps:$4 sm:$0xff]  }
 0x329   :  { %v2685_v34 = vmul.f32 %v2677_v0, %v2655_v55  ;;  %v2686_v14 = vmul.f32 %v2665_v8, %v2656_v57  ;;  %v2659_v59 = vmax.f32 %v2651_v20, 0.0  ;;  %v2707_v3 = vrot.slane %v2690_v2, %v6674_v63  ;;  %v5948_v2 = vld [vmem:[#allocation6 + $0x224] ss:$16 sps:$4 sm:$0xff]   ;;  %v5981_v10 = vld [vmem:[#allocation6 + $0x2cc] ss:$16 sps:$4 sm:$0xff]  }
 0x32a   :  { %v2714_v4 = vadd.f32 %v2703_v41, %v2684_v26  ;;  %v2688_v22 = vmul.f32 %v2673_v37, %v2658_v58  ;;  %v2687_v35 = vmul.f32 %v2669_v39, %v2657_v21  ;;  %v2712_v36 = vadd.f32 %v2695_v29, %v2682_v32  ;;  %v5951_v37 = vld [vmem:[#allocation6 + $0x22c] ss:$16 sps:$4 sm:$0xff]   ;;  %v5949_v39 = vld [vmem:[#allocation6 + $0x228] ss:$16 sps:$4 sm:$0xff]   ;;  %v5976_v17 = vld [vmem:[#allocation6 + $0x2c0] ss:$16 sps:$4 sm:$0xff]  }
 0x32b   :  { %v2716_v15 = vadd.f32 %v2695_v29, %v2686_v14  ;;  %v2689_v12 = vmul.f32 %v2677_v0, %v2659_v59  ;;  %v2713_v31 = vadd.f32 %v2699_v49, %v2683_v33  ;;  %v2715_v27 = vadd.f32 %v2707_v3, %v2685_v34  ;;  %v5946_v29 = vld [vmem:[#allocation6 + $0x220] ss:$16 sps:$4 sm:$0xff]   ;;  %v5957_v0 = vld [vmem:[#allocation6 + $0x24c] ss:$16 sps:$4 sm:$0xff]   ;;  %v5979_v5 = vld [vmem:[#allocation6 + $0x2c8] ss:$16 sps:$4 sm:$0xff]  }
 0x32c   :  { %v2718_v13 = vadd.f32 %v2703_v41, %v2688_v22  ;;  %v2717_v38 = vadd.f32 %v2699_v49, %v2687_v35  ;;  %v5954_v41 = vld [vmem:[#allocation6 + $0x244] ss:$16 sps:$4 sm:$0xff]   ;;  %v5963_v49 = vld [vmem:[#allocation6 + $0x26c] ss:$16 sps:$4 sm:$0xff]   ;;  %v5982_v11 = vld [vmem:[#allocation6 + $0x2e0] ss:$16 sps:$4 sm:$0xff]  }
 0x32d   :  { %v2720_v40 = vpack.c.bf16 %v2716_v15, %v2712_v36  ;;  %v2719_v42 = vadd.f32 %v2707_v3, %v2689_v12  ;;  %v5984_v6 = vld [vmem:[#allocation6 + $0x2e4] ss:$16 sps:$4 sm:$0xff]   ;;  %v5987_v24 = vld [vmem:[#allocation6 + $0x2ec] ss:$16 sps:$4 sm:$0xff]   ;;  %v5985_v19 = vld [vmem:[#allocation6 + $0x2e8] ss:$16 sps:$4 sm:$0xff]  }
 0x32e   :  { %v2721_v60 = vpack.c.bf16 %v2717_v38, %v2713_v31  ;;  %v6718_v45 = vpack.c.bf16 %v2718_v13, %v2714_v4  ;;  %v5990_v23 = vld [vmem:[#allocation6 + $0x304] ss:$16 sps:$4 sm:$0xff]   ;;  %v5993_v25 = vld [vmem:[#allocation6 + $0x30c] ss:$16 sps:$4 sm:$0xff]   ;;  %v5988_v56 = vld [vmem:[#allocation6 + $0x300] ss:$16 sps:$4 sm:$0xff]  }
 0x32f   :  { %v2723_v8 = vpack.c.bf16 %v2719_v42, %v2715_v27  ;;  %v5991_v32 = vld [vmem:[#allocation6 + $0x308] ss:$16 sps:$4 sm:$0xff]   ;;  %v5996_v55 = vld [vmem:[#allocation6 + $0x324] ss:$16 sps:$4 sm:$0xff]   ;;  %v5999_v57 = vld [vmem:[#allocation6 + $0x32c] ss:$16 sps:$4 sm:$0xff]  }
 0x330   :  { %3546 = vmatprep.mubr.bf16.mxu0 %v2721_v60  ;;  %3632 = vmatprep.mubr.bf16.mxu1 %v2721_v60  ;;  %v5994_v20 = vld [vmem:[#allocation6 + $0x320] ss:$16 sps:$4 sm:$0xff]   ;;  %v5997_v26 = vld [vmem:[#allocation6 + $0x328] ss:$16 sps:$4 sm:$0xff]   ;;  %v6002_v33 = vld [vmem:[#allocation6 + $0x344] ss:$16 sps:$4 sm:$0xff]  }
 0x331   :  { %3547 = vmatmul.mubr.bf16.vlgmr.msra.gmra.mrb[24].mxu0 %v2720_v40  ;;  %3633 = vmatmul.mubr.bf16.vlgmr.msra.gmra.mrb[24].mxu1 %v2720_v40  ;;  %v6005_v58 = vld [vmem:[#allocation6 + $0x34c] ss:$16 sps:$4 sm:$0xff]   ;;  %v6000_v21 = vld [vmem:[#allocation6 + $0x340] ss:$16 sps:$4 sm:$0xff]   ;;  %v6003_v34 = vld [vmem:[#allocation6 + $0x348] ss:$16 sps:$4 sm:$0xff]  }
 0x332   :  { %3558 = vmatpush1.bf16.msra.mxu0 %v5940_v43  ;;  %3644 = vmatpush1.bf16.msra.mxu1 %v5943_v44  ;;  %v6008_v14 = vld [vmem:[#allocation6 + $0x364] ss:$16 sps:$4 sm:$0xff]   ;;  %v6011_v59 = vld [vmem:[#allocation6 + $0x36c] ss:$16 sps:$4 sm:$0xff]   ;;  %v6006_v3 = vld [vmem:[#allocation6 + $0x360] ss:$16 sps:$4 sm:$0xff]  }
 0x333   :  { %3589 = vmatprep.mubr.bf16.mxu0 %v2723_v8  ;;  %3675 = vmatprep.mubr.bf16.mxu1 %v2723_v8  ;;  %v6009_v4 = vld [vmem:[#allocation6 + $0x368] ss:$16 sps:$4 sm:$0xff]   ;;  %v6014_v22 = vld [vmem:[#allocation6 + $0x384] ss:$16 sps:$4 sm:$0xff]   ;;  %v6017_v35 = vld [vmem:[#allocation6 + $0x38c] ss:$16 sps:$4 sm:$0xff]  }
 0x334   :  { %3559 = vmatprep.subr.bf16.mxu0 %v5948_v2  ;;  %3645 = vmatprep.subr.bf16.mxu1 %v5951_v37  ;;  %v6012_v36 = vld [vmem:[#allocation6 + $0x380] ss:$16 sps:$4 sm:$0xff]   ;;  %v6015_v15 = vld [vmem:[#allocation6 + $0x388] ss:$16 sps:$4 sm:$0xff]   ;;  %v6020_v12 = vld [vmem:[#allocation6 + $0x3a4] ss:$16 sps:$4 sm:$0xff]  }
 0x335   :  { %v6023_v13 = vld [vmem:[#allocation6 + $0x3ac] ss:$16 sps:$4 sm:$0xff]   ;;  %v6018_v31 = vld [vmem:[#allocation6 + $0x3a0] ss:$16 sps:$4 sm:$0xff]   ;;  %v6021_v38 = vld [vmem:[#allocation6 + $0x3a8] ss:$16 sps:$4 sm:$0xff]  }
 0x336   :  { %3560 = vmatpush1.bf16.msra.mxu0 %v5946_v29  ;;  %3646 = vmatpush1.bf16.msra.mxu1 %v5949_v39  ;;  %v6026_v40 = vld [vmem:[#allocation6 + $0x3c4] ss:$16 sps:$4 sm:$0xff]   ;;  %v6029_v27 = vld [vmem:[#allocation6 + $0x3cc] ss:$16 sps:$4 sm:$0xff]   ;;  %v6024_v42 = vld [vmem:[#allocation6 + $0x3c0] ss:$16 sps:$4 sm:$0xff]  }
 0x337   :  { %3561 = vmatprep.subr.bf16.mxu0 %v5954_v41  ;;  %3647 = vmatprep.subr.bf16.mxu1 %v5957_v0  ;;  %v6027_v60 = vld [vmem:[#allocation6 + $0x3c8] ss:$16 sps:$4 sm:$0xff]   ;;  %v6032_v43 = vld [vmem:[#allocation6 + $0x3e4] ss:$16 sps:$4 sm:$0xff]   ;;  %v6035_v44 = vld [vmem:[#allocation6 + $0x3ec] ss:$16 sps:$4 sm:$0xff]  }
 0x338   :  { %v6030_v8 = vld [vmem:[#allocation6 + $0x3e0] ss:$16 sps:$4 sm:$0xff]   ;;  %v6033_v2 = vld [vmem:[#allocation6 + $0x3e8] ss:$16 sps:$4 sm:$0xff]   ;;  %v6038_v37 = vld [vmem:[#allocation7 + $0x4] ss:$16 sps:$4 sm:$0xff]  }
 0x339   :  { %v6041_v29 = vld [vmem:[#allocation7 + $0xc] ss:$16 sps:$4 sm:$0xff]   ;;  %v6036_v39 = vld [vmem:[#allocation7] ss:$16 sps:$4 sm:$0xff]   ;;  %v6039_v41 = vld [vmem:[#allocation7 + $0x8] ss:$16 sps:$4 sm:$0xff]  }
 0x33a   :  { %3562 = vmatpush1.bf16.msra.mxu0 %v5952_v46  ;;  %3648 = vmatpush1.bf16.msra.mxu1 %v5955_v47  ;;  %v6044_v0 = vld [vmem:[#allocation7 + $0x24] ss:$16 sps:$4 sm:$0xff]   ;;  %v6047_v46 = vld [vmem:[#allocation7 + $0x2c] ss:$16 sps:$4 sm:$0xff]   ;;  %v6042_v47 = vld [vmem:[#allocation7 + $0x20] ss:$16 sps:$4 sm:$0xff]  }
 0x33b   :  { %3563 = vmatprep.subr.bf16.mxu0 %v5960_v48  ;;  %3649 = vmatprep.subr.bf16.mxu1 %v5963_v49  ;;  %v6045_v48 = vld [vmem:[#allocation7 + $0x28] ss:$16 sps:$4 sm:$0xff]   ;;  %v6050_v49 = vld [vmem:[#allocation7 + $0x44] ss:$16 sps:$4 sm:$0xff]  }
 0x33e   :  { %3564 = vmatpush1.bf16.msra.mxu0 %v5958_v50  ;;  %3650 = vmatpush1.bf16.msra.mxu1 %v5961_v51  ;;  %v6053_v50 = vld [vmem:[#allocation7 + $0x4c] ss:$16 sps:$4 sm:$0xff]   ;;  %v6048_v51 = vld [vmem:[#allocation7 + $0x40] ss:$16 sps:$4 sm:$0xff]  }
 0x33f   :  { %3565 = vmatprep.subr.bf16.mxu0 %v5966_v52  ;;  %3651 = vmatprep.subr.bf16.mxu1 %v5969_v53  ;;  %v6051_v52 = vld [vmem:[#allocation7 + $0x48] ss:$16 sps:$4 sm:$0xff]   ;;  %v6056_v53 = vld [vmem:[#allocation7 + $0x64] ss:$16 sps:$4 sm:$0xff]  }
 0x342   :  { %3566 = vmatpush1.bf16.msra.mxu0 %v5964_v61  ;;  %3652 = vmatpush1.bf16.msra.mxu1 %v5967_v1  ;;  %v6059_v61 = vld [vmem:[#allocation7 + $0x6c] ss:$16 sps:$4 sm:$0xff]   ;;  %v6054_v1 = vld [vmem:[#allocation7 + $0x60] ss:$16 sps:$4 sm:$0xff]  }
 0x343   :  { %3567 = vmatprep.subr.bf16.mxu0 %v5972_v7  ;;  %3653 = vmatprep.subr.bf16.mxu1 %v5975_v16  ;;  %v6062_v7 = vld [vmem:[#allocation7 + $0x84] ss:$16 sps:$4 sm:$0xff]   ;;  %v6065_v16 = vld [vmem:[#allocation7 + $0x8c] ss:$16 sps:$4 sm:$0xff]  }
 0x346   :  { %3568 = vmatpush1.bf16.msra.mxu0 %v5970_v18  ;;  %3654 = vmatpush1.bf16.msra.mxu1 %v5973_v54  ;;  %v6060_v18 = vld [vmem:[#allocation7 + $0x80] ss:$16 sps:$4 sm:$0xff]   ;;  %v6063_v54 = vld [vmem:[#allocation7 + $0x88] ss:$16 sps:$4 sm:$0xff]  }
 0x347   :  { %3569 = vmatprep.subr.bf16.mxu0 %v5978_v9  ;;  %3655 = vmatprep.subr.bf16.mxu1 %v5981_v10  ;;  %v6068_v9 = vld [vmem:[#allocation7 + $0xa4] ss:$16 sps:$4 sm:$0xff]   ;;  %v6071_v10 = vld [vmem:[#allocation7 + $0xac] ss:$16 sps:$4 sm:$0xff]  }
 0x34a   :  { %3570 = vmatpush1.bf16.msra.mxu0 %v5976_v17  ;;  %3656 = vmatpush1.bf16.msra.mxu1 %v5979_v5  ;;  %v6066_v17 = vld [vmem:[#allocation7 + $0xa0] ss:$16 sps:$4 sm:$0xff]   ;;  %v6069_v5 = vld [vmem:[#allocation7 + $0xa8] ss:$16 sps:$4 sm:$0xff]  }
 0x34b   :  { %3571 = vmatprep.subr.bf16.mxu0 %v5984_v6  ;;  %3657 = vmatprep.subr.bf16.mxu1 %v5987_v24  ;;  %v6074_v6 = vld [vmem:[#allocation7 + $0xc4] ss:$16 sps:$4 sm:$0xff]   ;;  %v6077_v24 = vld [vmem:[#allocation7 + $0xcc] ss:$16 sps:$4 sm:$0xff]  }
 0x34e   :  { %3572 = vmatpush1.bf16.msra.mxu0 %v5982_v11  ;;  %3658 = vmatpush1.bf16.msra.mxu1 %v5985_v19  ;;  %v6072_v11 = vld [vmem:[#allocation7 + $0xc0] ss:$16 sps:$4 sm:$0xff]   ;;  %v6075_v19 = vld [vmem:[#allocation7 + $0xc8] ss:$16 sps:$4 sm:$0xff]  }
 0x34f   :  { %3573 = vmatprep.subr.bf16.mxu0 %v5990_v23  ;;  %3659 = vmatprep.subr.bf16.mxu1 %v5993_v25  ;;  %v6080_v23 = vld [vmem:[#allocation7 + $0xe4] ss:$16 sps:$4 sm:$0xff]   ;;  %v6083_v25 = vld [vmem:[#allocation7 + $0xec] ss:$16 sps:$4 sm:$0xff]  }
 0x352   :  { %3574 = vmatpush1.bf16.msra.mxu0 %v5988_v56  ;;  %3660 = vmatpush1.bf16.msra.mxu1 %v5991_v32  ;;  %v6078_v56 = vld [vmem:[#allocation7 + $0xe0] ss:$16 sps:$4 sm:$0xff]   ;;  %v6081_v32 = vld [vmem:[#allocation7 + $0xe8] ss:$16 sps:$4 sm:$0xff]  }
 0x353   :  { %3575 = vmatprep.subr.bf16.mxu0 %v5996_v55  ;;  %3661 = vmatprep.subr.bf16.mxu1 %v5999_v57  ;;  %v6086_v55 = vld [vmem:[#allocation7 + $0x104] ss:$16 sps:$4 sm:$0xff]   ;;  %v6089_v57 = vld [vmem:[#allocation7 + $0x10c] ss:$16 sps:$4 sm:$0xff]  }
 0x356   :  { %3576 = vmatpush1.bf16.msra.mxu0 %v5994_v20  ;;  %3662 = vmatpush1.bf16.msra.mxu1 %v5997_v26  ;;  %v6084_v20 = vld [vmem:[#allocation7 + $0x100] ss:$16 sps:$4 sm:$0xff]   ;;  %v6087_v26 = vld [vmem:[#allocation7 + $0x108] ss:$16 sps:$4 sm:$0xff]  }
 0x357   :  { %3577 = vmatprep.subr.bf16.mxu0 %v6002_v33  ;;  %3663 = vmatprep.subr.bf16.mxu1 %v6005_v58  ;;  %v6092_v33 = vld [vmem:[#allocation7 + $0x124] ss:$16 sps:$4 sm:$0xff]   ;;  %v6095_v58 = vld [vmem:[#allocation7 + $0x12c] ss:$16 sps:$4 sm:$0xff]  }
 0x35a   :  { %3578 = vmatpush1.bf16.msra.mxu0 %v6000_v21  ;;  %3664 = vmatpush1.bf16.msra.mxu1 %v6003_v34  ;;  %v6090_v21 = vld [vmem:[#allocation7 + $0x120] ss:$16 sps:$4 sm:$0xff]   ;;  %v6093_v34 = vld [vmem:[#allocation7 + $0x128] ss:$16 sps:$4 sm:$0xff]  }
 0x35b   :  { %3579 = vmatprep.subr.bf16.mxu0 %v6008_v14  ;;  %3665 = vmatprep.subr.bf16.mxu1 %v6011_v59  ;;  %v6098_v14 = vld [vmem:[#allocation7 + $0x144] ss:$16 sps:$4 sm:$0xff]   ;;  %v6101_v59 = vld [vmem:[#allocation7 + $0x14c] ss:$16 sps:$4 sm:$0xff]  }
 0x35e   :  { %3580 = vmatpush1.bf16.msra.mxu0 %v6006_v3  ;;  %3666 = vmatpush1.bf16.msra.mxu1 %v6009_v4  ;;  %v6096_v3 = vld [vmem:[#allocation7 + $0x140] ss:$16 sps:$4 sm:$0xff]   ;;  %v6099_v4 = vld [vmem:[#allocation7 + $0x148] ss:$16 sps:$4 sm:$0xff]  }
 0x35f   :  { %3581 = vmatprep.subr.bf16.mxu0 %v6014_v22  ;;  %3667 = vmatprep.subr.bf16.mxu1 %v6017_v35  ;;  %v6104_v22 = vld [vmem:[#allocation7 + $0x164] ss:$16 sps:$4 sm:$0xff]   ;;  %v6107_v35 = vld [vmem:[#allocation7 + $0x16c] ss:$16 sps:$4 sm:$0xff]  }
 0x362   :  { %3582 = vmatpush1.bf16.msra.mxu0 %v6012_v36  ;;  %3668 = vmatpush1.bf16.msra.mxu1 %v6015_v15  ;;  %v6102_v36 = vld [vmem:[#allocation7 + $0x160] ss:$16 sps:$4 sm:$0xff]   ;;  %v6105_v15 = vld [vmem:[#allocation7 + $0x168] ss:$16 sps:$4 sm:$0xff]  }
 0x363   :  { %3583 = vmatprep.subr.bf16.mxu0 %v6020_v12  ;;  %3669 = vmatprep.subr.bf16.mxu1 %v6023_v13  ;;  %v6110_v12 = vld [vmem:[#allocation7 + $0x184] ss:$16 sps:$4 sm:$0xff]   ;;  %v6113_v13 = vld [vmem:[#allocation7 + $0x18c] ss:$16 sps:$4 sm:$0xff]  }
 0x366   :  { %3584 = vmatpush1.bf16.msra.mxu0 %v6018_v31  ;;  %3670 = vmatpush1.bf16.msra.mxu1 %v6021_v38  ;;  %v6108_v31 = vld [vmem:[#allocation7 + $0x180] ss:$16 sps:$4 sm:$0xff]   ;;  %v6111_v38 = vld [vmem:[#allocation7 + $0x188] ss:$16 sps:$4 sm:$0xff]  }
 0x367   :  { %3585 = vmatprep.subr.bf16.mxu0 %v6026_v40  ;;  %3671 = vmatprep.subr.bf16.mxu1 %v6029_v27  ;;  %v6116_v40 = vld [vmem:[#allocation7 + $0x1a4] ss:$16 sps:$4 sm:$0xff]   ;;  %v6119_v27 = vld [vmem:[#allocation7 + $0x1ac] ss:$16 sps:$4 sm:$0xff]  }
 0x36a   :  { %3586 = vmatpush1.bf16.msra.mxu0 %v6024_v42  ;;  %3672 = vmatpush1.bf16.msra.mxu1 %v6027_v60  ;;  %v6114_v42 = vld [vmem:[#allocation7 + $0x1a0] ss:$16 sps:$4 sm:$0xff]   ;;  %v6117_v60 = vld [vmem:[#allocation7 + $0x1a8] ss:$16 sps:$4 sm:$0xff]  }
 0x36b   :  { %3587 = vmatprep.subr.bf16.mxu0 %v6032_v43  ;;  %3673 = vmatprep.subr.bf16.mxu1 %v6035_v44  ;;  %v6122_v43 = vld [vmem:[#allocation7 + $0x1c4] ss:$16 sps:$4 sm:$0xff]   ;;  %v6125_v44 = vld [vmem:[#allocation7 + $0x1cc] ss:$16 sps:$4 sm:$0xff]  }
 0x36e   :  { %3588 = vmatpush1.bf16.msra.mxu0 %v6030_v8  ;;  %3674 = vmatpush1.bf16.msra.mxu1 %v6033_v2  ;;  %v6120_v8 = vld [vmem:[#allocation7 + $0x1c0] ss:$16 sps:$4 sm:$0xff]   ;;  %v6123_v2 = vld [vmem:[#allocation7 + $0x1c8] ss:$16 sps:$4 sm:$0xff]  }
 0x36f   :  { %4548 = vmatprep.subr.bf16.mxu0 %v6038_v37  ;;  %4634 = vmatprep.subr.bf16.mxu1 %v6041_v29  ;;  %v6128_v37 = vld [vmem:[#allocation7 + $0x1e4] ss:$16 sps:$4 sm:$0xff]   ;;  %v6131_v29 = vld [vmem:[#allocation7 + $0x1ec] ss:$16 sps:$4 sm:$0xff]  }
 0x371   :  { %3590 = vmatmul.mubr.bf16.vlgmr.msra.gmra.mrb[24].mxu0 %v6718_v45  ;;  %3676 = vmatmul.mubr.bf16.vlgmr.msra.gmra.mrb[24].mxu1 %v6718_v45  ;;  %v6057_v45 = vld [vmem:[#allocation7 + $0x68] ss:$16 sps:$4 sm:$0xff]  }
 0x372   :  { %4549 = vmatpush1.bf16.msra.mxu0 %v6036_v39  ;;  %4635 = vmatpush1.bf16.msra.mxu1 %v6039_v41  ;;  %v6126_v39 = vld [vmem:[#allocation7 + $0x1e0] ss:$16 sps:$4 sm:$0xff]   ;;  %v6129_v41 = vld [vmem:[#allocation7 + $0x1e8] ss:$16 sps:$4 sm:$0xff]  }
 0x373   :  { %4550 = vmatprep.subr.bf16.mxu0 %v6044_v0  ;;  %4636 = vmatprep.subr.bf16.mxu1 %v6047_v46  ;;  %v6134_v0 = vld [vmem:[#allocation7 + $0x204] ss:$16 sps:$4 sm:$0xff]   ;;  %v6137_v46 = vld [vmem:[#allocation7 + $0x20c] ss:$16 sps:$4 sm:$0xff]  }
 0x376   :  { %4551 = vmatpush1.bf16.msra.mxu0 %v6042_v47  ;;  %4637 = vmatpush1.bf16.msra.mxu1 %v6045_v48  ;;  %v2852_v47 = vld [vmem:[%s6785_s8] sm:$0xf] }
 0x377   :  { %4552 = vmatprep.subr.bf16.mxu0 %v6050_v49  ;;  %4638 = vmatprep.subr.bf16.mxu1 %v6053_v50  ;;  %v2857_v48 = vrot.slane %v2852_v47, %v6583_v28  ;;  %v3694_v49 = vld [vmem:[%s6786_s9] sm:$0xf]  ;;  %v2865_v50 = vrot.slane %v2852_v47, %v6671_v62 }
 0x37a   :  { %4553 = vmatpush1.bf16.msra.mxu0 %v6048_v51  ;;  %4639 = vmatpush1.bf16.msra.mxu1 %v6051_v52  ;;  %v3724_v51 = vld [vmem:[%s6787_s10] sm:$0xf]  ;;  %v2861_v52 = vrot.slane %v2852_v47, %v6589_v30 }
 0x37b   :  { %4554 = vmatprep.subr.bf16.mxu0 %v6056_v53  ;;  %4640 = vmatprep.subr.bf16.mxu1 %v6059_v61  ;;  %v2869_v53 = vrot.slane %v2852_v47, %v6674_v63 }
 0x37e   :  { %4555 = vmatpush1.bf16.msra.mxu0 %v6054_v1  ;;  %4641 = vmatpush1.bf16.msra.mxu1 %v6057_v45  ;;  %v3699_v1 = vrot.slane %v3694_v49, %v6583_v28 }
 0x37f   :  { %4556 = vmatprep.subr.bf16.mxu0 %v6062_v7  ;;  %4642 = vmatprep.subr.bf16.mxu1 %v6065_v16  ;;  %v3707_v7 = vrot.slane %v3694_v49, %v6671_v62  ;;  %v3703_v16 = vrot.slane %v3694_v49, %v6589_v30 }
 0x382   :  { %4557 = vmatpush1.bf16.msra.mxu0 %v6060_v18  ;;  %4643 = vmatpush1.bf16.msra.mxu1 %v6063_v54  ;;  %v3711_v18 = vrot.slane %v3694_v49, %v6674_v63  ;;  %v6143_v49 = vld [vmem:[#allocation7 + $0x22c] ss:$16 sps:$4 sm:$0xff]  }
 0x383   :  { %4558 = vmatprep.subr.bf16.mxu0 %v6068_v9  ;;  %4644 = vmatprep.subr.bf16.mxu1 %v6071_v10  ;;  %v3729_v9 = vrot.slane %v3724_v51, %v6583_v28 }
 0x386   :  { %4559 = vmatpush1.bf16.msra.mxu0 %v6066_v17  ;;  %4645 = vmatpush1.bf16.msra.mxu1 %v6069_v5  ;;  %v3737_v17 = vrot.slane %v3724_v51, %v6671_v62 }
 0x387   :  { %4560 = vmatprep.subr.bf16.mxu0 %v6074_v6  ;;  %4646 = vmatprep.subr.bf16.mxu1 %v6077_v24 }
 0x38a   :  { %4561 = vmatpush1.bf16.msra.mxu0 %v6072_v11  ;;  %4647 = vmatpush1.bf16.msra.mxu1 %v6075_v19  ;;  %v3733_v11 = vrot.slane %v3724_v51, %v6589_v30 }
 0x38b   :  { %4562 = vmatprep.subr.bf16.mxu0 %v6080_v23  ;;  %4648 = vmatprep.subr.bf16.mxu1 %v6083_v25  ;;  %v3741_v23 = vrot.slane %v3724_v51, %v6674_v63  ;;  %v6141_v51 = vld [vmem:[#allocation7 + $0x228] ss:$16 sps:$4 sm:$0xff]  }
 0x38e   :  { %4563 = vmatpush1.bf16.msra.mxu0 %v6078_v56  ;;  %4649 = vmatpush1.bf16.msra.mxu1 %v6081_v32 }
 0x38f   :  { %4564 = vmatprep.subr.bf16.mxu0 %v6086_v55  ;;  %4650 = vmatprep.subr.bf16.mxu1 %v6089_v57 }
 0x392   :  { %4565 = vmatpush1.bf16.msra.mxu0 %v6084_v20  ;;  %4651 = vmatpush1.bf16.msra.mxu1 %v6087_v26 }
 0x393   :  { %4566 = vmatprep.subr.bf16.mxu0 %v6092_v33  ;;  %4652 = vmatprep.subr.bf16.mxu1 %v6095_v58 }
 0x396   :  { %4567 = vmatpush1.bf16.msra.mxu0 %v6090_v21  ;;  %4653 = vmatpush1.bf16.msra.mxu1 %v6093_v34 }
 0x397   :  { %4568 = vmatprep.subr.bf16.mxu0 %v6098_v14  ;;  %4654 = vmatprep.subr.bf16.mxu1 %v6101_v59 }
 0x39a   :  { %4569 = vmatpush1.bf16.msra.mxu0 %v6096_v3  ;;  %4655 = vmatpush1.bf16.msra.mxu1 %v6099_v4 }
 0x39b   :  { %4570 = vmatprep.subr.bf16.mxu0 %v6104_v22  ;;  %4656 = vmatprep.subr.bf16.mxu1 %v6107_v35 }
 0x39e   :  { %4571 = vmatpush1.bf16.msra.mxu0 %v6102_v36  ;;  %4657 = vmatpush1.bf16.msra.mxu1 %v6105_v15 }
 0x39f   :  { %4572 = vmatprep.subr.bf16.mxu0 %v6110_v12  ;;  %4658 = vmatprep.subr.bf16.mxu1 %v6113_v13 }
 0x3a2   :  { %4573 = vmatpush1.bf16.msra.mxu0 %v6108_v31  ;;  %4659 = vmatpush1.bf16.msra.mxu1 %v6111_v38 }
 0x3a3   :  { %4574 = vmatprep.subr.bf16.mxu0 %v6116_v40  ;;  %4660 = vmatprep.subr.bf16.mxu1 %v6119_v27 }
 0x3a6   :  { %4575 = vmatpush1.bf16.msra.mxu0 %v6114_v42  ;;  %4661 = vmatpush1.bf16.msra.mxu1 %v6117_v60 }
 0x3a7   :  { %4576 = vmatprep.subr.bf16.mxu0 %v6122_v43  ;;  %4662 = vmatprep.subr.bf16.mxu1 %v6125_v44 }
 0x3aa   :  { %4577 = vmatpush1.bf16.msra.mxu0 %v6120_v8  ;;  %4663 = vmatpush1.bf16.msra.mxu1 %v6123_v2 }
 0x3ab   :  { %4578 = vmatprep.subr.bf16.mxu0 %v6128_v37  ;;  %4664 = vmatprep.subr.bf16.mxu1 %v6131_v29 }
 0x3ae   :  { %4579 = vmatpush1.bf16.msra.mxu0 %v6126_v39  ;;  %4665 = vmatpush1.bf16.msra.mxu1 %v6129_v41 }
 0x3af   :  { %4591 = vmatprep.subr.bf16.mxu0 %v6134_v0  ;;  %4677 = vmatprep.subr.bf16.mxu1 %v6137_v46  ;;  %v6132_v0 = vld [vmem:[#allocation7 + $0x200] ss:$16 sps:$4 sm:$0xff]   ;;  %v6135_v46 = vld [vmem:[#allocation7 + $0x208] ss:$16 sps:$4 sm:$0xff]  }
 0x444   :  { %v3591_v61 = vpop.f32.mrb[24].mxu0  ;;  %v3677_v45 = vpop.f32.mrb[24].mxu1 }
 0x445   :  { %v5799_v54 = vadd.f32 %v3591_v61, %v2857_v48  ;;  %v5803_v10 = vadd.f32 %v3677_v45, %v2865_v50  ;;  %v3593_v5 = vpop.f32.mrb[25].mxu0  ;;  %v3679_v6 = vpop.f32.mrb[25].mxu1  ;;  %v6144_v61 = vld [vmem:[#allocation7 + $0x240] ss:$16 sps:$4 sm:$0xff]   ;;  %v6152_v45 = vld [vmem:[#allocation7 + $0x264] ss:$16 sps:$4 sm:$0xff]  }
 0x446   :  { %v5800_v24 = vadd.f32 %v3593_v5, %v2861_v52  ;;  %v5804_v19 = vadd.f32 %v3679_v6, %v2869_v53  ;;  %v3595_v25 = vpop.f32.mrb[26].mxu0  ;;  %v3681_v56 = vpop.f32.mrb[26].mxu1  ;;  %v6164_v5 = vld [vmem:[#allocation7 + $0x2a4] ss:$16 sps:$4 sm:$0xff]   ;;  %v6167_v6 = vld [vmem:[#allocation7 + $0x2ac] ss:$16 sps:$4 sm:$0xff]  }
 0x447   :  { %v3686_v32 = vmax.f32 %v5799_v54, 0.0  ;;  %v3688_v55 = vmax.f32 %v5803_v10, 0.0  ;;  %v5801_v57 = vadd.f32 %v3595_v25, %v2857_v48  ;;  %v5805_v20 = vadd.f32 %v3681_v56, %v2865_v50  ;;  %v3597_v26 = vpop.f32.mrb[27].mxu0  ;;  %v3683_v33 = vpop.f32.mrb[27].mxu1  ;;  %v6140_v48 = vld [vmem:[#allocation7 + $0x224] ss:$16 sps:$4 sm:$0xff]  }
 0x448   :  { %v3687_v58 = vmax.f32 %v5800_v24, 0.0  ;;  %v3689_v21 = vmax.f32 %v5804_v19, 0.0  ;;  %v5802_v34 = vadd.f32 %v3597_v26, %v2861_v52  ;;  %v5806_v14 = vadd.f32 %v3683_v33, %v2869_v53  ;;  %v6138_v50 = vld [vmem:[#allocation7 + $0x220] ss:$16 sps:$4 sm:$0xff]   ;;  %v6146_v52 = vld [vmem:[#allocation7 + $0x244] ss:$16 sps:$4 sm:$0xff]  }
 0x449   :  { %v3716_v59 = vmul.f32 %v3699_v1, %v3686_v32  ;;  %v3718_v3 = vmul.f32 %v3707_v7, %v3688_v55  ;;  %v3690_v4 = vmax.f32 %v5801_v57, 0.0  ;;  %v3692_v22 = vmax.f32 %v5805_v20, 0.0  ;;  %v6149_v53 = vld [vmem:[#allocation7 + $0x24c] ss:$16 sps:$4 sm:$0xff]   ;;  %v6158_v54 = vld [vmem:[#allocation7 + $0x284] ss:$16 sps:$4 sm:$0xff]  }
 0x44a   :  { %v3717_v35 = vmul.f32 %v3703_v16, %v3687_v58  ;;  %v3719_v36 = vmul.f32 %v3711_v18, %v3689_v21  ;;  %v3691_v15 = vmax.f32 %v5802_v34, 0.0  ;;  %v3693_v12 = vmax.f32 %v5806_v14, 0.0  ;;  %v6156_v10 = vld [vmem:[#allocation7 + $0x280] ss:$16 sps:$4 sm:$0xff]   ;;  %v6170_v19 = vld [vmem:[#allocation7 + $0x2c4] ss:$16 sps:$4 sm:$0xff]  }
 0x44b   :  { %v3748_v13 = vadd.f32 %v3737_v17, %v3718_v3  ;;  %v3720_v31 = vmul.f32 %v3699_v1, %v3690_v4  ;;  %v3722_v38 = vmul.f32 %v3707_v7, %v3692_v22  ;;  %v3746_v42 = vadd.f32 %v3729_v9, %v3716_v59  ;;  %v6147_v1 = vld [vmem:[#allocation7 + $0x248] ss:$16 sps:$4 sm:$0xff]   ;;  %v6155_v7 = vld [vmem:[#allocation7 + $0x26c] ss:$16 sps:$4 sm:$0xff]   ;;  %v6162_v24 = vld [vmem:[#allocation7 + $0x2a0] ss:$16 sps:$4 sm:$0xff]  }
 0x44c   :  { %v3721_v40 = vmul.f32 %v3703_v16, %v3691_v15  ;;  %v3723_v27 = vmul.f32 %v3711_v18, %v3693_v12  ;;  %v3747_v44 = vadd.f32 %v3733_v11, %v3717_v35  ;;  %v3749_v8 = vadd.f32 %v3741_v23, %v3719_v36  ;;  %v6150_v16 = vld [vmem:[#allocation7 + $0x260] ss:$16 sps:$4 sm:$0xff]   ;;  %v6153_v18 = vld [vmem:[#allocation7 + $0x268] ss:$16 sps:$4 sm:$0xff]   ;;  %v6176_v32 = vld [vmem:[#allocation7 + $0x2e4] ss:$16 sps:$4 sm:$0xff]  }
 0x44d   :  { %v3750_v60 = vadd.f32 %v3729_v9, %v3720_v31  ;;  %v3752_v43 = vadd.f32 %v3737_v17, %v3722_v38  ;;  %v6161_v9 = vld [vmem:[#allocation7 + $0x28c] ss:$16 sps:$4 sm:$0xff]   ;;  %v6159_v17 = vld [vmem:[#allocation7 + $0x288] ss:$16 sps:$4 sm:$0xff]   ;;  %v6168_v25 = vld [vmem:[#allocation7 + $0x2c0] ss:$16 sps:$4 sm:$0xff]  }
 0x44e   :  { %v3751_v2 = vadd.f32 %v3733_v11, %v3721_v40  ;;  %v3753_v37 = vadd.f32 %v3741_v23, %v3723_v27  ;;  %v6165_v11 = vld [vmem:[#allocation7 + $0x2a8] ss:$16 sps:$4 sm:$0xff]   ;;  %v6173_v23 = vld [vmem:[#allocation7 + $0x2cc] ss:$16 sps:$4 sm:$0xff]   ;;  %v6174_v57 = vld [vmem:[#allocation7 + $0x2e0] ss:$16 sps:$4 sm:$0xff]  }
 0x44f   :  { %v3754_v29 = vpack.c.bf16 %v3750_v60, %v3746_v42  ;;  %v6743_v39 = vpack.c.bf16 %v3752_v43, %v3748_v13  ;;  %v6171_v56 = vld [vmem:[#allocation7 + $0x2c8] ss:$16 sps:$4 sm:$0xff]   ;;  %v6179_v55 = vld [vmem:[#allocation7 + $0x2ec] ss:$16 sps:$4 sm:$0xff]   ;;  %v6182_v26 = vld [vmem:[#allocation7 + $0x304] ss:$16 sps:$4 sm:$0xff]  }
 0x450   :  { %v3755_v41 = vpack.c.bf16 %v3751_v2, %v3747_v44  ;;  %v3757_v47 = vpack.c.bf16 %v3753_v37, %v3749_v8  ;;  %v6177_v20 = vld [vmem:[#allocation7 + $0x2e8] ss:$16 sps:$4 sm:$0xff]   ;;  %v6185_v33 = vld [vmem:[#allocation7 + $0x30c] ss:$16 sps:$4 sm:$0xff]   ;;  %v6180_v58 = vld [vmem:[#allocation7 + $0x300] ss:$16 sps:$4 sm:$0xff]  }
 0x451   :  { %v6183_v21 = vld [vmem:[#allocation7 + $0x308] ss:$16 sps:$4 sm:$0xff]   ;;  %v6188_v34 = vld [vmem:[#allocation7 + $0x324] ss:$16 sps:$4 sm:$0xff]   ;;  %v6191_v14 = vld [vmem:[#allocation7 + $0x32c] ss:$16 sps:$4 sm:$0xff]  }
 0x452   :  { %4580 = vmatprep.mubr.bf16.mxu0 %v3755_v41  ;;  %4666 = vmatprep.mubr.bf16.mxu1 %v3755_v41  ;;  %v6186_v59 = vld [vmem:[#allocation7 + $0x320] ss:$16 sps:$4 sm:$0xff]   ;;  %v6189_v3 = vld [vmem:[#allocation7 + $0x328] ss:$16 sps:$4 sm:$0xff]   ;;  %v6194_v4 = vld [vmem:[#allocation7 + $0x344] ss:$16 sps:$4 sm:$0xff]  }
 0x453   :  { %4581 = vmatmul.mubr.bf16.vlgmr.msra.gmra.mrb[28].mxu0 %v3754_v29  ;;  %4667 = vmatmul.mubr.bf16.vlgmr.msra.gmra.mrb[28].mxu1 %v3754_v29  ;;  %v6197_v22 = vld [vmem:[#allocation7 + $0x34c] ss:$16 sps:$4 sm:$0xff]   ;;  %v6192_v35 = vld [vmem:[#allocation7 + $0x340] ss:$16 sps:$4 sm:$0xff]   ;;  %v6195_v36 = vld [vmem:[#allocation7 + $0x348] ss:$16 sps:$4 sm:$0xff]  }
 0x454   :  { %4592 = vmatpush1.bf16.msra.mxu0 %v6132_v0  ;;  %4678 = vmatpush1.bf16.msra.mxu1 %v6135_v46  ;;  %v6200_v15 = vld [vmem:[#allocation7 + $0x364] ss:$16 sps:$4 sm:$0xff]   ;;  %v6203_v12 = vld [vmem:[#allocation7 + $0x36c] ss:$16 sps:$4 sm:$0xff]   ;;  %v6198_v13 = vld [vmem:[#allocation7 + $0x360] ss:$16 sps:$4 sm:$0xff]  }
 0x455   :  { %4623 = vmatprep.mubr.bf16.mxu0 %v3757_v47  ;;  %4709 = vmatprep.mubr.bf16.mxu1 %v3757_v47  ;;  %v6201_v31 = vld [vmem:[#allocation7 + $0x368] ss:$16 sps:$4 sm:$0xff]   ;;  %v6206_v38 = vld [vmem:[#allocation7 + $0x384] ss:$16 sps:$4 sm:$0xff]   ;;  %v6209_v40 = vld [vmem:[#allocation7 + $0x38c] ss:$16 sps:$4 sm:$0xff]  }
 0x456   :  { %4593 = vmatprep.subr.bf16.mxu0 %v6140_v48  ;;  %4679 = vmatprep.subr.bf16.mxu1 %v6143_v49  ;;  %v6204_v27 = vld [vmem:[#allocation7 + $0x380] ss:$16 sps:$4 sm:$0xff]   ;;  %v6207_v42 = vld [vmem:[#allocation7 + $0x388] ss:$16 sps:$4 sm:$0xff]   ;;  %v6212_v60 = vld [vmem:[#allocation7 + $0x3a4] ss:$16 sps:$4 sm:$0xff]  }
 0x457   :  { %v6215_v43 = vld [vmem:[#allocation7 + $0x3ac] ss:$16 sps:$4 sm:$0xff]   ;;  %v6210_v44 = vld [vmem:[#allocation7 + $0x3a0] ss:$16 sps:$4 sm:$0xff]   ;;  %v6213_v8 = vld [vmem:[#allocation7 + $0x3a8] ss:$16 sps:$4 sm:$0xff]  }
 0x458   :  { %4594 = vmatpush1.bf16.msra.mxu0 %v6138_v50  ;;  %4680 = vmatpush1.bf16.msra.mxu1 %v6141_v51  ;;  %v6218_v2 = vld [vmem:[#allocation7 + $0x3c4] ss:$16 sps:$4 sm:$0xff]   ;;  %v6221_v37 = vld [vmem:[#allocation7 + $0x3cc] ss:$16 sps:$4 sm:$0xff]   ;;  %v6216_v29 = vld [vmem:[#allocation7 + $0x3c0] ss:$16 sps:$4 sm:$0xff]  }
 0x459   :  { %4595 = vmatprep.subr.bf16.mxu0 %v6146_v52  ;;  %4681 = vmatprep.subr.bf16.mxu1 %v6149_v53  ;;  %v6219_v41 = vld [vmem:[#allocation7 + $0x3c8] ss:$16 sps:$4 sm:$0xff]   ;;  %v6224_v0 = vld [vmem:[#allocation7 + $0x3e4] ss:$16 sps:$4 sm:$0xff]   ;;  %v6227_v46 = vld [vmem:[#allocation7 + $0x3ec] ss:$16 sps:$4 sm:$0xff]  }
 0x45a   :  { %v6222_v47 = vld [vmem:[#allocation7 + $0x3e0] ss:$16 sps:$4 sm:$0xff]   ;;  %v6225_v48 = vld [vmem:[#allocation7 + $0x3e8] ss:$16 sps:$4 sm:$0xff]  }
 0x45b   :  { %v6228_v49 = vld [vmem:[#allocation9 + $0x40] sm:$0xff]   ;;  %v6232_v53 = vld [vmem:[#allocation9 + $0x48] sm:$0xff]  }
 0x45c   :  { %4596 = vmatpush1.bf16.msra.mxu0 %v6144_v61  ;;  %4682 = vmatpush1.bf16.msra.mxu1 %v6147_v1  ;;  %v6229_v50 = vld [vmem:[#allocation9 + $0xc0] sm:$0xff]   ;;  %v6233_v61 = vld [vmem:[#allocation9 + $0xc8] sm:$0xff]  }
 0x45d   :  { %4597 = vmatprep.subr.bf16.mxu0 %v6152_v45  ;;  %4683 = vmatprep.subr.bf16.mxu1 %v6155_v7  ;;  %v6230_v51 = vld [vmem:[#allocation9] sm:$0xff]   ;;  %v6234_v1 = vld [vmem:[#allocation9 + $0x8] sm:$0xff]   ;;  %v6236_v7 = vld [vmem:[#allocation9 + $0x50] sm:$0xff]  }
 0x45e   :  { %v6231_v52 = vld [vmem:[#allocation9 + $0x80] sm:$0xff]   ;;  %v6235_v45 = vld [vmem:[#allocation9 + $0x88] sm:$0xff]  }
 0x460   :  { %4598 = vmatpush1.bf16.msra.mxu0 %v6150_v16  ;;  %4684 = vmatpush1.bf16.msra.mxu1 %v6153_v18  ;;  %v6237_v16 = vld [vmem:[#allocation9 + $0xd0] sm:$0xff]  }
 0x461   :  { %4599 = vmatprep.subr.bf16.mxu0 %v6158_v54  ;;  %4685 = vmatprep.subr.bf16.mxu1 %v6161_v9  ;;  %v6238_v18 = vld [vmem:[#allocation9 + $0x10] sm:$0xff]   ;;  %v6240_v9 = vld [vmem:[#allocation9 + $0x58] sm:$0xff]  }
 0x462   :  { %v6239_v54 = vld [vmem:[#allocation9 + $0x90] sm:$0xff]  }
 0x464   :  { %4600 = vmatpush1.bf16.msra.mxu0 %v6156_v10  ;;  %4686 = vmatpush1.bf16.msra.mxu1 %v6159_v17  ;;  %v6241_v10 = vld [vmem:[#allocation9 + $0xd8] sm:$0xff]  }
 0x465   :  { %4601 = vmatprep.subr.bf16.mxu0 %v6164_v5  ;;  %4687 = vmatprep.subr.bf16.mxu1 %v6167_v6  ;;  %v6242_v17 = vld [vmem:[#allocation9 + $0x18] sm:$0xff]   ;;  %v6244_v5 = vld [vmem:[#allocation9 + $0x60] sm:$0xff]  }
 0x466   :  { %v6245_v6 = vld [vmem:[#allocation9 + $0xe0] sm:$0xff]  }
 0x468   :  { %4602 = vmatpush1.bf16.msra.mxu0 %v6162_v24  ;;  %4688 = vmatpush1.bf16.msra.mxu1 %v6165_v11  ;;  %v6246_v24 = vld [vmem:[#allocation9 + $0x20] sm:$0xff]  }
 0x469   :  { %4603 = vmatprep.subr.bf16.mxu0 %v6170_v19  ;;  %4689 = vmatprep.subr.bf16.mxu1 %v6173_v23  ;;  %v6247_v11 = vld [vmem:[#allocation9 + $0xa0] sm:$0xff]   ;;  %v6248_v19 = vld [vmem:[#allocation9 + $0x68] sm:$0xff]  }
 0x46a   :  { %v6249_v23 = vld [vmem:[#allocation9 + $0xe8] sm:$0xff]  }
 0x46c   :  { %4604 = vmatpush1.bf16.msra.mxu0 %v6168_v25  ;;  %4690 = vmatpush1.bf16.msra.mxu1 %v6171_v56  ;;  %v6250_v25 = vld [vmem:[#allocation9 + $0x28] sm:$0xff]  }
 0x46d   :  { %4605 = vmatprep.subr.bf16.mxu0 %v6176_v32  ;;  %4691 = vmatprep.subr.bf16.mxu1 %v6179_v55  ;;  %v6251_v56 = vld [vmem:[#allocation9 + $0xa8] sm:$0xff]   ;;  %v6252_v32 = vld [vmem:[#allocation9 + $0x70] sm:$0xff]  }
 0x46e   :  { %v6253_v55 = vld [vmem:[#allocation9 + $0xf0] sm:$0xff]  }
 0x470   :  { %4606 = vmatpush1.bf16.msra.mxu0 %v6174_v57  ;;  %4692 = vmatpush1.bf16.msra.mxu1 %v6177_v20  ;;  %v6254_v57 = vld [vmem:[#allocation9 + $0x30] sm:$0xff]  }
 0x471   :  { %4607 = vmatprep.subr.bf16.mxu0 %v6182_v26  ;;  %4693 = vmatprep.subr.bf16.mxu1 %v6185_v33  ;;  %v6255_v20 = vld [vmem:[#allocation9 + $0xb0] sm:$0xff]   ;;  %v6256_v26 = vld [vmem:[#allocation9 + $0x78] sm:$0xff]  }
 0x472   :  { %v6257_v33 = vld [vmem:[#allocation9 + $0xf8] sm:$0xff]  }
 0x474   :  { %4608 = vmatpush1.bf16.msra.mxu0 %v6180_v58  ;;  %4694 = vmatpush1.bf16.msra.mxu1 %v6183_v21  ;;  %v6258_v58 = vld [vmem:[#allocation9 + $0x38] sm:$0xff]  }
 0x475   :  { %4609 = vmatprep.subr.bf16.mxu0 %v6188_v34  ;;  %4695 = vmatprep.subr.bf16.mxu1 %v6191_v14  ;;  %v6259_v21 = vld [vmem:[#allocation9 + $0xb8] sm:$0xff]   ;;  %v3886_v34 = vld [vmem:[%s6789_s12] sm:$0xf] }
 0x476   :  { %v3891_v14 = vrot.slane %v3886_v34, %v6583_v28 }
 0x478   :  { %4610 = vmatpush1.bf16.msra.mxu0 %v6186_v59  ;;  %4696 = vmatpush1.bf16.msra.mxu1 %v6189_v3  ;;  %v4728_v59 = vld [vmem:[%s6790_s13] sm:$0xf]  ;;  %v3899_v3 = vrot.slane %v3886_v34, %v6671_v62 }
 0x479   :  { %4611 = vmatprep.subr.bf16.mxu0 %v6194_v4  ;;  %4697 = vmatprep.subr.bf16.mxu1 %v6197_v22  ;;  %v4758_v4 = vld [vmem:[%s6791_s14] sm:$0xf]  ;;  %v3895_v22 = vrot.slane %v3886_v34, %v6589_v30 }
 0x47c   :  { %4612 = vmatpush1.bf16.msra.mxu0 %v6192_v35  ;;  %4698 = vmatpush1.bf16.msra.mxu1 %v6195_v36  ;;  %v3903_v35 = vrot.slane %v3886_v34, %v6674_v63 }
 0x47d   :  { %4613 = vmatprep.subr.bf16.mxu0 %v6200_v15  ;;  %4699 = vmatprep.subr.bf16.mxu1 %v6203_v12  ;;  %v4733_v15 = vrot.slane %v4728_v59, %v6583_v28 }
 0x480   :  { %4614 = vmatpush1.bf16.msra.mxu0 %v6198_v13  ;;  %4700 = vmatpush1.bf16.msra.mxu1 %v6201_v31  ;;  %v4741_v13 = vrot.slane %v4728_v59, %v6671_v62  ;;  %v4737_v31 = vrot.slane %v4728_v59, %v6589_v30 }
 0x481   :  { %4615 = vmatprep.subr.bf16.mxu0 %v6206_v38  ;;  %4701 = vmatprep.subr.bf16.mxu1 %v6209_v40  ;;  %v4745_v38 = vrot.slane %v4728_v59, %v6674_v63 }
 0x484   :  { %4616 = vmatpush1.bf16.msra.mxu0 %v6204_v27  ;;  %4702 = vmatpush1.bf16.msra.mxu1 %v6207_v42  ;;  %v4763_v27 = vrot.slane %v4758_v4, %v6583_v28 }
 0x485   :  { %4617 = vmatprep.subr.bf16.mxu0 %v6212_v60  ;;  %4703 = vmatprep.subr.bf16.mxu1 %v6215_v43  ;;  %v4771_v60 = vrot.slane %v4758_v4, %v6671_v62 }
 0x488   :  { %4618 = vmatpush1.bf16.msra.mxu0 %v6210_v44  ;;  %4704 = vmatpush1.bf16.msra.mxu1 %v6213_v8 }
 0x489   :  { %4619 = vmatprep.subr.bf16.mxu0 %v6218_v2  ;;  %4705 = vmatprep.subr.bf16.mxu1 %v6221_v37  ;;  %v4767_v2 = vrot.slane %v4758_v4, %v6589_v30 }
 0x48c   :  { %4620 = vmatpush1.bf16.msra.mxu0 %v6216_v29  ;;  %4706 = vmatpush1.bf16.msra.mxu1 %v6219_v41  ;;  %v4775_v29 = vrot.slane %v4758_v4, %v6674_v63 }
 0x48d   :  { %4621 = vmatprep.subr.bf16.mxu0 %v6224_v0  ;;  %4707 = vmatprep.subr.bf16.mxu1 %v6227_v46 }
 0x490   :  { %4622 = vmatpush1.bf16.msra.mxu0 %v6222_v47  ;;  %4708 = vmatpush1.bf16.msra.mxu1 %v6225_v48 }
 0x491   :  { %5755 = vmatprep.subr.bf16.mxu0 %v6228_v49  ;;  %5777 = vmatprep.subr.bf16.mxu1 %v6229_v50 }
 0x493   :  { %4624 = vmatmul.mubr.bf16.vlgmr.msra.gmra.mrb[28].mxu0 %v6743_v39  ;;  %4710 = vmatmul.mubr.bf16.vlgmr.msra.gmra.mrb[28].mxu1 %v6743_v39  ;;  %v6243_v39 = vld [vmem:[#allocation9 + $0x98] sm:$0xff]  }
 0x494   :  { %5756 = vmatpush3.bf16.msra.mxu0 %v6230_v51  ;;  %5778 = vmatpush3.bf16.msra.mxu1 %v6231_v52 }
 0x495   :  { %5757 = vmatprep.subr.bf16.mxu0 %v6232_v53  ;;  %5779 = vmatprep.subr.bf16.mxu1 %v6233_v61 }
 0x498   :  { %5758 = vmatpush3.bf16.msra.mxu0 %v6234_v1  ;;  %5780 = vmatpush3.bf16.msra.mxu1 %v6235_v45 }
 0x499   :  { %5759 = vmatprep.subr.bf16.mxu0 %v6236_v7  ;;  %5781 = vmatprep.subr.bf16.mxu1 %v6237_v16 }
 0x49c   :  { %5760 = vmatpush3.bf16.msra.mxu0 %v6238_v18  ;;  %5782 = vmatpush3.bf16.msra.mxu1 %v6239_v54 }
 0x49d   :  { %5761 = vmatprep.subr.bf16.mxu0 %v6240_v9  ;;  %5783 = vmatprep.subr.bf16.mxu1 %v6241_v10 }
 0x4a0   :  { %5762 = vmatpush3.bf16.msra.mxu0 %v6242_v17  ;;  %5784 = vmatpush3.bf16.msra.mxu1 %v6243_v39 }
 0x4a1   :  { %5763 = vmatprep.subr.bf16.mxu0 %v6244_v5  ;;  %5785 = vmatprep.subr.bf16.mxu1 %v6245_v6 }
 0x4a4   :  { %5764 = vmatpush3.bf16.msra.mxu0 %v6246_v24  ;;  %5786 = vmatpush3.bf16.msra.mxu1 %v6247_v11 }
 0x4a5   :  { %5765 = vmatprep.subr.bf16.mxu0 %v6248_v19  ;;  %5787 = vmatprep.subr.bf16.mxu1 %v6249_v23 }
 0x4a8   :  { %5766 = vmatpush3.bf16.msra.mxu0 %v6250_v25  ;;  %5788 = vmatpush3.bf16.msra.mxu1 %v6251_v56 }
 0x4a9   :  { %5767 = vmatprep.subr.bf16.mxu0 %v6252_v32  ;;  %5789 = vmatprep.subr.bf16.mxu1 %v6253_v55 }
 0x4ac   :  { %5768 = vmatpush3.bf16.msra.mxu0 %v6254_v57  ;;  %5790 = vmatpush3.bf16.msra.mxu1 %v6255_v20 }
 0x4ad   :  { %5769 = vmatprep.subr.bf16.mxu0 %v6256_v26  ;;  %5791 = vmatprep.subr.bf16.mxu1 %v6257_v33  ;;  %v5722_v33 = vld [vmem:[%s6793_s16] ss:$0 sm:$0xff] }
 0x4b0   :  { %5770 = vmatpush3.bf16.msra.mxu0 %v6258_v58  ;;  %5792 = vmatpush3.bf16.msra.mxu1 %v6259_v21 }
 0x566   :  { %v4625_v36 = vpop.f32.mrb[28].mxu0  ;;  %v4711_v12 = vpop.f32.mrb[28].mxu1 }
 0x567   :  { %v5807_v40 = vadd.f32 %v4625_v36, %v3891_v14  ;;  %v5811_v42 = vadd.f32 %v4711_v12, %v3899_v3  ;;  %v4627_v43 = vpop.f32.mrb[29].mxu0  ;;  %v4713_v44 = vpop.f32.mrb[29].mxu1 }
 0x568   :  { %v5808_v8 = vadd.f32 %v4627_v43, %v3895_v22  ;;  %v5812_v37 = vadd.f32 %v4713_v44, %v3903_v35  ;;  %v4629_v41 = vpop.f32.mrb[30].mxu0  ;;  %v4715_v0 = vpop.f32.mrb[30].mxu1 }
 0x569   :  { %v4720_v46 = vmax.f32 %v5807_v40, 0.0  ;;  %v4722_v47 = vmax.f32 %v5811_v42, 0.0  ;;  %v5809_v48 = vadd.f32 %v4629_v41, %v3891_v14  ;;  %v5813_v49 = vadd.f32 %v4715_v0, %v3899_v3  ;;  %v4631_v50 = vpop.f32.mrb[31].mxu0  ;;  %v4717_v51 = vpop.f32.mrb[31].mxu1 }
 0x56a   :  { %v4721_v28 = vmax.f32 %v5808_v8, 0.0  ;;  %v4723_v52 = vmax.f32 %v5812_v37, 0.0  ;;  %v5810_v53 = vadd.f32 %v4631_v50, %v3895_v22  ;;  %v5814_v62 = vadd.f32 %v4717_v51, %v3903_v35 }
 0x56b   :  { %v4750_v61 = vmul.f32 %v4733_v15, %v4720_v46  ;;  %v4752_v1 = vmul.f32 %v4741_v13, %v4722_v47  ;;  %v4724_v45 = vmax.f32 %v5809_v48, 0.0  ;;  %v4726_v7 = vmax.f32 %v5813_v49, 0.0 }
 0x56c   :  { %v4751_v30 = vmul.f32 %v4737_v31, %v4721_v28  ;;  %v4753_v16 = vmul.f32 %v4745_v38, %v4723_v52  ;;  %v4725_v18 = vmax.f32 %v5810_v53, 0.0  ;;  %v4727_v63 = vmax.f32 %v5814_v62, 0.0 }
 0x56d   :  { %v4754_v54 = vmul.f32 %v4733_v15, %v4724_v45  ;;  %v4756_v9 = vmul.f32 %v4741_v13, %v4726_v7  ;;  %v4780_v39 = vadd.f32 %v4763_v27, %v4750_v61  ;;  %v4782_v5 = vadd.f32 %v4771_v60, %v4752_v1 }
 0x56e   :  { %v4755_v10 = vmul.f32 %v4737_v31, %v4725_v18  ;;  %v4757_v17 = vmul.f32 %v4745_v38, %v4727_v63  ;;  %v4781_v11 = vadd.f32 %v4767_v2, %v4751_v30  ;;  %v4783_v19 = vadd.f32 %v4775_v29, %v4753_v16 }
 0x56f   :  { %v4784_v6 = vadd.f32 %v4763_v27, %v4754_v54  ;;  %v4786_v24 = vadd.f32 %v4771_v60, %v4756_v9 }
 0x570   :  { %v4785_v23 = vadd.f32 %v4767_v2, %v4755_v10  ;;  %v4787_v25 = vadd.f32 %v4775_v29, %v4757_v17 }
 0x571   :  { %v4788_v56 = vpack.c.bf16 %v4784_v6, %v4780_v39  ;;  %v4790_v32 = vpack.c.bf16 %v4786_v24, %v4782_v5 }
 0x572   :  { %v4789_v55 = vpack.c.bf16 %v4785_v23, %v4781_v11  ;;  %v4791_v57 = vpack.c.bf16 %v4787_v25, %v4783_v19 }
 0x574   :  { %5087 = vmatprep.mubr.bf16.mxu0 %v4789_v55  ;;  %5128 = vmatprep.mubr.bf16.mxu1 %v4791_v57 }
 0x575   :  { %5088 = vmatmul.mubr.bf16.vlgmr.msra.gmra.mrb[32].mxu0 %v4788_v56  ;;  %5129 = vmatmul.mubr.bf16.vlgmr.msra.gmra.mrb[32].mxu1 %v4790_v32 }
 0x648   :  { %v5771_v20 = vpop.f32.mrb[32].mxu0  ;;  %v5793_v26 = vpop.f32.mrb[32].mxu1 }
 0x649   :  { %v5772_v58 = vpop.f32.mrb[33].mxu0  ;;  %v5794_v21 = vpop.f32.mrb[33].mxu1 }
 0x64a   :  { %v5773_v34 = vadd.f32 %v5772_v58, %v5771_v20  ;;  %v5795_v14 = vadd.f32 %v5794_v21, %v5793_v26  ;;  %v5774_v59 = vpop.f32.mrb[34].mxu0  ;;  %v5796_v3 = vpop.f32.mrb[34].mxu1 }
 0x64b   :  { %v5775_v4 = vpop.f32.mrb[35].mxu0  ;;  %v5797_v22 = vpop.f32.mrb[35].mxu1 }
 0x64c   :  { %v5090_v35 = vadd.f32 %v5773_v34, %v5722_v33  ;;  %v5776_v36 = vadd.f32 %v5775_v4, %v5774_v59  ;;  %v5798_v15 = vadd.f32 %v5797_v22, %v5796_v3 }
 0x64e   :  { %v5131_v12 = vadd.f32 %v5795_v14, %v5090_v35  ;;  %v5093_v13 = vadd.f32 %v5776_v36, %v5722_v33 }
 0x650   :  { %5137 = vst [vmem:[%s6807_s30] sm:$0xff] %v5131_v12  ;;  %v5134_v31 = vadd.f32 %v5798_v15, %v5093_v13 }
 0x652   :  { %5138 = vst [vmem:[%s6807_s30 + $0x8] sm:$0xff] %v5134_v31 }
 0x653   :  { %5143 = vsyncpa [#allocation3], 1 }
 0x654   :  { %5144 = vsyncpa [#allocation5], 1 }
 0x655   :  { %5145 = vsyncpa [#allocation8], 1 }

</bundles_post_ra>
